<compile_context>
chip_gen: v5e
topology: v5e:2x2
jax: 0.10.0
libtpu: 0.0.40
codegen_flags: <defaults>
</compile_context>

<pallas_src>
import functools
import math

import jax
import jax.numpy as jnp
from jax.experimental import pallas as pl
from jax.experimental.pallas import tpu as pltpu

LEAK = 0.1   # nn.LeakyReLU(0.1) in the original module
EPS = 1e-5   # nn.InstanceNorm2d default eps


# ----------------------------- Pallas kernels ------------------------------

def _conv_kernel(p_ref, w_ref, b_ref, o_ref, *, n, p, use_norm):
    """One branch, full batch: fused matmul + bias + InstanceNorm + LeakyReLU.

    p_ref: (1, N*P, K)    bf16 im2col patches (rows: sample-major, then spatial)
    w_ref: (1, K, Cout)   bf16 reshaped conv weight for this branch
    b_ref: (1, 1, Cout)   f32 bias
    o_ref: (1, P, N*Cout) lane-dense output (N*Cout = 128 for N=2, Cout=64)
    """
    x = p_ref[0]                                   # (N*P, K) bf16
    w = w_ref[0]                                   # (K, Cout) bf16
    y = jnp.dot(x, w, preferred_element_type=jnp.float32)   # MXU, f32 accum
    y = y + b_ref[0]                               # (N*P, Cout) f32

    cols = []
    for i in range(n):                             # static unroll over batch
        yi = y[i * p:(i + 1) * p]                  # (P, Cout), sample i
        if use_norm:
            # InstanceNorm2d(affine=False): per-sample per-channel over spatial,
            # biased variance, eps=1e-5.
            mean = jnp.mean(yi, axis=0, keepdims=True)
            var = jnp.mean((yi - mean) ** 2, axis=0, keepdims=True)
            yi = (yi - mean) * jax.lax.rsqrt(var + EPS)
        cols.append(yi)
    z = jnp.concatenate(cols, axis=-1)             # (P, N*Cout) -> lane-dense
    z = jnp.where(z > 0, z, LEAK * z)              # LeakyReLU(0.1)
    o_ref[0] = z.astype(o_ref.dtype)


def _head_kernel(x_ref, w1_ref, b1_ref, w2_ref, b2_ref, out_ref, feat_ref):
    """Fused Linear(512->1024) + LeakyReLU(0.1) and Linear(1024->1)."""
    h = jnp.dot(x_ref[...], w1_ref[...], preferred_element_type=jnp.float32)
    h = h + b1_ref[...]
    h = jnp.where(h > 0, h, LEAK * h)              # (N, 1024) f32
    feat_ref[...] = h.astype(feat_ref.dtype)
    o = jnp.dot(h, w2_ref[...], preferred_element_type=jnp.float32) + b2_ref[...]
    out_ref[...] = o.astype(out_ref.dtype)


# ------------------------------ layer wrappers ------------------------------

def _im2col(x):
    """x: (G, N, H, W, C) -> patches (G, N*OH*OW, 16*C) for k=4, s=2, pad=1."""
    g, n, h, w, c = x.shape
    oh, ow = h // 2, w // 2
    xp = jnp.pad(x, ((0, 0), (0, 0), (1, 1), (1, 1), (0, 0)))
    taps = []
    for kh in range(4):
        for kw in range(4):
            taps.append(xp[:, :, kh:kh + 2 * oh:2, kw:kw + 2 * ow:2, :])
    patches = jnp.stack(taps, axis=4)              # (G, N, OH, OW, 16, C)
    return patches.reshape(g, n * oh * ow, 16 * c), oh, ow


def _conv_wmat(w_torch):
    """(Cout, Cin, 4, 4) torch layout -> (16*Cin, Cout), matching im2col K order."""
    cout = w_torch.shape[0]
    return jnp.transpose(w_torch, (2, 3, 1, 0)).reshape(-1, cout)


def conv_layer(patches, w_stack, b_stack, *, n, p, use_norm):
    """patches: (2, N*P, K) bf16; w_stack: (2, K, Cout) bf16; b_stack: (2, 1, Cout) f32."""
    g, n_p, k = patches.shape
    cout = w_stack.shape[-1]
    return pl.pallas_call(
        functools.partial(_conv_kernel, n=n, p=p, use_norm=use_norm),
        out_shape=jax.ShapeDtypeStruct((g, p, n * cout), jnp.bfloat16),
        grid=(g,),
        in_specs=[
            pl.BlockSpec((1, n_p, k), lambda i: (i, 0, 0)),
            pl.BlockSpec((1, k, cout), lambda i: (i, 0, 0)),
            pl.BlockSpec((1, 1, cout), lambda i: (i, 0, 0)),
        ],
        out_specs=pl.BlockSpec((1, p, n * cout), lambda i: (i, 0, 0)),
        compiler_params=pltpu.CompilerParams(
            dimension_semantics=("parallel",)),       # v7x: split branches over 2 TCs
    )(patches, w_stack, b_stack)


def head(x, w1_t, b1, w2_t, b2):
    """x: (N, 512) concatenated branch features. Returns (out (N,1), feature (N,1024))."""
    n = x.shape[0]
    w1 = jnp.transpose(w1_t).astype(jnp.bfloat16)     # (512, 1024)
    b1m = b1.reshape(1, -1).astype(jnp.float32)       # (1, 1024)
    w2 = jnp.transpose(w2_t).astype(jnp.float32)      # (1024, 1)
    b2m = b2.reshape(1, -1).astype(jnp.float32)       # (1, 1)
    dmid = w1.shape[1]
    out, feat = pl.pallas_call(
        _head_kernel,
        out_shape=(jax.ShapeDtypeStruct((n, 1), jnp.float32),
                   jax.ShapeDtypeStruct((n, dmid), jnp.float32)),
        grid=(1,),
        in_specs=[
            pl.BlockSpec(x.shape, lambda i: (0, 0)),
            pl.BlockSpec(w1.shape, lambda i: (0, 0)),
            pl.BlockSpec(b1m.shape, lambda i: (0, 0)),
            pl.BlockSpec(w2.shape, lambda i: (0, 0)),
            pl.BlockSpec(b2m.shape, lambda i: (0, 0)),
        ],
        out_specs=(pl.BlockSpec((n, 1), lambda i: (0, 0)),
                   pl.BlockSpec((n, dmid), lambda i: (0, 0))),
    )(x.astype(jnp.bfloat16), w1, b1m, w2, b2m)
    return out, feat


# ------------------------------ full forward --------------------------------

def discriminatorxx_forward(params, img1_nchw, img2_nchw):
    # NCHW -> NHWC, stack the two branches on a leading "branch" axis.
    x1 = jnp.transpose(img1_nchw, (0, 2, 3, 1))
    x2 = jnp.transpose(img2_nchw, (0, 2, 3, 1))
    x = jnp.stack([x1, x2], axis=0).astype(jnp.bfloat16)     # (2, N, H, W, C)
    n = x.shape[1]

    for layer in range(1, 5):
        patches, oh, ow = _im2col(x)                         # (2, N*P, 16*Cin)
        p = oh * ow
        w_stack = jnp.stack(
            [_conv_wmat(params[f"a{layer}_w"]),
             _conv_wmat(params[f"b{layer}_w"])], axis=0).astype(jnp.bfloat16)
        b_stack = jnp.stack(
            [params[f"a{layer}_b"], params[f"b{layer}_b"]], axis=0)
        b_stack = b_stack.reshape(2, 1, -1).astype(jnp.float32)
        out = conv_layer(patches, w_stack, b_stack,
                         n=n, p=p, use_norm=(layer > 1))     # (2, P, N*64) bf16
        cout = out.shape[-1] // n
        # back to (branch, sample, OH, OW, C) for the next layer's im2col
        x = jnp.transpose(out.reshape(2, oh, ow, n, cout), (0, 3, 1, 2, 4))

    # torch-order flatten (.view(-1, 64*2*2) from NCHW) + branch concat:
    # f[s, g*256 + c*4 + h*2 + w]  ->  (N, 512)
    f_cat = jnp.transpose(x, (1, 0, 4, 2, 3)).reshape(n, -1)
    out, feature = head(f_cat, params["l1_w"], params["l1_b"],
                        params["l2_w"], params["l2_b"])
    return out, feature


# ------------------------------ parameter init ------------------------------

def _init_conv(key, cout, cin):
    k1, k2 = jax.random.split(key)
    bound = 1.0 / math.sqrt(cin * 16)
    w = jax.random.uniform(k1, (cout, cin, 4, 4), jnp.float32, -bound, bound)
    b = jax.random.uniform(k2, (cout,), jnp.float32, -bound, bound)
    return w, b


def _init_linear(key, dout, din):
    k1, k2 = jax.random.split(key)
    bound = 1.0 / math.sqrt(din)
    w = jax.random.uniform(k1, (dout, din), jnp.float32, -bound, bound)
    b = jax.random.uniform(k2, (dout,), jnp.float32, -bound, bound)
    return w, b


def init_params(key):
    keys = jax.random.split(key, 10)
    params = {}
    cins = [1, 64, 64, 64]
    for i in range(4):                       # branch 1 (img_layer1..4)
        w, b = _init_conv(keys[i], 64, cins[i])
        params[f"a{i+1}_w"], params[f"a{i+1}_b"] = w, b
    for i in range(4):                       # branch 2 (img_layer5..8)
        w, b = _init_conv(keys[4 + i], 64, cins[i])
        params[f"b{i+1}_w"], params[f"b{i+1}_b"] = w, b
    params["l1_w"], params["l1_b"] = _init_linear(keys[8], 1024, 64 * 2 * 2 * 2)
    params["l2_w"], params["l2_b"] = _init_linear(keys[9], 1, 1024)
    return params


# ---------------------------------- main -------------------------------------

if __name__ == "__main__":
    key = jax.random.PRNGKey(0)
    kp, k1, k2 = jax.random.split(key, 3)

    params = init_params(kp)
    # Spatial must be 32x32 so the 4 stride-2 convs yield 2x2 (view 64*2*2).
    img1 = jax.random.normal(k1, (2, 1, 32, 32), jnp.float32)  # NCHW like PyTorch
    img2 = jax.random.normal(k2, (2, 1, 32, 32), jnp.float32)

    fwd = jax.jit(discriminatorxx_forward)
    out, feature = fwd(params, img1, img2)
    out = jax.block_until_ready(out)
    feature = jax.block_until_ready(feature)

    assert out.shape == (2, 1), out.shape
    assert feature.shape == (2, 1024), feature.shape
    assert jnp.all(jnp.isfinite(out)) and jnp.all(jnp.isfinite(feature))
    print("KERNEL_OK")
</pallas_src>

<mosaic_0001>
module attributes {stable_mosaic.version = 11 : i64} {
  func.func @_conv_kernel(%arg0: i32, %arg1: memref<1x512x16xbf16, #tpu.memory_space<vmem>>, %arg2: memref<1x16x64xbf16, #tpu.memory_space<vmem>>, %arg3: memref<1x1x64xf32, #tpu.memory_space<vmem>>, %arg4: memref<1x256x128xbf16, #tpu.memory_space<vmem>>) attributes {dimension_semantics = [#tpu.dimension_semantics<parallel>], iteration_bounds = array<i64: 2>, scalar_prefetch = 0 : i64, scratch_operands = 0 : i64, tpu.core_type = #tpu.core_type<tc>, window_params = [{transform_indices = @transform_0, window_bounds = array<i64: 1, 512, 16>}, {transform_indices = @transform_1, window_bounds = array<i64: 1, 16, 64>}, {transform_indices = @transform_2, window_bounds = array<i64: 1, 1, 64>}, {transform_indices = @transform_3, window_bounds = array<i64: 1, 256, 128>}]} {
    %c0 = arith.constant 0 : index
    %c0_0 = arith.constant 0 : index
    %c0_1 = arith.constant 0 : index
    %0 = vector.load %arg1[%c0, %c0_0, %c0_1] : memref<1x512x16xbf16, #tpu.memory_space<vmem>>, vector<1x512x16xbf16>
    %1 = vector.shape_cast %0 : vector<1x512x16xbf16> to vector<512x16xbf16>
    %c0_2 = arith.constant 0 : index
    %c0_3 = arith.constant 0 : index
    %c0_4 = arith.constant 0 : index
    %2 = vector.load %arg2[%c0_2, %c0_3, %c0_4] : memref<1x16x64xbf16, #tpu.memory_space<vmem>>, vector<1x16x64xbf16>
    %3 = vector.shape_cast %2 : vector<1x16x64xbf16> to vector<16x64xbf16>
    %cst = arith.constant dense<0.000000e+00> : vector<512x64xf32>
    %4 = tpu.matmul %1, %3, %cst {dimension_numbers = #tpu.dot_dimension_numbers<[1], [0], [0], [1], [0, 0, 1, 1], [], []>} : vector<512x16xbf16>, vector<16x64xbf16>, vector<512x64xf32> -> vector<512x64xf32>
    %c0_5 = arith.constant 0 : index
    %c0_6 = arith.constant 0 : index
    %c0_7 = arith.constant 0 : index
    %5 = vector.load %arg3[%c0_5, %c0_6, %c0_7] : memref<1x1x64xf32, #tpu.memory_space<vmem>>, vector<1x1x64xf32>
    %6 = vector.shape_cast %5 : vector<1x1x64xf32> to vector<1x64xf32>
    %7 = vector.broadcast %6 : vector<1x64xf32> to vector<512x64xf32>
    %8 = arith.addf %4, %7 : vector<512x64xf32>
    %9 = vector.extract_strided_slice %8 {offsets = [0, 0], sizes = [256, 64], strides = [1, 1]} : vector<512x64xf32> to vector<256x64xf32>
    %10 = vector.extract_strided_slice %8 {offsets = [256, 0], sizes = [256, 64], strides = [1, 1]} : vector<512x64xf32> to vector<256x64xf32>
    %11 = tpu.concatenate %9, %10 in 1 : vector<256x64xf32>, vector<256x64xf32> -> vector<256x128xf32>
    %cst_8 = arith.constant 0.000000e+00 : f32
    %12 = vector.broadcast %cst_8 : f32 to vector<256x128xf32>
    %13 = arith.cmpf ogt, %11, %12 : vector<256x128xf32>
    %cst_9 = arith.constant 1.000000e-01 : f32
    %14 = vector.broadcast %cst_9 : f32 to vector<256x128xf32>
    %15 = arith.mulf %14, %11 : vector<256x128xf32>
    %16 = arith.select %13, %11, %15 : vector<256x128xi1>, vector<256x128xf32>
    %17 = arith.truncf %16 : vector<256x128xf32> to vector<256x128xbf16>
    %c0_10 = arith.constant 0 : index
    %c0_11 = arith.constant 0 : index
    %c0_12 = arith.constant 0 : index
    %18 = vector.load %arg4[%c0_10, %c0_11, %c0_12] : memref<1x256x128xbf16, #tpu.memory_space<vmem>>, vector<1x256x128xbf16>
    %19 = vector.shape_cast %18 : vector<1x256x128xbf16> to vector<256x128xbf16>
    %20 = vector.shape_cast %17 : vector<256x128xbf16> to vector<1x256x128xbf16>
    tpu.vector_store %arg4[%c0_10, %c0_11, %c0_12], %20 {strides = array<i32>} : memref<1x256x128xbf16, #tpu.memory_space<vmem>>, vector<1x256x128xbf16>,
    return
  }
  func.func @transform_0(%arg0: i32) -> (i32, i32, i32) {
    %c0_i32 = arith.constant 0 : i32
    %c0_i32_0 = arith.constant 0 : i32
    %c0_i32_1 = arith.constant 0 : i32
    return %arg0, %c0_i32, %c0_i32_0 : i32, i32, i32
  }
  func.func @transform_1(%arg0: i32) -> (i32, i32, i32) {
    %c0_i32 = arith.constant 0 : i32
    %c0_i32_0 = arith.constant 0 : i32
    %c0_i32_1 = arith.constant 0 : i32
    return %arg0, %c0_i32, %c0_i32_0 : i32, i32, i32
  }
  func.func @transform_2(%arg0: i32) -> (i32, i32, i32) {
    %c0_i32 = arith.constant 0 : i32
    %c0_i32_0 = arith.constant 0 : i32
    %c0_i32_1 = arith.constant 0 : i32
    return %arg0, %c0_i32, %c0_i32_0 : i32, i32, i32
  }
  func.func @transform_3(%arg0: i32) -> (i32, i32, i32) {
    %c0_i32 = arith.constant 0 : i32
    %c0_i32_0 = arith.constant 0 : i32
    %c0_i32_1 = arith.constant 0 : i32
    return %arg0, %c0_i32, %c0_i32_0 : i32, i32, i32
  }
}

module attributes {stable_mosaic.version = 11 : i64} {
  func.func @_conv_kernel(%arg0: i32, %arg1: memref<1x128x1024xbf16, #tpu.memory_space<vmem>>, %arg2: memref<1x1024x64xbf16, #tpu.memory_space<vmem>>, %arg3: memref<1x1x64xf32, #tpu.memory_space<vmem>>, %arg4: memref<1x64x128xbf16, #tpu.memory_space<vmem>>) attributes {dimension_semantics = [#tpu.dimension_semantics<parallel>], iteration_bounds = array<i64: 2>, scalar_prefetch = 0 : i64, scratch_operands = 0 : i64, tpu.core_type = #tpu.core_type<tc>, window_params = [{transform_indices = @transform_0, window_bounds = array<i64: 1, 128, 1024>}, {transform_indices = @transform_1, window_bounds = array<i64: 1, 1024, 64>}, {transform_indices = @transform_2, window_bounds = array<i64: 1, 1, 64>}, {transform_indices = @transform_3, window_bounds = array<i64: 1, 64, 128>}]} {
    %c0 = arith.constant 0 : index
    %c0_0 = arith.constant 0 : index
    %c0_1 = arith.constant 0 : index
    %0 = vector.load %arg1[%c0, %c0_0, %c0_1] : memref<1x128x1024xbf16, #tpu.memory_space<vmem>>, vector<1x128x1024xbf16>
    %1 = vector.shape_cast %0 : vector<1x128x1024xbf16> to vector<128x1024xbf16>
    %c0_2 = arith.constant 0 : index
    %c0_3 = arith.constant 0 : index
    %c0_4 = arith.constant 0 : index
    %2 = vector.load %arg2[%c0_2, %c0_3, %c0_4] : memref<1x1024x64xbf16, #tpu.memory_space<vmem>>, vector<1x1024x64xbf16>
    %3 = vector.shape_cast %2 : vector<1x1024x64xbf16> to vector<1024x64xbf16>
    %cst = arith.constant dense<0.000000e+00> : vector<128x64xf32>
    %4 = tpu.matmul %1, %3, %cst {dimension_numbers = #tpu.dot_dimension_numbers<[1], [0], [0], [1], [0, 0, 1, 1], [], []>} : vector<128x1024xbf16>, vector<1024x64xbf16>, vector<128x64xf32> -> vector<128x64xf32>
    %c0_5 = arith.constant 0 : index
    %c0_6 = arith.constant 0 : index
    %c0_7 = arith.constant 0 : index
    %5 = vector.load %arg3[%c0_5, %c0_6, %c0_7] : memref<1x1x64xf32, #tpu.memory_space<vmem>>, vector<1x1x64xf32>
    %6 = vector.shape_cast %5 : vector<1x1x64xf32> to vector<1x64xf32>
    %7 = vector.broadcast %6 : vector<1x64xf32> to vector<128x64xf32>
    %8 = arith.addf %4, %7 : vector<128x64xf32>
    %9 = vector.extract_strided_slice %8 {offsets = [0, 0], sizes = [64, 64], strides = [1, 1]} : vector<128x64xf32> to vector<64x64xf32>
    %cst_8 = arith.constant dense<0.000000e+00> : vector<64xf32>
    %10 = vector.multi_reduction <add>, %9, %cst_8 [0] : vector<64x64xf32> to vector<64xf32>
    %11 = vector.shape_cast %10 : vector<64xf32> to vector<1x64xf32>
    %cst_9 = arith.constant 6.400000e+01 : f32
    %12 = vector.broadcast %cst_9 : f32 to vector<1x64xf32>
    %13 = arith.divf %11, %12 : vector<1x64xf32>
    %14 = vector.broadcast %13 : vector<1x64xf32> to vector<64x64xf32>
    %15 = arith.subf %9, %14 : vector<64x64xf32>
    %16 = arith.mulf %15, %15 : vector<64x64xf32>
    %cst_10 = arith.constant dense<0.000000e+00> : vector<64xf32>
    %17 = vector.multi_reduction <add>, %16, %cst_10 [0] : vector<64x64xf32> to vector<64xf32>
    %18 = vector.shape_cast %17 : vector<64xf32> to vector<1x64xf32>
    %cst_11 = arith.constant 6.400000e+01 : f32
    %19 = vector.broadcast %cst_11 : f32 to vector<1x64xf32>
    %20 = arith.divf %18, %19 : vector<1x64xf32>
    %21 = vector.broadcast %13 : vector<1x64xf32> to vector<64x64xf32>
    %22 = arith.subf %9, %21 : vector<64x64xf32>
    %cst_12 = arith.constant 9.99999974E-6 : f32
    %23 = vector.broadcast %cst_12 : f32 to vector<1x64xf32>
    %24 = arith.addf %20, %23 : vector<1x64xf32>
    %25 = math.rsqrt %24 : vector<1x64xf32>
    %26 = vector.broadcast %25 : vector<1x64xf32> to vector<64x64xf32>
    %27 = arith.mulf %22, %26 : vector<64x64xf32>
    %28 = vector.extract_strided_slice %8 {offsets = [64, 0], sizes = [64, 64], strides = [1, 1]} : vector<128x64xf32> to vector<64x64xf32>
    %cst_13 = arith.constant dense<0.000000e+00> : vector<64xf32>
    %29 = vector.multi_reduction <add>, %28, %cst_13 [0] : vector<64x64xf32> to vector<64xf32>
    %30 = vector.shape_cast %29 : vector<64xf32> to vector<1x64xf32>
    %cst_14 = arith.constant 6.400000e+01 : f32
    %31 = vector.broadcast %cst_14 : f32 to vector<1x64xf32>
    %32 = arith.divf %30, %31 : vector<1x64xf32>
    %33 = vector.broadcast %32 : vector<1x64xf32> to vector<64x64xf32>
    %34 = arith.subf %28, %33 : vector<64x64xf32>
    %35 = arith.mulf %34, %34 : vector<64x64xf32>
    %cst_15 = arith.constant dense<0.000000e+00> : vector<64xf32>
    %36 = vector.multi_reduction <add>, %35, %cst_15 [0] : vector<64x64xf32> to vector<64xf32>
    %37 = vector.shape_cast %36 : vector<64xf32> to vector<1x64xf32>
    %cst_16 = arith.constant 6.400000e+01 : f32
    %38 = vector.broadcast %cst_16 : f32 to vector<1x64xf32>
    %39 = arith.divf %37, %38 : vector<1x64xf32>
    %40 = vector.broadcast %32 : vector<1x64xf32> to vector<64x64xf32>
    %41 = arith.subf %28, %40 : vector<64x64xf32>
    %cst_17 = arith.constant 9.99999974E-6 : f32
    %42 = vector.broadcast %cst_17 : f32 to vector<1x64xf32>
    %43 = arith.addf %39, %42 : vector<1x64xf32>
    %44 = math.rsqrt %43 : vector<1x64xf32>
    %45 = vector.broadcast %44 : vector<1x64xf32> to vector<64x64xf32>
    %46 = arith.mulf %41, %45 : vector<64x64xf32>
    %47 = tpu.concatenate %27, %46 in 1 : vector<64x64xf32>, vector<64x64xf32> -> vector<64x128xf32>
    %cst_18 = arith.constant 0.000000e+00 : f32
    %48 = vector.broadcast %cst_18 : f32 to vector<64x128xf32>
    %49 = arith.cmpf ogt, %47, %48 : vector<64x128xf32>
    %cst_19 = arith.constant 1.000000e-01 : f32
    %50 = vector.broadcast %cst_19 : f32 to vector<64x128xf32>
    %51 = arith.mulf %50, %47 : vector<64x128xf32>
    %52 = arith.select %49, %47, %51 : vector<64x128xi1>, vector<64x128xf32>
    %53 = arith.truncf %52 : vector<64x128xf32> to vector<64x128xbf16>
    %c0_20 = arith.constant 0 : index
    %c0_21 = arith.constant 0 : index
    %c0_22 = arith.constant 0 : index
    %54 = vector.load %arg4[%c0_20, %c0_21, %c0_22] : memref<1x64x128xbf16, #tpu.memory_space<vmem>>, vector<1x64x128xbf16>
    %55 = vector.shape_cast %54 : vector<1x64x128xbf16> to vector<64x128xbf16>
    %56 = vector.shape_cast %53 : vector<64x128xbf16> to vector<1x64x128xbf16>
    tpu.vector_store %arg4[%c0_20, %c0_21, %c0_22], %56 {strides = array<i32>} : memref<1x64x128xbf16, #tpu.memory_space<vmem>>, vector<1x64x128xbf16>,
    return
  }
  func.func @transform_0(%arg0: i32) -> (i32, i32, i32) {
    %c0_i32 = arith.constant 0 : i32
    %c0_i32_0 = arith.constant 0 : i32
    %c0_i32_1 = arith.constant 0 : i32
    return %arg0, %c0_i32, %c0_i32_0 : i32, i32, i32
  }
  func.func @transform_1(%arg0: i32) -> (i32, i32, i32) {
    %c0_i32 = arith.constant 0 : i32
    %c0_i32_0 = arith.constant 0 : i32
    %c0_i32_1 = arith.constant 0 : i32
    return %arg0, %c0_i32, %c0_i32_0 : i32, i32, i32
  }
  func.func @transform_2(%arg0: i32) -> (i32, i32, i32) {
    %c0_i32 = arith.constant 0 : i32
    %c0_i32_0 = arith.constant 0 : i32
    %c0_i32_1 = arith.constant 0 : i32
    return %arg0, %c0_i32, %c0_i32_0 : i32, i32, i32
  }
  func.func @transform_3(%arg0: i32) -> (i32, i32, i32) {
    %c0_i32 = arith.constant 0 : i32
    %c0_i32_0 = arith.constant 0 : i32
    %c0_i32_1 = arith.constant 0 : i32
    return %arg0, %c0_i32, %c0_i32_0 : i32, i32, i32
  }
}

module attributes {stable_mosaic.version = 11 : i64} {
  func.func @_conv_kernel(%arg0: i32, %arg1: memref<1x32x1024xbf16, #tpu.memory_space<vmem>>, %arg2: memref<1x1024x64xbf16, #tpu.memory_space<vmem>>, %arg3: memref<1x1x64xf32, #tpu.memory_space<vmem>>, %arg4: memref<1x16x128xbf16, #tpu.memory_space<vmem>>) attributes {dimension_semantics = [#tpu.dimension_semantics<parallel>], iteration_bounds = array<i64: 2>, scalar_prefetch = 0 : i64, scratch_operands = 0 : i64, tpu.core_type = #tpu.core_type<tc>, window_params = [{transform_indices = @transform_0, window_bounds = array<i64: 1, 32, 1024>}, {transform_indices = @transform_1, window_bounds = array<i64: 1, 1024, 64>}, {transform_indices = @transform_2, window_bounds = array<i64: 1, 1, 64>}, {transform_indices = @transform_3, window_bounds = array<i64: 1, 16, 128>}]} {
    %c0 = arith.constant 0 : index
    %c0_0 = arith.constant 0 : index
    %c0_1 = arith.constant 0 : index
    %0 = vector.load %arg1[%c0, %c0_0, %c0_1] : memref<1x32x1024xbf16, #tpu.memory_space<vmem>>, vector<1x32x1024xbf16>
    %1 = vector.shape_cast %0 : vector<1x32x1024xbf16> to vector<32x1024xbf16>
    %c0_2 = arith.constant 0 : index
    %c0_3 = arith.constant 0 : index
    %c0_4 = arith.constant 0 : index
    %2 = vector.load %arg2[%c0_2, %c0_3, %c0_4] : memref<1x1024x64xbf16, #tpu.memory_space<vmem>>, vector<1x1024x64xbf16>
    %3 = vector.shape_cast %2 : vector<1x1024x64xbf16> to vector<1024x64xbf16>
    %cst = arith.constant dense<0.000000e+00> : vector<32x64xf32>
    %4 = tpu.matmul %1, %3, %cst {dimension_numbers = #tpu.dot_dimension_numbers<[1], [0], [0], [1], [0, 0, 1, 1], [], []>} : vector<32x1024xbf16>, vector<1024x64xbf16>, vector<32x64xf32> -> vector<32x64xf32>
    %c0_5 = arith.constant 0 : index
    %c0_6 = arith.constant 0 : index
    %c0_7 = arith.constant 0 : index
    %5 = vector.load %arg3[%c0_5, %c0_6, %c0_7] : memref<1x1x64xf32, #tpu.memory_space<vmem>>, vector<1x1x64xf32>
    %6 = vector.shape_cast %5 : vector<1x1x64xf32> to vector<1x64xf32>
    %7 = vector.broadcast %6 : vector<1x64xf32> to vector<32x64xf32>
    %8 = arith.addf %4, %7 : vector<32x64xf32>
    %9 = vector.extract_strided_slice %8 {offsets = [0, 0], sizes = [16, 64], strides = [1, 1]} : vector<32x64xf32> to vector<16x64xf32>
    %cst_8 = arith.constant dense<0.000000e+00> : vector<64xf32>
    %10 = vector.multi_reduction <add>, %9, %cst_8 [0] : vector<16x64xf32> to vector<64xf32>
    %11 = vector.shape_cast %10 : vector<64xf32> to vector<1x64xf32>
    %cst_9 = arith.constant 1.600000e+01 : f32
    %12 = vector.broadcast %cst_9 : f32 to vector<1x64xf32>
    %13 = arith.divf %11, %12 : vector<1x64xf32>
    %14 = vector.broadcast %13 : vector<1x64xf32> to vector<16x64xf32>
    %15 = arith.subf %9, %14 : vector<16x64xf32>
    %16 = arith.mulf %15, %15 : vector<16x64xf32>
    %cst_10 = arith.constant dense<0.000000e+00> : vector<64xf32>
    %17 = vector.multi_reduction <add>, %16, %cst_10 [0] : vector<16x64xf32> to vector<64xf32>
    %18 = vector.shape_cast %17 : vector<64xf32> to vector<1x64xf32>
    %cst_11 = arith.constant 1.600000e+01 : f32
    %19 = vector.broadcast %cst_11 : f32 to vector<1x64xf32>
    %20 = arith.divf %18, %19 : vector<1x64xf32>
    %21 = vector.broadcast %13 : vector<1x64xf32> to vector<16x64xf32>
    %22 = arith.subf %9, %21 : vector<16x64xf32>
    %cst_12 = arith.constant 9.99999974E-6 : f32
    %23 = vector.broadcast %cst_12 : f32 to vector<1x64xf32>
    %24 = arith.addf %20, %23 : vector<1x64xf32>
    %25 = math.rsqrt %24 : vector<1x64xf32>
    %26 = vector.broadcast %25 : vector<1x64xf32> to vector<16x64xf32>
    %27 = arith.mulf %22, %26 : vector<16x64xf32>
    %28 = vector.extract_strided_slice %8 {offsets = [16, 0], sizes = [16, 64], strides = [1, 1]} : vector<32x64xf32> to vector<16x64xf32>
    %cst_13 = arith.constant dense<0.000000e+00> : vector<64xf32>
    %29 = vector.multi_reduction <add>, %28, %cst_13 [0] : vector<16x64xf32> to vector<64xf32>
    %30 = vector.shape_cast %29 : vector<64xf32> to vector<1x64xf32>
    %cst_14 = arith.constant 1.600000e+01 : f32
    %31 = vector.broadcast %cst_14 : f32 to vector<1x64xf32>
    %32 = arith.divf %30, %31 : vector<1x64xf32>
    %33 = vector.broadcast %32 : vector<1x64xf32> to vector<16x64xf32>
    %34 = arith.subf %28, %33 : vector<16x64xf32>
    %35 = arith.mulf %34, %34 : vector<16x64xf32>
    %cst_15 = arith.constant dense<0.000000e+00> : vector<64xf32>
    %36 = vector.multi_reduction <add>, %35, %cst_15 [0] : vector<16x64xf32> to vector<64xf32>
    %37 = vector.shape_cast %36 : vector<64xf32> to vector<1x64xf32>
    %cst_16 = arith.constant 1.600000e+01 : f32
    %38 = vector.broadcast %cst_16 : f32 to vector<1x64xf32>
    %39 = arith.divf %37, %38 : vector<1x64xf32>
    %40 = vector.broadcast %32 : vector<1x64xf32> to vector<16x64xf32>
    %41 = arith.subf %28, %40 : vector<16x64xf32>
    %cst_17 = arith.constant 9.99999974E-6 : f32
    %42 = vector.broadcast %cst_17 : f32 to vector<1x64xf32>
    %43 = arith.addf %39, %42 : vector<1x64xf32>
    %44 = math.rsqrt %43 : vector<1x64xf32>
    %45 = vector.broadcast %44 : vector<1x64xf32> to vector<16x64xf32>
    %46 = arith.mulf %41, %45 : vector<16x64xf32>
    %47 = tpu.concatenate %27, %46 in 1 : vector<16x64xf32>, vector<16x64xf32> -> vector<16x128xf32>
    %cst_18 = arith.constant 0.000000e+00 : f32
    %48 = vector.broadcast %cst_18 : f32 to vector<16x128xf32>
    %49 = arith.cmpf ogt, %47, %48 : vector<16x128xf32>
    %cst_19 = arith.constant 1.000000e-01 : f32
    %50 = vector.broadcast %cst_19 : f32 to vector<16x128xf32>
    %51 = arith.mulf %50, %47 : vector<16x128xf32>
    %52 = arith.select %49, %47, %51 : vector<16x128xi1>, vector<16x128xf32>
    %53 = arith.truncf %52 : vector<16x128xf32> to vector<16x128xbf16>
    %c0_20 = arith.constant 0 : index
    %c0_21 = arith.constant 0 : index
    %c0_22 = arith.constant 0 : index
    %54 = vector.load %arg4[%c0_20, %c0_21, %c0_22] : memref<1x16x128xbf16, #tpu.memory_space<vmem>>, vector<1x16x128xbf16>
    %55 = vector.shape_cast %54 : vector<1x16x128xbf16> to vector<16x128xbf16>
    %56 = vector.shape_cast %53 : vector<16x128xbf16> to vector<1x16x128xbf16>
    tpu.vector_store %arg4[%c0_20, %c0_21, %c0_22], %56 {strides = array<i32>} : memref<1x16x128xbf16, #tpu.memory_space<vmem>>, vector<1x16x128xbf16>,
    return
  }
  func.func @transform_0(%arg0: i32) -> (i32, i32, i32) {
    %c0_i32 = arith.constant 0 : i32
    %c0_i32_0 = arith.constant 0 : i32
    %c0_i32_1 = arith.constant 0 : i32
    return %arg0, %c0_i32, %c0_i32_0 : i32, i32, i32
  }
  func.func @transform_1(%arg0: i32) -> (i32, i32, i32) {
    %c0_i32 = arith.constant 0 : i32
    %c0_i32_0 = arith.constant 0 : i32
    %c0_i32_1 = arith.constant 0 : i32
    return %arg0, %c0_i32, %c0_i32_0 : i32, i32, i32
  }
  func.func @transform_2(%arg0: i32) -> (i32, i32, i32) {
    %c0_i32 = arith.constant 0 : i32
    %c0_i32_0 = arith.constant 0 : i32
    %c0_i32_1 = arith.constant 0 : i32
    return %arg0, %c0_i32, %c0_i32_0 : i32, i32, i32
  }
  func.func @transform_3(%arg0: i32) -> (i32, i32, i32) {
    %c0_i32 = arith.constant 0 : i32
    %c0_i32_0 = arith.constant 0 : i32
    %c0_i32_1 = arith.constant 0 : i32
    return %arg0, %c0_i32, %c0_i32_0 : i32, i32, i32
  }
}

module attributes {stable_mosaic.version = 11 : i64} {
  func.func @_conv_kernel(%arg0: i32, %arg1: memref<1x8x1024xbf16, #tpu.memory_space<vmem>>, %arg2: memref<1x1024x64xbf16, #tpu.memory_space<vmem>>, %arg3: memref<1x1x64xf32, #tpu.memory_space<vmem>>, %arg4: memref<1x4x128xbf16, #tpu.memory_space<vmem>>) attributes {dimension_semantics = [#tpu.dimension_semantics<parallel>], iteration_bounds = array<i64: 2>, scalar_prefetch = 0 : i64, scratch_operands = 0 : i64, tpu.core_type = #tpu.core_type<tc>, window_params = [{transform_indices = @transform_0, window_bounds = array<i64: 1, 8, 1024>}, {transform_indices = @transform_1, window_bounds = array<i64: 1, 1024, 64>}, {transform_indices = @transform_2, window_bounds = array<i64: 1, 1, 64>}, {transform_indices = @transform_3, window_bounds = array<i64: 1, 4, 128>}]} {
    %c0 = arith.constant 0 : index
    %c0_0 = arith.constant 0 : index
    %c0_1 = arith.constant 0 : index
    %0 = vector.load %arg1[%c0, %c0_0, %c0_1] : memref<1x8x1024xbf16, #tpu.memory_space<vmem>>, vector<1x8x1024xbf16>
    %1 = vector.shape_cast %0 : vector<1x8x1024xbf16> to vector<8x1024xbf16>
    %c0_2 = arith.constant 0 : index
    %c0_3 = arith.constant 0 : index
    %c0_4 = arith.constant 0 : index
    %2 = vector.load %arg2[%c0_2, %c0_3, %c0_4] : memref<1x1024x64xbf16, #tpu.memory_space<vmem>>, vector<1x1024x64xbf16>
    %3 = vector.shape_cast %2 : vector<1x1024x64xbf16> to vector<1024x64xbf16>
    %cst = arith.constant dense<0.000000e+00> : vector<8x64xf32>
    %4 = tpu.matmul %1, %3, %cst {dimension_numbers = #tpu.dot_dimension_numbers<[1], [0], [0], [1], [0, 0, 1, 1], [], []>} : vector<8x1024xbf16>, vector<1024x64xbf16>, vector<8x64xf32> -> vector<8x64xf32>
    %c0_5 = arith.constant 0 : index
    %c0_6 = arith.constant 0 : index
    %c0_7 = arith.constant 0 : index
    %5 = vector.load %arg3[%c0_5, %c0_6, %c0_7] : memref<1x1x64xf32, #tpu.memory_space<vmem>>, vector<1x1x64xf32>
    %6 = vector.shape_cast %5 : vector<1x1x64xf32> to vector<1x64xf32>
    %7 = vector.broadcast %6 : vector<1x64xf32> to vector<8x64xf32>
    %8 = arith.addf %4, %7 : vector<8x64xf32>
    %9 = vector.extract_strided_slice %8 {offsets = [0, 0], sizes = [4, 64], strides = [1, 1]} : vector<8x64xf32> to vector<4x64xf32>
    %cst_8 = arith.constant dense<0.000000e+00> : vector<64xf32>
    %10 = vector.multi_reduction <add>, %9, %cst_8 [0] : vector<4x64xf32> to vector<64xf32>
    %11 = vector.shape_cast %10 : vector<64xf32> to vector<1x64xf32>
    %cst_9 = arith.constant 4.000000e+00 : f32
    %12 = vector.broadcast %cst_9 : f32 to vector<1x64xf32>
    %13 = arith.divf %11, %12 : vector<1x64xf32>
    %14 = vector.broadcast %13 : vector<1x64xf32> to vector<4x64xf32>
    %15 = arith.subf %9, %14 : vector<4x64xf32>
    %16 = arith.mulf %15, %15 : vector<4x64xf32>
    %cst_10 = arith.constant dense<0.000000e+00> : vector<64xf32>
    %17 = vector.multi_reduction <add>, %16, %cst_10 [0] : vector<4x64xf32> to vector<64xf32>
    %18 = vector.shape_cast %17 : vector<64xf32> to vector<1x64xf32>
    %cst_11 = arith.constant 4.000000e+00 : f32
    %19 = vector.broadcast %cst_11 : f32 to vector<1x64xf32>
    %20 = arith.divf %18, %19 : vector<1x64xf32>
    %21 = vector.broadcast %13 : vector<1x64xf32> to vector<4x64xf32>
    %22 = arith.subf %9, %21 : vector<4x64xf32>
    %cst_12 = arith.constant 9.99999974E-6 : f32
    %23 = vector.broadcast %cst_12 : f32 to vector<1x64xf32>
    %24 = arith.addf %20, %23 : vector<1x64xf32>
    %25 = math.rsqrt %24 : vector<1x64xf32>
    %26 = vector.broadcast %25 : vector<1x64xf32> to vector<4x64xf32>
    %27 = arith.mulf %22, %26 : vector<4x64xf32>
    %28 = vector.extract_strided_slice %8 {offsets = [4, 0], sizes = [4, 64], strides = [1, 1]} : vector<8x64xf32> to vector<4x64xf32>
    %cst_13 = arith.constant dense<0.000000e+00> : vector<64xf32>
    %29 = vector.multi_reduction <add>, %28, %cst_13 [0] : vector<4x64xf32> to vector<64xf32>
    %30 = vector.shape_cast %29 : vector<64xf32> to vector<1x64xf32>
    %cst_14 = arith.constant 4.000000e+00 : f32
    %31 = vector.broadcast %cst_14 : f32 to vector<1x64xf32>
    %32 = arith.divf %30, %31 : vector<1x64xf32>
    %33 = vector.broadcast %32 : vector<1x64xf32> to vector<4x64xf32>
    %34 = arith.subf %28, %33 : vector<4x64xf32>
    %35 = arith.mulf %34, %34 : vector<4x64xf32>
    %cst_15 = arith.constant dense<0.000000e+00> : vector<64xf32>
    %36 = vector.multi_reduction <add>, %35, %cst_15 [0] : vector<4x64xf32> to vector<64xf32>
    %37 = vector.shape_cast %36 : vector<64xf32> to vector<1x64xf32>
    %cst_16 = arith.constant 4.000000e+00 : f32
    %38 = vector.broadcast %cst_16 : f32 to vector<1x64xf32>
    %39 = arith.divf %37, %38 : vector<1x64xf32>
    %40 = vector.broadcast %32 : vector<1x64xf32> to vector<4x64xf32>
    %41 = arith.subf %28, %40 : vector<4x64xf32>
    %cst_17 = arith.constant 9.99999974E-6 : f32
    %42 = vector.broadcast %cst_17 : f32 to vector<1x64xf32>
    %43 = arith.addf %39, %42 : vector<1x64xf32>
    %44 = math.rsqrt %43 : vector<1x64xf32>
    %45 = vector.broadcast %44 : vector<1x64xf32> to vector<4x64xf32>
    %46 = arith.mulf %41, %45 : vector<4x64xf32>
    %47 = tpu.concatenate %27, %46 in 1 : vector<4x64xf32>, vector<4x64xf32> -> vector<4x128xf32>
    %cst_18 = arith.constant 0.000000e+00 : f32
    %48 = vector.broadcast %cst_18 : f32 to vector<4x128xf32>
    %49 = arith.cmpf ogt, %47, %48 : vector<4x128xf32>
    %cst_19 = arith.constant 1.000000e-01 : f32
    %50 = vector.broadcast %cst_19 : f32 to vector<4x128xf32>
    %51 = arith.mulf %50, %47 : vector<4x128xf32>
    %52 = arith.select %49, %47, %51 : vector<4x128xi1>, vector<4x128xf32>
    %53 = arith.truncf %52 : vector<4x128xf32> to vector<4x128xbf16>
    %c0_20 = arith.constant 0 : index
    %c0_21 = arith.constant 0 : index
    %c0_22 = arith.constant 0 : index
    %54 = vector.load %arg4[%c0_20, %c0_21, %c0_22] : memref<1x4x128xbf16, #tpu.memory_space<vmem>>, vector<1x4x128xbf16>
    %55 = vector.shape_cast %54 : vector<1x4x128xbf16> to vector<4x128xbf16>
    %56 = vector.shape_cast %53 : vector<4x128xbf16> to vector<1x4x128xbf16>
    tpu.vector_store %arg4[%c0_20, %c0_21, %c0_22], %56 {strides = array<i32>} : memref<1x4x128xbf16, #tpu.memory_space<vmem>>, vector<1x4x128xbf16>,
    return
  }
  func.func @transform_0(%arg0: i32) -> (i32, i32, i32) {
    %c0_i32 = arith.constant 0 : i32
    %c0_i32_0 = arith.constant 0 : i32
    %c0_i32_1 = arith.constant 0 : i32
    return %arg0, %c0_i32, %c0_i32_0 : i32, i32, i32
  }
  func.func @transform_1(%arg0: i32) -> (i32, i32, i32) {
    %c0_i32 = arith.constant 0 : i32
    %c0_i32_0 = arith.constant 0 : i32
    %c0_i32_1 = arith.constant 0 : i32
    return %arg0, %c0_i32, %c0_i32_0 : i32, i32, i32
  }
  func.func @transform_2(%arg0: i32) -> (i32, i32, i32) {
    %c0_i32 = arith.constant 0 : i32
    %c0_i32_0 = arith.constant 0 : i32
    %c0_i32_1 = arith.constant 0 : i32
    return %arg0, %c0_i32, %c0_i32_0 : i32, i32, i32
  }
  func.func @transform_3(%arg0: i32) -> (i32, i32, i32) {
    %c0_i32 = arith.constant 0 : i32
    %c0_i32_0 = arith.constant 0 : i32
    %c0_i32_1 = arith.constant 0 : i32
    return %arg0, %c0_i32, %c0_i32_0 : i32, i32, i32
  }
}

module attributes {stable_mosaic.version = 11 : i64} {
  func.func @_head_kernel(%arg0: i32, %arg1: memref<2x512xbf16, #tpu.memory_space<vmem>>, %arg2: memref<512x1024xbf16, #tpu.memory_space<vmem>>, %arg3: memref<1x1024xf32, #tpu.memory_space<vmem>>, %arg4: memref<1024x1xf32, #tpu.memory_space<vmem>>, %arg5: memref<1x1xf32, #tpu.memory_space<vmem>>, %arg6: memref<2x1xf32, #tpu.memory_space<vmem>>, %arg7: memref<2x1024xf32, #tpu.memory_space<vmem>>) attributes {dimension_semantics = [#tpu.dimension_semantics<arbitrary>], iteration_bounds = array<i64: 1>, scalar_prefetch = 0 : i64, scratch_operands = 0 : i64, tpu.core_type = #tpu.core_type<tc>, window_params = [{pipeline_mode = #tpu.pipeline_mode<synchronous>, transform_indices = @transform_0, window_bounds = array<i64: 2, 512>}, {pipeline_mode = #tpu.pipeline_mode<synchronous>, transform_indices = @transform_1, window_bounds = array<i64: 512, 1024>}, {pipeline_mode = #tpu.pipeline_mode<synchronous>, transform_indices = @transform_2, window_bounds = array<i64: 1, 1024>}, {pipeline_mode = #tpu.pipeline_mode<synchronous>, transform_indices = @transform_3, window_bounds = array<i64: 1024, 1>}, {pipeline_mode = #tpu.pipeline_mode<synchronous>, transform_indices = @transform_4, window_bounds = array<i64: 1, 1>}, {pipeline_mode = #tpu.pipeline_mode<synchronous>, transform_indices = @transform_5, window_bounds = array<i64: 2, 1>}, {pipeline_mode = #tpu.pipeline_mode<synchronous>, transform_indices = @transform_6, window_bounds = array<i64: 2, 1024>}]} {
    %c0 = arith.constant 0 : index
    %c0_0 = arith.constant 0 : index
    %0 = vector.load %arg1[%c0, %c0_0] : memref<2x512xbf16, #tpu.memory_space<vmem>>, vector<2x512xbf16>
    %c0_1 = arith.constant 0 : index
    %c0_2 = arith.constant 0 : index
    %1 = vector.load %arg2[%c0_1, %c0_2] : memref<512x1024xbf16, #tpu.memory_space<vmem>>, vector<512x1024xbf16>
    %cst = arith.constant dense<0.000000e+00> : vector<2x1024xf32>
    %2 = tpu.matmul %0, %1, %cst {dimension_numbers = #tpu.dot_dimension_numbers<[1], [0], [0], [1], [0, 0, 1, 1], [], []>} : vector<2x512xbf16>, vector<512x1024xbf16>, vector<2x1024xf32> -> vector<2x1024xf32>
    %c0_3 = arith.constant 0 : index
    %c0_4 = arith.constant 0 : index
    %3 = vector.load %arg3[%c0_3, %c0_4] : memref<1x1024xf32, #tpu.memory_space<vmem>>, vector<1x1024xf32>
    %4 = vector.broadcast %3 : vector<1x1024xf32> to vector<2x1024xf32>
    %5 = arith.addf %2, %4 : vector<2x1024xf32>
    %cst_5 = arith.constant 0.000000e+00 : f32
    %6 = vector.broadcast %cst_5 : f32 to vector<2x1024xf32>
    %7 = arith.cmpf ogt, %5, %6 : vector<2x1024xf32>
    %cst_6 = arith.constant 1.000000e-01 : f32
    %8 = vector.broadcast %cst_6 : f32 to vector<2x1024xf32>
    %9 = arith.mulf %8, %5 : vector<2x1024xf32>
    %10 = arith.select %7, %5, %9 : vector<2x1024xi1>, vector<2x1024xf32>
    %c0_7 = arith.constant 0 : index
    %c0_8 = arith.constant 0 : index
    %11 = vector.load %arg7[%c0_7, %c0_8] : memref<2x1024xf32, #tpu.memory_space<vmem>>, vector<2x1024xf32>
    tpu.vector_store %arg7[%c0_7, %c0_8], %10 {strides = array<i32>} : memref<2x1024xf32, #tpu.memory_space<vmem>>, vector<2x1024xf32>,
    %c0_9 = arith.constant 0 : index
    %c0_10 = arith.constant 0 : index
    %12 = vector.load %arg4[%c0_9, %c0_10] : memref<1024x1xf32, #tpu.memory_space<vmem>>, vector<1024x1xf32>
    %cst_11 = arith.constant dense<0.000000e+00> : vector<2x1xf32>
    %13 = tpu.matmul %10, %12, %cst_11 {dimension_numbers = #tpu.dot_dimension_numbers<[1], [0], [0], [1], [0, 0, 1, 1], [], []>} : vector<2x1024xf32>, vector<1024x1xf32>, vector<2x1xf32> -> vector<2x1xf32>
    %c0_12 = arith.constant 0 : index
    %c0_13 = arith.constant 0 : index
    %14 = vector.load %arg5[%c0_12, %c0_13] : memref<1x1xf32, #tpu.memory_space<vmem>>, vector<1x1xf32>
    %15 = vector.broadcast %14 : vector<1x1xf32> to vector<2x1xf32>
    %16 = arith.addf %13, %15 : vector<2x1xf32>
    %c0_14 = arith.constant 0 : index
    %c0_15 = arith.constant 0 : index
    %17 = vector.load %arg6[%c0_14, %c0_15] : memref<2x1xf32, #tpu.memory_space<vmem>>, vector<2x1xf32>
    tpu.vector_store %arg6[%c0_14, %c0_15], %16 {strides = array<i32>} : memref<2x1xf32, #tpu.memory_space<vmem>>, vector<2x1xf32>,
    return
  }
  func.func @transform_0(%arg0: i32) -> (i32, i32) {
    %c0_i32 = arith.constant 0 : i32
    %c0_i32_0 = arith.constant 0 : i32
    %c0_i32_1 = arith.constant 0 : i32
    return %c0_i32, %c0_i32_0 : i32, i32
  }
  func.func @transform_1(%arg0: i32) -> (i32, i32) {
    %c0_i32 = arith.constant 0 : i32
    %c0_i32_0 = arith.constant 0 : i32
    %c0_i32_1 = arith.constant 0 : i32
    return %c0_i32, %c0_i32_0 : i32, i32
  }
  func.func @transform_2(%arg0: i32) -> (i32, i32) {
    %c0_i32 = arith.constant 0 : i32
    %c0_i32_0 = arith.constant 0 : i32
    %c0_i32_1 = arith.constant 0 : i32
    return %c0_i32, %c0_i32_0 : i32, i32
  }
  func.func @transform_3(%arg0: i32) -> (i32, i32) {
    %c0_i32 = arith.constant 0 : i32
    %c0_i32_0 = arith.constant 0 : i32
    %c0_i32_1 = arith.constant 0 : i32
    return %c0_i32, %c0_i32_0 : i32, i32
  }
  func.func @transform_4(%arg0: i32) -> (i32, i32) {
    %c0_i32 = arith.constant 0 : i32
    %c0_i32_0 = arith.constant 0 : i32
    %c0_i32_1 = arith.constant 0 : i32
    return %c0_i32, %c0_i32_0 : i32, i32
  }
  func.func @transform_5(%arg0: i32) -> (i32, i32) {
    %c0_i32 = arith.constant 0 : i32
    %c0_i32_0 = arith.constant 0 : i32
    %c0_i32_1 = arith.constant 0 : i32
    return %c0_i32, %c0_i32_0 : i32, i32
  }
  func.func @transform_6(%arg0: i32) -> (i32, i32) {
    %c0_i32 = arith.constant 0 : i32
    %c0_i32_0 = arith.constant 0 : i32
    %c0_i32_1 = arith.constant 0 : i32
    return %c0_i32, %c0_i32_0 : i32, i32
  }
}

</mosaic_0001>

<bundles_post_ra>
// kernel: discriminatorxx_forward.5
= control target key start
LH: loop header
LB: loop body
LE: loop exit
PB: predicated region body
PF: predicated region fallthrough
CT: control target
= control target key end

     0   :  { %s1455_s12 = smov 0   ;;  %s1718_s0 = inlined_call_operand.vmem [shape: bf16[2,512,16], index: 0, kind: input, shape index: {}]   ;;  %s1719_s1 = inlined_call_operand.vmem [shape: bf16[2,16,64], index: 1, kind: input, shape index: {}]   ;;  %s1720_s2 = inlined_call_operand.vmem [shape: f32[2,1,64], index: 2, kind: input, shape index: {}]   ;;  %s1721_s3 = inlined_call_operand.vmem [shape: bf16[2,256,128], index: 3, kind: output, shape index: {}]  }
   0x1 LB: > { %s1105_s13 = sadd.s32 4294967295, %s1432_s12   ;;  %p1109_p0 = scmp.ge.s32.totalorder %s1432_s12, 1  ;;  %s1432_s12 = sphi %s1455_s12, %s13_s12  }
   0x2   : > { %p155_p1 = scmp.lt.s32.totalorder %s1432_s12, 3 }
   0x4   : > { %p156_p2 = pnand %p1109_p0, %p155_p1 }
   0x5   : > { %p187_p3 = scmp.lt.s32.totalorder (!%p156_p2), %s1105_s13, 1  ;;  %s1434_s27 = smov (!%p156_p2), 64  }
   0x6   : > { %159 = sbr.rel (%p156_p2) target bundleno = 403 (0x193), region = 32 }
   0xb   : > { %s1723_s13 = smov (!%p187_p3, %s1105_s13), 1  ;;  %vm442_vm0 = vcmask 130048   ;;  %vm836_vm1 = vcmask 523264  }
   0xc   : > { %s1282_s14 = sshll.u32 %s1723_s13, 8  ;;  %s1283_s15 = sshll.u32 %s1723_s13, 3 }
   0xd   : > { %s1470_s18 = scalar_lea.vmem %s1718_s0, %s1282_s14  ;;  %s196_s21 = scalar_lea.vmem %s1719_s1, %s1283_s15 }
   0xe   : > { %s199_s24 = scalar_lea.vmem %s1720_s2, %s1723_s13  ;;  %v1317_v0 = vld [vmem:[%s196_s21] sm:$0xff]  ;;  %v1302_v3 = vld [vmem:[%s1470_s18 + $0x88] sm:$0xff]  ;;  %v1303_v5 = vld [vmem:[%s1470_s18 + $0x90] sm:$0xff]  ;;  %s1284_s28 = sshll.u32 %s1723_s13, 7 }
   0xf   : > { %v1301_v1 = vld [vmem:[%s1470_s18 + $0x80] sm:$0xff]  ;;  %1414 = vmatpush.bf16.msra.mxu2 %v1317_v0  ;;  %1415 = vmatpush.bf16.msra.mxu3 %v1317_v0  ;;  %v1310_v4 = vld [vmem:[%s1470_s18 + $0xc8] sm:$0xff]  ;;  %v1311_v6 = vld [vmem:[%s1470_s18 + $0xd0] sm:$0xff]  ;;  %s1623_s4 = scalar_lea.vmem %s1721_s3, %s1284_s28 }
  0x10   : > { %v1309_v2 = vld [vmem:[%s1470_s18 + $0xc0] sm:$0xff]  ;;  %546 = vmatpush.bf16.msra.mxu0 %v1317_v0  ;;  %1413 = vmatpush.bf16.msra.mxu1 %v1317_v0  ;;  %v1304_v7 = vld [vmem:[%s1470_s18 + $0x98] sm:$0xff]  ;;  %v1306_v13 = vld [vmem:[%s1470_s18 + $0xa8] sm:$0xff] }
  0x11   : > { %v1312_v8 = vld [vmem:[%s1470_s18 + $0xd8] sm:$0xff]  ;;  %v1305_v9 = vld [vmem:[%s1470_s18 + $0xa0] sm:$0xff]  ;;  %v1314_v14 = vld [vmem:[%s1470_s18 + $0xe8] sm:$0xff] }
  0x12   : > { %1264 = vmatmul.msk.bf16.vlgmr.msra.gmra.mxu2 %vm442_vm0, %v1301_v1  ;;  %1272 = vmatmul.msk.bf16.vlgmr.msra.gmra.mxu3 %vm442_vm0, %v1309_v2  ;;  %v1313_v10 = vld [vmem:[%s1470_s18 + $0xe0] sm:$0xff]  ;;  %v1286_v15 = vld [vmem:[%s1470_s18 + $0x8] sm:$0xff]  ;;  %v1307_v17 = vld [vmem:[%s1470_s18 + $0xb0] sm:$0xff] }
  0x13   : > { %v1285_v11 = vld [vmem:[%s1470_s18] sm:$0xff]  ;;  %v1294_v16 = vld [vmem:[%s1470_s18 + $0x48] sm:$0xff]  ;;  %v1315_v18 = vld [vmem:[%s1470_s18 + $0xf0] sm:$0xff] }
  0x14   : > { %v1293_v12 = vld [vmem:[%s1470_s18 + $0x40] sm:$0xff]  ;;  %1248 = vmatmul.msk.bf16.vlgmr.msra.gmra.mxu0 %vm442_vm0, %v1285_v11  ;;  %v1287_v19 = vld [vmem:[%s1470_s18 + $0x10] sm:$0xff]  ;;  %v1308_v21 = vld [vmem:[%s1470_s18 + $0xb8] sm:$0xff] }
  0x15   : > { %1256 = vmatmul.msk.bf16.vlgmr.msra.gmra.mxu1 %vm442_vm0, %v1293_v12  ;;  %v1295_v20 = vld [vmem:[%s1470_s18 + $0x50] sm:$0xff]  ;;  %v1316_v22 = vld [vmem:[%s1470_s18 + $0xf8] sm:$0xff]  ;;  %v1289_v25 = vld [vmem:[%s1470_s18 + $0x20] sm:$0xff] }
  0x16   : > { %v1288_v23 = vld [vmem:[%s1470_s18 + $0x18] sm:$0xff]  ;;  %v1533_v26 = vld [vmem:[%s199_s24] ss:$0 sm:$0xff]  ;;  %v1290_v36 = vld [vmem:[%s1470_s18 + $0x28] sm:$0xff] }
  0x17   : > { %v1296_v24 = vld [vmem:[%s1470_s18 + $0x58] sm:$0xff]  ;;  %v1297_v31 = vld [vmem:[%s1470_s18 + $0x60] sm:$0xff]  ;;  %v1298_v41 = vld [vmem:[%s1470_s18 + $0x68] sm:$0xff] }
  0x18   : > { %v1291_v45 = vld [vmem:[%s1470_s18 + $0x30] sm:$0xff]  ;;  %v1292_v54 = vld [vmem:[%s1470_s18 + $0x38] sm:$0xff] }
  0x19   : > { %v1299_v55 = vld [vmem:[%s1470_s18 + $0x70] sm:$0xff] }
  0x22   : > { %1265 = vmatmul.msk.bf16.gmra.mxu2 %vm442_vm0, %v1302_v3  ;;  %1273 = vmatmul.msk.bf16.gmra.mxu3 %vm442_vm0, %v1310_v4 }
  0x24   : > { %1249 = vmatmul.msk.bf16.gmra.mxu0 %vm442_vm0, %v1286_v15 }
  0x25   : > { %1257 = vmatmul.msk.bf16.gmra.mxu1 %vm442_vm0, %v1294_v16 }
  0x32   : > { %1266 = vmatmul.msk.bf16.gmra.mxu2 %vm442_vm0, %v1303_v5  ;;  %1274 = vmatmul.msk.bf16.gmra.mxu3 %vm442_vm0, %v1311_v6  ;;  %v1300_v5 = vld [vmem:[%s1470_s18 + $0x78] sm:$0xff] }
  0x34   : > { %1250 = vmatmul.msk.bf16.gmra.mxu0 %vm442_vm0, %v1287_v19 }
  0x35   : > { %1258 = vmatmul.msk.bf16.gmra.mxu1 %vm442_vm0, %v1295_v20 }
  0x42   : > { %1267 = vmatmul.msk.bf16.gmra.mxu2 %vm442_vm0, %v1304_v7  ;;  %1275 = vmatmul.msk.bf16.gmra.mxu3 %vm442_vm0, %v1312_v8 }
  0x44   : > { %1251 = vmatmul.msk.bf16.gmra.mxu0 %vm442_vm0, %v1288_v23 }
  0x45   : > { %1259 = vmatmul.msk.bf16.gmra.mxu1 %vm442_vm0, %v1296_v24 }
  0x52   : > { %1268 = vmatmul.msk.bf16.gmra.mxu2 %vm442_vm0, %v1305_v9  ;;  %1276 = vmatmul.msk.bf16.gmra.mxu3 %vm442_vm0, %v1313_v10 }
  0x54   : > { %1252 = vmatmul.msk.bf16.gmra.mxu0 %vm442_vm0, %v1289_v25 }
  0x55   : > { %1260 = vmatmul.msk.bf16.gmra.mxu1 %vm442_vm0, %v1297_v31 }
  0x62   : > { %1269 = vmatmul.msk.bf16.gmra.mxu2 %vm442_vm0, %v1306_v13  ;;  %1277 = vmatmul.msk.bf16.gmra.mxu3 %vm442_vm0, %v1314_v14 }
  0x64   : > { %1253 = vmatmul.msk.bf16.gmra.mxu0 %vm442_vm0, %v1290_v36 }
  0x65   : > { %1261 = vmatmul.msk.bf16.gmra.mxu1 %vm442_vm0, %v1298_v41 }
  0x72   : > { %1270 = vmatmul.msk.bf16.gmra.mxu2 %vm442_vm0, %v1307_v17  ;;  %1278 = vmatmul.msk.bf16.gmra.mxu3 %vm442_vm0, %v1315_v18 }
  0x74   : > { %1254 = vmatmul.msk.bf16.gmra.mxu0 %vm442_vm0, %v1291_v45 }
  0x75   : > { %1262 = vmatmul.msk.bf16.gmra.mxu1 %vm442_vm0, %v1299_v55 }
  0x82   : > { %1271 = vmatmul.msk.bf16.gmra.mxu2 %vm442_vm0, %v1308_v21  ;;  %1279 = vmatmul.msk.bf16.gmra.mxu3 %vm442_vm0, %v1316_v22 }
  0x84   : > { %1255 = vmatmul.msk.bf16.gmra.mxu0 %vm442_vm0, %v1292_v54 }
  0x85   : > { %1263 = vmatmul.msk.bf16.gmra.mxu1 %vm442_vm0, %v1300_v5 }
  0x91   : > { %v548_v10 = vpop.f32.mrf.mxu0 }
  0x92   : > { %v588_v11 = vpop.f32.mrf.mxu1  ;;  %v549_v45 = vadd.f32 %v1533_v26, %v548_v10 }
  0x95   : > { %v628_v27 = vpop.f32.mrf.mxu2  ;;  %v668_v28 = vpop.f32.mrf.mxu3 }
  0x96   : > { %v629_v29 = vadd.f32 %v1533_v26, %v628_v27  ;;  %v669_v30 = vadd.f32 %v1533_v26, %v668_v28 }
  0x98   : > { %772 = vrot.lane.b32.xlu1 %v669_v30, %s1434_s27  ;;  %740 = vrot.lane.b32.xlu0 %v629_v29, %s1434_s27 }
  0x99   : > { %v550_v16 = vpop.f32.mrf.mxu0 }
  0x9a   : > { %v590_v21 = vpop.f32.mrf.mxu1 }
  0x9d   : > { %v630_v32 = vpop.f32.mrf.mxu2  ;;  %v670_v33 = vpop.f32.mrf.mxu3 }
  0x9e   : > { %v631_v34 = vadd.f32 %v1533_v26, %v630_v32  ;;  %v671_v35 = vadd.f32 %v1533_v26, %v670_v33  ;;  %v591_v33 = vadd.f32 %v1533_v26, %v590_v21 }
  0xa0   : > { %774 = vrot.lane.b32.xlu2 %v671_v35, %s1434_s27  ;;  %742 = vrot.lane.b32.xlu0 %v631_v34, %s1434_s27 }
  0xa1   : > { %v1598_v22 = vpop.f32.mrf.mxu0 }
  0xa2   : > { %v1604_v28 = vpop.f32.mrf.mxu1 }
  0xa5   : > { %v633_v37 = vpop.f32.mrf.mxu2  ;;  %v673_v38 = vpop.f32.mrf.mxu3 }
  0xa6   : > { %v634_v39 = vadd.f32 %v1533_v26, %v633_v37  ;;  %v674_v40 = vadd.f32 %v1533_v26, %v673_v38 }
  0xa8   : > { %744 = vrot.lane.b32.xlu1 %v634_v39, %s1434_s27  ;;  %776 = vrot.lane.b32.xlu0 %v674_v40, %s1434_s27  ;;  %v589_v40 = vadd.f32 %v1533_v26, %v588_v11 }
  0xa9   : > { %v555_v32 = vpop.f32.mrf.mxu0 }
  0xaa   : > { %v1609_v34 = vpop.f32.mrf.mxu1  ;;  %v556_v11 = vadd.f32 %v1533_v26, %v555_v32 }
  0xad   : > { %v635_v42 = vpop.f32.mrf.mxu2  ;;  %v675_v43 = vpop.f32.mrf.mxu3 }
  0xae   : > { %v636_v44 = vadd.f32 %v1533_v26, %v635_v42  ;;  %v676_v48 = vadd.f32 %v1533_v26, %v675_v43 }
  0xb0   : > { %746 = vrot.lane.b32.xlu1 %v636_v44, %s1434_s27 }
  0xb1   : > { %v558_v42 = vpop.f32.mrf.mxu0 }
  0xb5   : > { %v638_v46 = vpop.f32.mrf.mxu2  ;;  %v678_v47 = vpop.f32.mrf.mxu3 }
  0xb6   : > { %v639_v49 = vadd.f32 %v1533_v26, %v638_v46  ;;  %v679_v50 = vadd.f32 %v1533_v26, %v678_v47 }
  0xb8   : > { %748 = vrot.lane.b32.xlu2 %v639_v49, %s1434_s27  ;;  %778 = vrot.lane.b32.xlu1 %v676_v48, %s1434_s27  ;;  %v1618_v48 = vpop.f32.mrf.mxu1 }
  0xbd   : > { %v640_v51 = vpop.f32.mrf.mxu2  ;;  %v680_v52 = vpop.f32.mrf.mxu3 }
  0xbe   : > { %v681_v53 = vadd.f32 %v1533_v26, %v680_v52  ;;  %v641_v58 = vadd.f32 %v1533_v26, %v640_v51 }
  0xc0   : > { %780 = vrot.lane.b32.xlu2 %v679_v50, %s1434_s27  ;;  %782 = vrot.lane.b32.xlu0 %v681_v53, %s1434_s27  ;;  %v600_v5 = vpop.f32.mrf.mxu1 }
  0xc5   : > { %v643_v56 = vpop.f32.mrf.mxu2  ;;  %v683_v57 = vpop.f32.mrf.mxu3 }
  0xc6   : > { %v644_v59 = vadd.f32 %v1533_v26, %v643_v56  ;;  %v684_v60 = vadd.f32 %v1533_v26, %v683_v57  ;;  %v551_v56 = vadd.f32 %v1533_v26, %v550_v16  ;;  %v594_v16 = vadd.f32 %v1533_v26, %v1604_v28 }
  0xc8   : > { %750 = vrot.lane.b32.xlu2 %v641_v58, %s1434_s27  ;;  %784 = vrot.lane.b32.xlu1 %v684_v60, %s1434_s27 }
  0xc9   : > { %752 = vrot.lane.b32.xlu0 %v644_v59, %s1434_s27 }
  0xcd   : > { %v645_v61 = vpop.f32.mrf.mxu2  ;;  %v685_v62 = vpop.f32.mrf.mxu3 }
  0xce   : > { %v646_v63 = vadd.f32 %v1533_v26, %v645_v61  ;;  %v686_v0 = vadd.f32 %v1533_v26, %v685_v62 }
  0xd0   : > { %786 = vrot.lane.b32.xlu2 %v686_v0, %s1434_s27  ;;  %754 = vrot.lane.b32.xlu1 %v646_v63, %s1434_s27  ;;  %v560_v63 = vpop.f32.mrf.mxu0 }
  0xd5   : > { %v648_v1 = vpop.f32.mrf.mxu2  ;;  %v688_v2 = vpop.f32.mrf.mxu3 }
  0xd6   : > { %v649_v3 = vadd.f32 %v1533_v26, %v648_v1  ;;  %v689_v4 = vadd.f32 %v1533_v26, %v688_v2 }
  0xd8   : > { %756 = vrot.lane.b32.xlu2 %v649_v3, %s1434_s27  ;;  %788 = vrot.lane.b32.xlu0 %v689_v4, %s1434_s27  ;;  %v1641_v10 = vpop.f32.mrf.mxu0 }
  0xdd   : > { %v650_v6 = vpop.f32.mrf.mxu2  ;;  %v690_v7 = vpop.f32.mrf.mxu3 }
  0xde   : > { %v651_v8 = vadd.f32 %v1533_v26, %v650_v6  ;;  %v691_v9 = vadd.f32 %v1533_v26, %v690_v7 }
  0xe0   : > { %790 = vrot.lane.b32.xlu1 %v691_v9, %s1434_s27  ;;  %758 = vrot.lane.b32.xlu0 %v651_v8, %s1434_s27  ;;  %v554_v8 = vadd.f32 %v1533_v26, %v1598_v22  ;;  %v559_v9 = vadd.f32 %v1533_v26, %v558_v42 }
  0xe5   : > { %v653_v12 = vpop.f32.mrf.mxu2  ;;  %v693_v13 = vpop.f32.mrf.mxu3 }
  0xe6   : > { %v654_v14 = vadd.f32 %v1533_v26, %v653_v12  ;;  %v694_v15 = vadd.f32 %v1533_v26, %v693_v13  ;;  %v561_v13 = vadd.f32 %v1533_v26, %v560_v63 }
  0xe8   : > { %792 = vrot.lane.b32.xlu2 %v694_v15, %s1434_s27  ;;  %760 = vrot.lane.b32.xlu1 %v654_v14, %s1434_s27  ;;  %v603_v15 = vpop.f32.mrf.mxu1 }
  0xed   : > { %v655_v17 = vpop.f32.mrf.mxu2  ;;  %v695_v18 = vpop.f32.mrf.mxu3 }
  0xee   : > { %v656_v19 = vadd.f32 %v1533_v26, %v655_v17  ;;  %v696_v20 = vadd.f32 %v1533_v26, %v695_v18 }
  0xf0   : > { %762 = vrot.lane.b32.xlu2 %v656_v19, %s1434_s27  ;;  %794 = vrot.lane.b32.xlu0 %v696_v20, %s1434_s27 }
  0xf5   : > { %v658_v23 = vpop.f32.mrf.mxu2  ;;  %v698_v24 = vpop.f32.mrf.mxu3 }
  0xf6   : > { %v659_v25 = vadd.f32 %v1533_v26, %v658_v23  ;;  %v699_v27 = vadd.f32 %v1533_v26, %v698_v24 }
  0xf8   : > { %796 = vrot.lane.b32.xlu1 %v699_v27, %s1434_s27  ;;  %764 = vrot.lane.b32.xlu0 %v659_v25, %s1434_s27 }
  0xfa   : > { %v775_v35 = vpop.permute.xlu2 %774 }
  0xfb   : > { %v854_v38 = vsel %vm836_vm1, %v591_v33, %v775_v35  ;;  %v565_v35 = vpop.f32.mrf.mxu0 }
  0xfc   : > { %v918_v41 = vmul.f32 0.1, %v854_v38  ;;  %vm886_vm2 = vcmp.gt.f32.partialorder %v854_v38, 0.0 }
  0xfd   : > { %v660_v29 = vpop.f32.mrf.mxu2  ;;  %v700_v30 = vpop.f32.mrf.mxu3 }
  0xfe   : > { %v661_v31 = vadd.f32 %v1533_v26, %v660_v29  ;;  %v950_v49 = vsel %vm886_vm2, %v854_v38, %v918_v41  ;;  %v701_v52 = vadd.f32 %v1533_v26, %v700_v30  ;;  %v605_v41 = vpop.f32.mrf.mxu1 }
 0x100   : > { %766 = vrot.lane.b32.xlu1 %v661_v31, %s1434_s27 }
 0x105   : > { %v663_v36 = vpop.f32.mrf.mxu2  ;;  %v703_v37 = vpop.f32.mrf.mxu3 }
 0x106   : > { %v664_v39 = vadd.f32 %v1533_v26, %v663_v36  ;;  %v704_v3 = vadd.f32 %v1533_v26, %v703_v37  ;;  %v596_v36 = vadd.f32 %v1533_v26, %v1609_v34 }
 0x108   : > { %768 = vrot.lane.b32.xlu2 %v664_v39, %s1434_s27  ;;  %v599_v39 = vadd.f32 %v1533_v26, %v1618_v48  ;;  %v606_v48 = vadd.f32 %v1533_v26, %v605_v41 }
 0x10a   : > { %v773_v43 = vpop.permute.xlu1 %772  ;;  %v741_v44 = vpop.permute.xlu0 %740 }
 0x10b   : > { %v853_v46 = vsel %vm836_vm1, %v589_v40, %v773_v43  ;;  %v837_v58 = vsel %vm836_vm1, %v549_v45, %v741_v44  ;;  %v601_v45 = vadd.f32 %v1533_v26, %v600_v5 }
 0x10c   : > { %vm885_vm3 = vcmp.gt.f32.partialorder %v853_v46, 0.0  ;;  %v917_v47 = vmul.f32 0.1, %v853_v46  ;;  %v901_v59 = vmul.f32 0.1, %v837_v58  ;;  %vm869_vm4 = vcmp.gt.f32.partialorder %v837_v58, 0.0 }
 0x10d   : > { %v665_v50 = vpop.f32.mrf.mxu2  ;;  %v705_v51 = vpop.f32.mrf.mxu3 }
 0x10e   : > { %v949_v53 = vsel %vm885_vm3, %v853_v46, %v917_v47  ;;  %v666_v54 = vadd.f32 %v1533_v26, %v665_v50  ;;  %v706_v55 = vadd.f32 %v1533_v26, %v705_v51  ;;  %v933_v1 = vsel %vm869_vm4, %v837_v58, %v901_v59  ;;  %v568_v47 = vpop.f32.mrf.mxu0 }
 0x10f   : > { %v1361_v57 = vpack.c.bf16 %v950_v49, %v949_v53 }
 0x110   : > { %798 = vrot.lane.b32.xlu2 %v701_v52, %s1434_s27  ;;  %802 = vrot.lane.b32.xlu1 %v706_v55, %s1434_s27 }
 0x111   : > { %1405 = vst [vmem:[%s1623_s4 + $0x40] sm:$0xff] %v1361_v57   ;;  %770 = vrot.lane.b32.xlu0 %v666_v54, %s1434_s27  ;;  %v608_v54 = vpop.f32.mrf.mxu1  ;;  %v604_v57 = vadd.f32 %v1533_v26, %v603_v15 }
 0x112   : > { %v749_v60 = vpop.permute.xlu2 %748  ;;  %v743_v61 = vpop.permute.xlu0 %742 }
 0x113   : > { %v838_v62 = vsel %vm836_vm1, %v551_v56, %v743_v61  ;;  %v841_v12 = vsel %vm836_vm1, %v559_v9, %v749_v60 }
 0x114   : > { %vm870_vm5 = vcmp.gt.f32.partialorder %v838_v62, 0.0  ;;  %v902_v0 = vmul.f32 0.1, %v838_v62  ;;  %v905_v17 = vmul.f32 0.1, %v841_v12  ;;  %vm873_vm6 = vcmp.gt.f32.partialorder %v841_v12, 0.0 }
 0x116   : > { %v934_v2 = vsel %vm870_vm5, %v838_v62, %v902_v0  ;;  %v937_v27 = vsel %vm873_vm6, %v841_v12, %v905_v17  ;;  %v564_v62 = vadd.f32 %v1533_v26, %v1641_v10  ;;  %v570_v63 = vpop.f32.mrf.mxu0 }
 0x117   : > { %v1321_v4 = vpack.c.bf16 %v934_v2, %v933_v1 }
 0x119   : > { %1322 = vst [vmem:[%s1623_s4] sm:$0xff] %v1321_v4   ;;  %800 = vrot.lane.b32.xlu0 %v704_v3, %s1434_s27  ;;  %v610_v5 = vpop.f32.mrf.mxu1 }
 0x11a   : > { %v781_v6 = vpop.permute.xlu2 %780  ;;  %v745_v7 = vpop.permute.xlu1 %744 }
 0x11b   : > { %v839_v14 = vsel %vm836_vm1, %v554_v8, %v745_v7  ;;  %v777_v23 = vpop.permute.xlu0 %776  ;;  %v857_v34 = vsel %vm836_vm1, %v599_v39, %v781_v6  ;;  %v566_v6 = vadd.f32 %v1533_v26, %v565_v35 }
 0x11c   : > { %v903_v18 = vmul.f32 0.1, %v839_v14  ;;  %vm871_vm7 = vcmp.gt.f32.partialorder %v839_v14, 0.0  ;;  %v855_v31 = vsel %vm836_vm1, %v594_v16, %v777_v23  ;;  %v921_v49 = vmul.f32 0.1, %v857_v34 }
 0x11d   : > { %v919_v37 = vmul.f32 0.1, %v855_v31  ;;  %vm887_vm10 = vcmp.gt.f32.partialorder %v855_v31, 0.0  ;;  %vm889_vm12 = vcmp.gt.f32.partialorder %v857_v34, 0.0 }
 0x11e   : > { %v935_v29 = vsel %vm871_vm7, %v839_v14, %v903_v18  ;;  %v953_v55 = vsel %vm889_vm12, %v857_v34, %v921_v49  ;;  %v573_v14 = vpop.f32.mrf.mxu0 }
 0x11f   : > { %v951_v43 = vsel %vm887_vm10, %v855_v31, %v919_v37 }
 0x121   : > { %v613_v18 = vpop.f32.mrf.mxu1 }
 0x122   : > { %v751_v19 = vpop.permute.xlu2 %750  ;;  %v747_v20 = vpop.permute.xlu1 %746 }
 0x123   : > { %v842_v21 = vsel %vm836_vm1, %v561_v13, %v751_v19  ;;  %v840_v22 = vsel %vm836_vm1, %v556_v11, %v747_v20 }
 0x124   : > { %vm874_vm8 = vcmp.gt.f32.partialorder %v842_v21, 0.0  ;;  %v906_v24 = vmul.f32 0.1, %v842_v21  ;;  %vm872_vm9 = vcmp.gt.f32.partialorder %v840_v22, 0.0  ;;  %v904_v25 = vmul.f32 0.1, %v840_v22 }
 0x126   : > { %v938_v28 = vsel %vm874_vm8, %v842_v21, %v906_v24  ;;  %v936_v30 = vsel %vm872_vm9, %v840_v22, %v904_v25  ;;  %v569_v21 = vadd.f32 %v1533_v26, %v568_v47  ;;  %v609_v22 = vadd.f32 %v1533_v26, %v608_v54 }
 0x127   : > { %v1331_v32 = vpack.c.bf16 %v938_v28, %v937_v27  ;;  %v1326_v33 = vpack.c.bf16 %v936_v30, %v935_v29  ;;  %v571_v24 = vadd.f32 %v1533_v26, %v570_v63  ;;  %v611_v25 = vadd.f32 %v1533_v26, %v610_v5  ;;  %v575_v27 = vpop.f32.mrf.mxu0 }
 0x128   : > { %v576_v31 = vadd.f32 %v1533_v26, %v575_v27 }
 0x129   : > { %1399 = vst [vmem:[%s1623_s4 + $0x10] sm:$0xff] %v1331_v32   ;;  %v615_v28 = vpop.f32.mrf.mxu1 }
 0x12a   : > { %1398 = vst [vmem:[%s1623_s4 + $0x8] sm:$0xff] %v1326_v33   ;;  %v779_v38 = vpop.permute.xlu1 %778  ;;  %v787_v52 = vpop.permute.xlu2 %786 }
 0x12b   : > { %v856_v40 = vsel %vm836_vm1, %v596_v36, %v779_v38  ;;  %v860_v58 = vsel %vm836_vm1, %v606_v48, %v787_v52 }
 0x12c   : > { %vm888_vm11 = vcmp.gt.f32.partialorder %v856_v40, 0.0  ;;  %v920_v42 = vmul.f32 0.1, %v856_v40  ;;  %v924_v60 = vmul.f32 0.1, %v860_v58  ;;  %vm892_vm14 = vcmp.gt.f32.partialorder %v860_v58, 0.0 }
 0x12e   : > { %v952_v44 = vsel %vm888_vm11, %v856_v40, %v920_v42  ;;  %v956_v3 = vsel %vm892_vm14, %v860_v58, %v924_v60 }
 0x12f   : > { %v1366_v46 = vpack.c.bf16 %v952_v44, %v951_v43 }
 0x131   : > { %1406 = vst [vmem:[%s1623_s4 + $0x48] sm:$0xff] %v1366_v46   ;;  %v618_v48 = vpop.f32.mrf.mxu1 }
 0x132   : > { %v783_v50 = vpop.permute.xlu0 %782  ;;  %v757_v9 = vpop.permute.xlu2 %756 }
 0x133   : > { %v858_v51 = vsel %vm836_vm1, %v601_v45, %v783_v50  ;;  %v845_v23 = vsel %vm836_vm1, %v569_v21, %v757_v9  ;;  %v574_v45 = vadd.f32 %v1533_v26, %v573_v14 }
 0x134   : > { %vm890_vm13 = vcmp.gt.f32.partialorder %v858_v51, 0.0  ;;  %v922_v53 = vmul.f32 0.1, %v858_v51  ;;  %v909_v30 = vmul.f32 0.1, %v845_v23  ;;  %vm877_vm3 = vcmp.gt.f32.partialorder %v845_v23, 0.0 }
 0x136   : > { %v954_v56 = vsel %vm890_vm13, %v858_v51, %v922_v53  ;;  %v941_v41 = vsel %vm877_vm3, %v845_v23, %v909_v30  ;;  %v614_v51 = vadd.f32 %v1533_v26, %v613_v18 }
 0x137   : > { %v1371_v59 = vpack.c.bf16 %v954_v56, %v953_v55 }
 0x139   : > { %1407 = vst [vmem:[%s1623_s4 + $0x50] sm:$0xff] %v1371_v59   ;;  %v578_v59 = vpop.f32.mrf.mxu0 }
 0x13a   : > { %v785_v61 = vpop.permute.xlu1 %784  ;;  %v579_v9 = vadd.f32 %v1533_v26, %v578_v59 }
 0x13b   : > { %v859_v0 = vsel %vm836_vm1, %v604_v57, %v785_v61  ;;  %v753_v2 = vpop.permute.xlu0 %752  ;;  %v616_v57 = vadd.f32 %v1533_v26, %v615_v28 }
 0x13c   : > { %vm891_vm15 = vcmp.gt.f32.partialorder %v859_v0, 0.0  ;;  %v923_v1 = vmul.f32 0.1, %v859_v0  ;;  %v843_v8 = vsel %vm836_vm1, %v564_v62, %v753_v2 }
 0x13d   : > { %v907_v11 = vmul.f32 0.1, %v843_v8  ;;  %vm875_vm0 = vcmp.gt.f32.partialorder %v843_v8, 0.0 }
 0x13e   : > { %v955_v4 = vsel %vm891_vm15, %v859_v0, %v923_v1  ;;  %v620_v1 = vpop.f32.mrf.mxu1 }
 0x13f   : > { %v1376_v7 = vpack.c.bf16 %v956_v3, %v955_v4  ;;  %v939_v15 = vsel %vm875_vm0, %v843_v8, %v907_v11  ;;  %v619_v4 = vadd.f32 %v1533_v26, %v618_v48 }
 0x141   : > { %1408 = vst [vmem:[%s1623_s4 + $0x58] sm:$0xff] %v1376_v7   ;;  %v580_v11 = vpop.f32.mrf.mxu0 }
 0x142   : > { %v755_v10 = vpop.permute.xlu1 %754  ;;  %v793_v19 = vpop.permute.xlu2 %792  ;;  %v581_v18 = vadd.f32 %v1533_v26, %v580_v11 }
 0x143   : > { %v844_v12 = vsel %vm836_vm1, %v566_v6, %v755_v10  ;;  %v863_v56 = vsel %vm836_vm1, %v614_v51, %v793_v19  ;;  %v621_v6 = vadd.f32 %v1533_v26, %v620_v1 }
 0x144   : > { %vm876_vm2 = vcmp.gt.f32.partialorder %v844_v12, 0.0  ;;  %v908_v13 = vmul.f32 0.1, %v844_v12  ;;  %v927_v60 = vmul.f32 0.1, %v863_v56  ;;  %vm895_vm9 = vcmp.gt.f32.partialorder %v863_v56, 0.0 }
 0x146   : > { %v940_v16 = vsel %vm876_vm2, %v844_v12, %v908_v13  ;;  %v959_v2 = vsel %vm895_vm9, %v863_v56, %v927_v60  ;;  %v623_v30 = vpop.f32.mrf.mxu1 }
 0x147   : > { %v1336_v17 = vpack.c.bf16 %v940_v16, %v939_v15 }
 0x149   : > { %1400 = vst [vmem:[%s1623_s4 + $0x18] sm:$0xff] %v1336_v17  }
 0x14a   : > { %v789_v20 = vpop.permute.xlu0 %788  ;;  %v763_v38 = vpop.permute.xlu2 %762 }
 0x14b   : > { %v861_v29 = vsel %vm836_vm1, %v609_v22, %v789_v20  ;;  %v848_v34 = vsel %vm836_vm1, %v576_v31, %v763_v38 }
 0x14c   : > { %v925_v32 = vmul.f32 0.1, %v861_v29  ;;  %vm893_vm4 = vcmp.gt.f32.partialorder %v861_v29, 0.0  ;;  %v912_v49 = vmul.f32 0.1, %v848_v34  ;;  %vm880_vm7 = vcmp.gt.f32.partialorder %v848_v34, 0.0 }
 0x14e   : > { %v957_v42 = vsel %vm893_vm4, %v861_v29, %v925_v32  ;;  %v944_v54 = vsel %vm880_vm7, %v848_v34, %v912_v49 }
 0x152   : > { %v791_v33 = vpop.permute.xlu1 %790  ;;  %v759_v35 = vpop.permute.xlu0 %758 }
 0x153   : > { %v862_v36 = vsel %vm836_vm1, %v611_v25, %v791_v33  ;;  %v846_v37 = vsel %vm836_vm1, %v571_v24, %v759_v35  ;;  %v583_v25 = vpop.f32.mrf.mxu0 }
 0x154   : > { %vm894_vm5 = vcmp.gt.f32.partialorder %v862_v36, 0.0  ;;  %v926_v39 = vmul.f32 0.1, %v862_v36  ;;  %vm878_vm6 = vcmp.gt.f32.partialorder %v846_v37, 0.0  ;;  %v910_v40 = vmul.f32 0.1, %v846_v37 }
 0x155   : > { %v584_v31 = vadd.f32 %v1533_v26, %v583_v25 }
 0x156   : > { %v958_v43 = vsel %vm894_vm5, %v862_v36, %v926_v39  ;;  %v942_v44 = vsel %vm878_vm6, %v846_v37, %v910_v40  ;;  %v625_v36 = vpop.f32.mrf.mxu1 }
 0x157   : > { %v1381_v46 = vpack.c.bf16 %v958_v43, %v957_v42  ;;  %v1341_v47 = vpack.c.bf16 %v942_v44, %v941_v41  ;;  %v626_v39 = vadd.f32 %v1533_v26, %v625_v36 }
 0x159   : > { %1409 = vst [vmem:[%s1623_s4 + $0x60] sm:$0xff] %v1381_v46   ;;  %v624_v46 = vadd.f32 %v1533_v26, %v623_v30 }
 0x15a   : > { %1401 = vst [vmem:[%s1623_s4 + $0x20] sm:$0xff] %v1341_v47   ;;  %v761_v50 = vpop.permute.xlu1 %760 }
 0x15b   : > { %v847_v52 = vsel %vm836_vm1, %v574_v45, %v761_v50  ;;  %v585_v32 = vpop.f32.mrf.mxu0 }
 0x15c   : > { %vm879_vm8 = vcmp.gt.f32.partialorder %v847_v52, 0.0  ;;  %v911_v53 = vmul.f32 0.1, %v847_v52  ;;  %v586_v35 = vadd.f32 %v1533_v26, %v585_v32 }
 0x15e   : > { %v943_v55 = vsel %vm879_vm8, %v847_v52, %v911_v53 }
 0x15f   : > { %v1346_v58 = vpack.c.bf16 %v944_v54, %v943_v55 }
 0x161   : > { %1402 = vst [vmem:[%s1623_s4 + $0x28] sm:$0xff] %v1346_v58  }
 0x162   : > { %v769_v61 = vpop.permute.xlu2 %768  ;;  %v795_v62 = vpop.permute.xlu0 %794 }
 0x163   : > { %v864_v63 = vsel %vm836_vm1, %v616_v57, %v795_v62  ;;  %v851_v33 = vsel %vm836_vm1, %v584_v31, %v769_v61 }
 0x164   : > { %vm896_vm10 = vcmp.gt.f32.partialorder %v864_v63, 0.0  ;;  %v928_v0 = vmul.f32 0.1, %v864_v63  ;;  %v915_v37 = vmul.f32 0.1, %v851_v33  ;;  %vm883_vm15 = vcmp.gt.f32.partialorder %v851_v33, 0.0 }
 0x166   : > { %v960_v3 = vsel %vm896_vm10, %v864_v63, %v928_v0  ;;  %v947_v43 = vsel %vm883_vm15, %v851_v33, %v915_v37 }
 0x167   : > { %v1386_v5 = vpack.c.bf16 %v960_v3, %v959_v2 }
 0x169   : > { %1410 = vst [vmem:[%s1623_s4 + $0x68] sm:$0xff] %v1386_v5  }
 0x16a   : > { %v799_v7 = vpop.permute.xlu2 %798  ;;  %v797_v8 = vpop.permute.xlu1 %796 }
 0x16b   : > { %v866_v10 = vsel %vm836_vm1, %v621_v6, %v799_v7  ;;  %v865_v12 = vsel %vm836_vm1, %v619_v4, %v797_v8  ;;  %v765_v15 = vpop.permute.xlu0 %764 }
 0x16c   : > { %vm898_vm11 = vcmp.gt.f32.partialorder %v866_v10, 0.0  ;;  %v930_v13 = vmul.f32 0.1, %v866_v10  ;;  %vm897_vm12 = vcmp.gt.f32.partialorder %v865_v12, 0.0  ;;  %v929_v14 = vmul.f32 0.1, %v865_v12 }
 0x16d   : > { %v849_v20 = vsel %vm836_vm1, %v579_v9, %v765_v15 }
 0x16e   : > { %v962_v16 = vsel %vm898_vm11, %v866_v10, %v930_v13  ;;  %v961_v17 = vsel %vm897_vm12, %v865_v12, %v929_v14  ;;  %v913_v21 = vmul.f32 0.1, %v849_v20  ;;  %vm881_vm13 = vcmp.gt.f32.partialorder %v849_v20, 0.0 }
 0x16f   : > { %v1391_v19 = vpack.c.bf16 %v962_v16, %v961_v17 }
 0x170   : > { %v945_v27 = vsel %vm881_vm13, %v849_v20, %v913_v21 }
 0x171   : > { %1411 = vst [vmem:[%s1623_s4 + $0x70] sm:$0xff] %v1391_v19  }
 0x172   : > { %v767_v22 = vpop.permute.xlu1 %766 }
 0x173   : > { %v850_v23 = vsel %vm836_vm1, %v581_v18, %v767_v22 }
 0x174   : > { %vm882_vm14 = vcmp.gt.f32.partialorder %v850_v23, 0.0  ;;  %v914_v24 = vmul.f32 0.1, %v850_v23 }
 0x176   : > { %v946_v29 = vsel %vm882_vm14, %v850_v23, %v914_v24 }
 0x177   : > { %v1351_v28 = vpack.c.bf16 %v946_v29, %v945_v27 }
 0x179   : > { %1403 = vst [vmem:[%s1623_s4 + $0x30] sm:$0xff] %v1351_v28  }
 0x182   : > { %v803_v41 = vpop.permute.xlu1 %802 }
 0x183   : > { %v771_v38 = vpop.permute.xlu0 %770  ;;  %v868_v45 = vsel %vm836_vm1, %v626_v39, %v803_v41 }
 0x184   : > { %v852_v40 = vsel %vm836_vm1, %v586_v35, %v771_v38  ;;  %v932_v47 = vmul.f32 0.1, %v868_v45  ;;  %vm900_vm2 = vcmp.gt.f32.partialorder %v868_v45, 0.0 }
 0x185   : > { %vm884_vm0 = vcmp.gt.f32.partialorder %v852_v40, 0.0  ;;  %v916_v42 = vmul.f32 0.1, %v852_v40 }
 0x186   : > { %v964_v51 = vsel %vm900_vm2, %v868_v45, %v932_v47 }
 0x187   : > { %v948_v44 = vsel %vm884_vm0, %v852_v40, %v916_v42 }
 0x188   : > { %v1356_v34 = vpack.c.bf16 %v948_v44, %v947_v43 }
 0x18a   : > { %1404 = vst [vmem:[%s1623_s4 + $0x38] sm:$0xff] %v1356_v34  }
 0x18b   : > { %v801_v49 = vpop.permute.xlu0 %800 }
 0x18c   : > { %v867_v50 = vsel %vm836_vm1, %v624_v46, %v801_v49 }
 0x18d   : > { %vm899_vm3 = vcmp.gt.f32.partialorder %v867_v50, 0.0  ;;  %v931_v48 = vmul.f32 0.1, %v867_v50 }
 0x18f   : > { %v963_v52 = vsel %vm899_vm3, %v867_v50, %v931_v48 }
 0x190   : > { %v1396_v53 = vpack.c.bf16 %v964_v51, %v963_v52 }
 0x192   : > { %1412 = vst [vmem:[%s1623_s4 + $0x78] sm:$0xff] %v1396_v53  }
 0x193 PF: > { %s13_s12 = sadd.s32 1, %s1432_s12  }
 0x194   : > { %p10_p4 = scmp.ge.s32.totalorder %s13_s12, 4  }
 0x196   :  { %12 = sbr.rel (!%p10_p4) target bundleno = 1 (0x1), region = 68 }

// kernel: discriminatorxx_forward.6
= control target key start
LH: loop header
LB: loop body
LE: loop exit
PB: predicated region body
PF: predicated region fallthrough
CT: control target
= control target key end

     0   :  { %s2545_s12 = smov 0   ;;  %s3000_s0 = inlined_call_operand.vmem [shape: bf16[2,128,1024], index: 0, kind: input, shape index: {}]   ;;  %s3001_s1 = inlined_call_operand.vmem [shape: bf16[2,1024,64], index: 1, kind: input, shape index: {}]   ;;  %s3002_s2 = inlined_call_operand.vmem [shape: f32[2,1,64], index: 2, kind: input, shape index: {}]   ;;  %s3003_s3 = inlined_call_operand.vmem [shape: bf16[2,64,128], index: 3, kind: output, shape index: {}]  }
   0x1 LB: > { %s1819_s13 = sadd.s32 4294967295, %s2521_s12   ;;  %p1823_p0 = scmp.ge.s32.totalorder %s2521_s12, 1  ;;  %s2521_s12 = sphi %s2545_s12, %s13_s12  }
   0x2   : > { %p155_p1 = scmp.lt.s32.totalorder %s2521_s12, 3 }
   0x4   : > { %p156_p2 = pnand %p1823_p0, %p155_p1 }
   0x5   : > { %p187_p3 = scmp.lt.s32.totalorder (!%p156_p2), %s1819_s13, 1  ;;  %s2524_s26 = smov (!%p156_p2), 64  }
   0x6   : > { %159 = sbr.rel (%p156_p2) target bundleno = 643 (0x283), region = 32 }
   0xb   : > { %s3005_s13 = smov (!%p187_p3, %s1819_s13), 1  ;;  %vm1497_vm0 = vcmask 523264  }
   0xc   : > { %s2344_s14 = sshll.u32 %s3005_s13, 9  ;;  %s199_s20 = scalar_lea.vmem %s3002_s2, %s3005_s13 }
   0xd   : > { %s2561_s17 = scalar_lea.vmem %s3001_s1, %s2344_s14  ;;  %s2598_s23 = scalar_lea.vmem %s3000_s0, %s2344_s14 }
   0xe   : > { %v2418_v0 = vld [vmem:[%s2561_s17 + $0x38] sm:$0xff]  ;;  %v2417_v4 = vld [vmem:[%s2561_s17 + $0x30] sm:$0xff]  ;;  %v2416_v8 = vld [vmem:[%s2561_s17 + $0x28] sm:$0xff]  ;;  %s2346_s27 = sshll.u32 %s3005_s13, 5 }
   0xf   : > { %v2426_v1 = vld [vmem:[%s2561_s17 + $0x78] sm:$0xff]  ;;  %1105 = vmatpush.bf16.msra.mxu0 %v2418_v0  ;;  %v2425_v5 = vld [vmem:[%s2561_s17 + $0x70] sm:$0xff]  ;;  %v2424_v9 = vld [vmem:[%s2561_s17 + $0x68] sm:$0xff]  ;;  %s2979_s30 = scalar_lea.vmem %s3003_s3, %s2346_s27 }
  0x10   : > { %v2434_v2 = vld [vmem:[%s2561_s17 + $0xb8] sm:$0xff]  ;;  %1154 = vmatpush.bf16.msra.mxu1 %v2426_v1  ;;  %v2433_v6 = vld [vmem:[%s2561_s17 + $0xb0] sm:$0xff]  ;;  %v2432_v10 = vld [vmem:[%s2561_s17 + $0xa8] sm:$0xff] }
  0x11   : > { %v2442_v3 = vld [vmem:[%s2561_s17 + $0xf8] sm:$0xff]  ;;  %1203 = vmatpush.bf16.msra.mxu2 %v2434_v2  ;;  %v2441_v7 = vld [vmem:[%s2561_s17 + $0xf0] sm:$0xff]  ;;  %v2440_v11 = vld [vmem:[%s2561_s17 + $0xe8] sm:$0xff] }
  0x12   : > { %1252 = vmatpush.bf16.msra.mxu3 %v2442_v3  ;;  %v2415_v12 = vld [vmem:[%s2561_s17 + $0x20] sm:$0xff]  ;;  %v2414_v16 = vld [vmem:[%s2561_s17 + $0x18] sm:$0xff]  ;;  %v2413_v20 = vld [vmem:[%s2561_s17 + $0x10] sm:$0xff] }
  0x13   : > { %1106 = vmatpush.bf16.msra.mxu0 %v2417_v4  ;;  %v2423_v13 = vld [vmem:[%s2561_s17 + $0x60] sm:$0xff]  ;;  %v2422_v17 = vld [vmem:[%s2561_s17 + $0x58] sm:$0xff]  ;;  %v2421_v21 = vld [vmem:[%s2561_s17 + $0x50] sm:$0xff] }
  0x14   : > { %1155 = vmatpush.bf16.msra.mxu1 %v2425_v5  ;;  %v2431_v14 = vld [vmem:[%s2561_s17 + $0xa0] sm:$0xff]  ;;  %v2430_v18 = vld [vmem:[%s2561_s17 + $0x98] sm:$0xff]  ;;  %v2429_v22 = vld [vmem:[%s2561_s17 + $0x90] sm:$0xff] }
  0x15   : > { %1204 = vmatpush.bf16.msra.mxu2 %v2433_v6  ;;  %v2439_v15 = vld [vmem:[%s2561_s17 + $0xe0] sm:$0xff]  ;;  %v2438_v19 = vld [vmem:[%s2561_s17 + $0xd8] sm:$0xff]  ;;  %v2437_v23 = vld [vmem:[%s2561_s17 + $0xd0] sm:$0xff] }
  0x16   : > { %1253 = vmatpush.bf16.msra.mxu3 %v2441_v7  ;;  %v2412_v24 = vld [vmem:[%s2561_s17 + $0x8] sm:$0xff]  ;;  %v2411_v28 = vld [vmem:[%s2561_s17] sm:$0xff]  ;;  %v2466_v40 = vld [vmem:[%s2561_s17 + $0x1b8] sm:$0xff] }
  0x17   : > { %1107 = vmatpush.bf16.msra.mxu0 %v2416_v8  ;;  %v2420_v25 = vld [vmem:[%s2561_s17 + $0x48] sm:$0xff]  ;;  %v2419_v29 = vld [vmem:[%s2561_s17 + $0x40] sm:$0xff]  ;;  %v2450_v41 = vld [vmem:[%s2561_s17 + $0x138] sm:$0xff] }
  0x18   : > { %1156 = vmatpush.bf16.msra.mxu1 %v2424_v9  ;;  %v2428_v26 = vld [vmem:[%s2561_s17 + $0x88] sm:$0xff]  ;;  %v2427_v30 = vld [vmem:[%s2561_s17 + $0x80] sm:$0xff]  ;;  %v2474_v46 = vld [vmem:[%s2561_s17 + $0x1f8] sm:$0xff] }
  0x19   : > { %1205 = vmatpush.bf16.msra.mxu2 %v2432_v10  ;;  %v2436_v27 = vld [vmem:[%s2561_s17 + $0xc8] sm:$0xff]  ;;  %v2435_v31 = vld [vmem:[%s2561_s17 + $0xc0] sm:$0xff]  ;;  %v2458_v47 = vld [vmem:[%s2561_s17 + $0x178] sm:$0xff] }
  0x1a   : > { %1254 = vmatpush.bf16.msra.mxu3 %v2440_v11  ;;  %v1832_v32 = vld [vmem:[%s2598_s23] sm:$0xf]  ;;  %v2347_v34 = vld [vmem:[%s2598_s23 + $0x4] sm:$0xf]  ;;  %v1840_v36 = vld [vmem:[%s2598_s23 + $0x8] sm:$0xf] }
  0x1b   : > { %1108 = vmatpush.bf16.msra.mxu0 %v2415_v12  ;;  %v2351_v33 = vld [vmem:[%s2598_s23 + $0x1c] sm:$0xf0]  ;;  %v1834_v35 = vld [vmem:[%s2598_s23 + $0x20] sm:$0xf0]  ;;  %v2352_v37 = vld [vmem:[%s2598_s23 + $0x24] sm:$0xf0] }
  0x1c   : > { %1157 = vmatpush.bf16.msra.mxu1 %v2423_v13  ;;  %v2348_v38 = vld [vmem:[%s2598_s23 + $0xc] sm:$0xf]  ;;  %v1833_v42 = vor.u32 %v2351_v33, %v1832_v32  ;;  %v1837_v43 = vor.u32 %v2347_v34, %v1834_v35  ;;  %v1841_v44 = vor.u32 %v2352_v37, %v1840_v36  ;;  %v2465_v48 = vld [vmem:[%s2561_s17 + $0x1b0] sm:$0xff]  ;;  %v1864_v56 = vld [vmem:[%s2598_s23 + $0x40] sm:$0xf] }
  0x1d   : > { %1206 = vmatpush.bf16.msra.mxu2 %v2431_v14  ;;  %v1842_v39 = vld [vmem:[%s2598_s23 + $0x28] sm:$0xf0]  ;;  %v2449_v49 = vld [vmem:[%s2561_s17 + $0x130] sm:$0xff]  ;;  %v2359_v57 = vld [vmem:[%s2598_s23 + $0x5c] sm:$0xf0] }
  0x1e   : > { %1255 = vmatpush.bf16.msra.mxu3 %v2439_v15  ;;  %v1845_v45 = vor.u32 %v2348_v38, %v1842_v39  ;;  %v2473_v50 = vld [vmem:[%s2561_s17 + $0x1f0] sm:$0xff]  ;;  %v2464_v52 = vld [vmem:[%s2561_s17 + $0x1a8] sm:$0xff]  ;;  %v2355_v58 = vld [vmem:[%s2598_s23 + $0x44] sm:$0xf]  ;;  %v1865_v0 = vor.u32 %v2359_v57, %v1864_v56 }
  0x1f   : > { %1109 = vmatpush.bf16.msra.mxu0 %v2414_v16  ;;  %v2457_v51 = vld [vmem:[%s2561_s17 + $0x170] sm:$0xff]  ;;  %v2448_v53 = vld [vmem:[%s2561_s17 + $0x128] sm:$0xff]  ;;  %v1866_v59 = vld [vmem:[%s2598_s23 + $0x60] sm:$0xf0] }
  0x20   : > { %1158 = vmatpush.bf16.msra.mxu1 %v2422_v17  ;;  %v2472_v54 = vld [vmem:[%s2561_s17 + $0x1e8] sm:$0xff]  ;;  %v1869_v1 = vor.u32 %v2355_v58, %v1866_v59  ;;  %v2463_v4 = vld [vmem:[%s2561_s17 + $0x1a0] sm:$0xff]  ;;  %v2461_v36 = vld [vmem:[%s2561_s17 + $0x190] sm:$0xff] }
  0x21   : > { %1207 = vmatpush.bf16.msra.mxu2 %v2430_v18  ;;  %v2456_v55 = vld [vmem:[%s2561_s17 + $0x168] sm:$0xff]  ;;  %v2447_v5 = vld [vmem:[%s2561_s17 + $0x120] sm:$0xff]  ;;  %v2445_v37 = vld [vmem:[%s2561_s17 + $0x110] sm:$0xff] }
  0x22   : > { %1256 = vmatpush.bf16.msra.mxu3 %v2438_v19  ;;  %v1872_v60 = vld [vmem:[%s2598_s23 + $0x48] sm:$0xf]  ;;  %v2356_v62 = vld [vmem:[%s2598_s23 + $0x4c] sm:$0xf]  ;;  %v2471_v6 = vld [vmem:[%s2561_s17 + $0x1e0] sm:$0xff] }
  0x23   : > { %1110 = vmatpush.bf16.msra.mxu0 %v2413_v20  ;;  %v2360_v61 = vld [vmem:[%s2598_s23 + $0x64] sm:$0xf0]  ;;  %v1874_v63 = vld [vmem:[%s2598_s23 + $0x68] sm:$0xf0]  ;;  %v2455_v7 = vld [vmem:[%s2561_s17 + $0x160] sm:$0xff] }
  0x24   : > { %1159 = vmatpush.bf16.msra.mxu1 %v2421_v21  ;;  %v1873_v2 = vor.u32 %v2360_v61, %v1872_v60  ;;  %v1877_v3 = vor.u32 %v2356_v62, %v1874_v63  ;;  %v1896_v8 = vld [vmem:[%s2598_s23 + $0x80] sm:$0xf]  ;;  %v2363_v10 = vld [vmem:[%s2598_s23 + $0x84] sm:$0xf]  ;;  %v1904_v12 = vld [vmem:[%s2598_s23 + $0x88] sm:$0xf] }
  0x25   : > { %1208 = vmatpush.bf16.msra.mxu2 %v2429_v22  ;;  %v2367_v9 = vld [vmem:[%s2598_s23 + $0x9c] sm:$0xf0]  ;;  %v1898_v11 = vld [vmem:[%s2598_s23 + $0xa0] sm:$0xf0]  ;;  %v2368_v13 = vld [vmem:[%s2598_s23 + $0xa4] sm:$0xf0] }
  0x26   : > { %1257 = vmatpush.bf16.msra.mxu3 %v2437_v23  ;;  %v2364_v14 = vld [vmem:[%s2598_s23 + $0x8c] sm:$0xf]  ;;  %v1897_v16 = vor.u32 %v2367_v9, %v1896_v8  ;;  %v1901_v17 = vor.u32 %v2363_v10, %v1898_v11  ;;  %v1905_v18 = vor.u32 %v2368_v13, %v1904_v12  ;;  %v2462_v20 = vld [vmem:[%s2561_s17 + $0x198] sm:$0xff]  ;;  %v2469_v38 = vld [vmem:[%s2561_s17 + $0x1d0] sm:$0xff] }
  0x27   : > { %1111 = vmatpush.bf16.msra.mxu0 %v2412_v24  ;;  %v1906_v15 = vld [vmem:[%s2598_s23 + $0xa8] sm:$0xf0]  ;;  %v2446_v21 = vld [vmem:[%s2561_s17 + $0x118] sm:$0xff]  ;;  %v1928_v24 = vld [vmem:[%s2598_s23 + $0xc0] sm:$0xf] }
  0x28   : > { %1160 = vmatpush.bf16.msra.mxu1 %v2420_v25  ;;  %v1909_v19 = vor.u32 %v2364_v14, %v1906_v15  ;;  %v2470_v22 = vld [vmem:[%s2561_s17 + $0x1d8] sm:$0xff]  ;;  %v2375_v25 = vld [vmem:[%s2598_s23 + $0xdc] sm:$0xf0]  ;;  %v2453_v39 = vld [vmem:[%s2561_s17 + $0x150] sm:$0xff] }
  0x29   : > { %1209 = vmatpush.bf16.msra.mxu2 %v2428_v26  ;;  %v2454_v23 = vld [vmem:[%s2561_s17 + $0x158] sm:$0xff]  ;;  %v2371_v26 = vld [vmem:[%s2598_s23 + $0xc4] sm:$0xf]  ;;  %v1929_v32 = vor.u32 %v2375_v25, %v1928_v24  ;;  %v1992_v56 = vld [vmem:[%s2598_s23 + $0x140] sm:$0xf] }
  0x2a   : > { %1258 = vmatpush.bf16.msra.mxu3 %v2436_v27  ;;  %v1930_v27 = vld [vmem:[%s2598_s23 + $0xe0] sm:$0xf0]  ;;  %v2391_v57 = vld [vmem:[%s2598_s23 + $0x15c] sm:$0xf0]  ;;  %v2000_v60 = vld [vmem:[%s2598_s23 + $0x148] sm:$0xf] }
  0x2b   : > { %1112 = vmatpush.bf16.msra.mxu0 %v2411_v28  ;;  %v1936_v28 = vld [vmem:[%s2598_s23 + $0xc8] sm:$0xf]  ;;  %v1933_v33 = vor.u32 %v2371_v26, %v1930_v27  ;;  %v2387_v58 = vld [vmem:[%s2598_s23 + $0x144] sm:$0xf]  ;;  %v2388_v62 = vld [vmem:[%s2598_s23 + $0x14c] sm:$0xf] }
  0x2c   : > { %1161 = vmatpush.bf16.msra.mxu1 %v2419_v29  ;;  %v2376_v29 = vld [vmem:[%s2598_s23 + $0xe4] sm:$0xf0]  ;;  %v1994_v59 = vld [vmem:[%s2598_s23 + $0x160] sm:$0xf0]  ;;  %v2002_v63 = vld [vmem:[%s2598_s23 + $0x168] sm:$0xf0] }
  0x2d   : > { %1210 = vmatpush.bf16.msra.mxu2 %v2427_v30  ;;  %v2372_v30 = vld [vmem:[%s2598_s23 + $0xcc] sm:$0xf]  ;;  %v1937_v34 = vor.u32 %v2376_v29, %v1936_v28  ;;  %v2392_v61 = vld [vmem:[%s2598_s23 + $0x164] sm:$0xf0]  ;;  %v2024_v8 = vld [vmem:[%s2598_s23 + $0x180] sm:$0xf] }
  0x2e   : > { %1259 = vmatpush.bf16.msra.mxu3 %v2435_v31  ;;  %1113 = vmatmul.bf16.vlgmr.msra.gmra.mxu0 %v1833_v42  ;;  %v1938_v31 = vld [vmem:[%s2598_s23 + $0xe8] sm:$0xf0]  ;;  %v2379_v42 = vld [vmem:[%s2598_s23 + $0x104] sm:$0xf]  ;;  %v2399_v9 = vld [vmem:[%s2598_s23 + $0x19c] sm:$0xf0] }
  0x2f   : > { %1301 = vmatpush.bf16.msrb.mxu0 %v2450_v41  ;;  %1162 = vmatmul.bf16.vlgmr.msra.gmra.mxu1 %v1837_v43  ;;  %v1941_v35 = vor.u32 %v2372_v30, %v1938_v31  ;;  %v2383_v41 = vld [vmem:[%s2598_s23 + $0x11c] sm:$0xf0]  ;;  %v1962_v43 = vld [vmem:[%s2598_s23 + $0x120] sm:$0xf0]  ;;  %v2032_v12 = vld [vmem:[%s2598_s23 + $0x188] sm:$0xf] }
  0x30   : > { %1211 = vmatmul.bf16.vlgmr.msra.gmra.mxu2 %v1841_v44  ;;  %1350 = vmatpush.bf16.msrb.mxu1 %v2458_v47  ;;  %v1968_v44 = vld [vmem:[%s2598_s23 + $0x108] sm:$0xf]  ;;  %v1970_v47 = vld [vmem:[%s2598_s23 + $0x128] sm:$0xf0]  ;;  %v2395_v10 = vld [vmem:[%s2598_s23 + $0x184] sm:$0xf] }
  0x31   : > { %1399 = vmatpush.bf16.msrb.mxu2 %v2466_v40  ;;  %1260 = vmatmul.bf16.vlgmr.msra.gmra.mxu3 %v1845_v45  ;;  %v1960_v40 = vld [vmem:[%s2598_s23 + $0x100] sm:$0xf]  ;;  %v2384_v45 = vld [vmem:[%s2598_s23 + $0x124] sm:$0xf0]  ;;  %v2026_v11 = vld [vmem:[%s2598_s23 + $0x1a0] sm:$0xf0] }
  0x32   : > { %1448 = vmatpush.bf16.msrb.mxu3 %v2474_v46  ;;  %v2380_v46 = vld [vmem:[%s2598_s23 + $0x10c] sm:$0xf]  ;;  %v2400_v13 = vld [vmem:[%s2598_s23 + $0x1a4] sm:$0xf0] }
  0x33   : > { %1302 = vmatpush.bf16.msrb.mxu0 %v2449_v49  ;;  %v1965_v49 = vor.u32 %v2379_v42, %v1962_v43  ;;  %v2396_v14 = vld [vmem:[%s2598_s23 + $0x18c] sm:$0xf]  ;;  %v2064_v24 = vld [vmem:[%s2598_s23 + $0x1c8] sm:$0xf] }
  0x34   : > { %1351 = vmatpush.bf16.msrb.mxu1 %v2457_v51  ;;  %v1973_v51 = vor.u32 %v2380_v46, %v1970_v47  ;;  %v2034_v15 = vld [vmem:[%s2598_s23 + $0x1a8] sm:$0xf0]  ;;  %v2408_v25 = vld [vmem:[%s2598_s23 + $0x1e4] sm:$0xf0] }
  0x35   : > { %1400 = vmatpush.bf16.msrb.mxu2 %v2465_v48  ;;  %v1961_v48 = vor.u32 %v2383_v41, %v1960_v40  ;;  %v2404_v26 = vld [vmem:[%s2598_s23 + $0x1cc] sm:$0xf]  ;;  %v2065_v30 = vor.u32 %v2408_v25, %v2064_v24  ;;  %v1858_v40 = vld [vmem:[%s2598_s23 + $0x38] sm:$0xf0]  ;;  %v1914_v24 = vld [vmem:[%s2598_s23 + $0xb0] sm:$0xf0] }
  0x36   : > { %1449 = vmatpush.bf16.msrb.mxu3 %v2473_v50  ;;  %v1969_v50 = vor.u32 %v2384_v45, %v1968_v44  ;;  %v2066_v27 = vld [vmem:[%s2598_s23 + $0x1e8] sm:$0xf0]  ;;  %v1920_v25 = vld [vmem:[%s2598_s23 + $0x98] sm:$0xf] }
  0x37   : > { %1303 = vmatpush.bf16.msrb.mxu0 %v2448_v53  ;;  %v2444_v53 = vld [vmem:[%s2561_s17 + $0x108] sm:$0xff]  ;;  %v2069_v31 = vor.u32 %v2404_v26, %v2066_v27  ;;  %v2370_v26 = vld [vmem:[%s2598_s23 + $0xb4] sm:$0xf0]  ;;  %v2366_v27 = vld [vmem:[%s2598_s23 + $0x9c] sm:$0xf] }
  0x38   : > { %1352 = vmatpush.bf16.msrb.mxu1 %v2456_v55  ;;  %v2452_v55 = vld [vmem:[%s2561_s17 + $0x148] sm:$0xff] }
  0x39   : > { %1401 = vmatpush.bf16.msrb.mxu2 %v2464_v52  ;;  %v2460_v52 = vld [vmem:[%s2561_s17 + $0x188] sm:$0xff] }
  0x3a   : > { %1450 = vmatpush.bf16.msrb.mxu3 %v2472_v54  ;;  %v2468_v54 = vld [vmem:[%s2561_s17 + $0x1c8] sm:$0xff] }
  0x3b   : > { %1304 = vmatpush.bf16.msrb.mxu0 %v2447_v5  ;;  %v2443_v5 = vld [vmem:[%s2561_s17 + $0x100] sm:$0xff] }
  0x3c   : > { %1353 = vmatpush.bf16.msrb.mxu1 %v2455_v7  ;;  %v2451_v7 = vld [vmem:[%s2561_s17 + $0x140] sm:$0xff] }
  0x3d   : > { %1402 = vmatpush.bf16.msrb.mxu2 %v2463_v4  ;;  %v2459_v4 = vld [vmem:[%s2561_s17 + $0x180] sm:$0xff] }
  0x3e   : > { %1118 = vmatmul.bf16.gmra.mxu0 %v1865_v0  ;;  %1451 = vmatpush.bf16.msrb.mxu3 %v2471_v6  ;;  %v1993_v0 = vor.u32 %v2391_v57, %v1992_v56  ;;  %v2467_v6 = vld [vmem:[%s2561_s17 + $0x1c0] sm:$0xff]  ;;  %v1880_v57 = vld [vmem:[%s2598_s23 + $0x50] sm:$0xf] }
  0x3f   : > { %1167 = vmatmul.bf16.gmra.mxu1 %v1869_v1  ;;  %1305 = vmatpush.bf16.msrb.mxu0 %v2446_v21  ;;  %v1997_v1 = vor.u32 %v2387_v58, %v1994_v59  ;;  %v2407_v21 = vld [vmem:[%s2598_s23 + $0x1dc] sm:$0xf0]  ;;  %v2361_v58 = vld [vmem:[%s2598_s23 + $0x6c] sm:$0xf0]  ;;  %v2357_v59 = vld [vmem:[%s2598_s23 + $0x54] sm:$0xf] }
  0x40   : > { %1216 = vmatmul.bf16.gmra.mxu2 %v1873_v2  ;;  %1354 = vmatpush.bf16.msrb.mxu1 %v2454_v23  ;;  %v2001_v2 = vor.u32 %v2392_v61, %v2000_v60  ;;  %v2058_v23 = vld [vmem:[%s2598_s23 + $0x1e0] sm:$0xf0]  ;;  %v1882_v60 = vld [vmem:[%s2598_s23 + $0x70] sm:$0xf0]  ;;  %v1888_v61 = vld [vmem:[%s2598_s23 + $0x58] sm:$0xf] }
  0x41   : > { %1265 = vmatmul.bf16.gmra.mxu3 %v1877_v3  ;;  %1403 = vmatpush.bf16.msrb.mxu2 %v2462_v20  ;;  %v2005_v3 = vor.u32 %v2388_v62, %v2002_v63  ;;  %v2056_v20 = vld [vmem:[%s2598_s23 + $0x1c0] sm:$0xf]  ;;  %v2362_v62 = vld [vmem:[%s2598_s23 + $0x74] sm:$0xf0]  ;;  %v2358_v63 = vld [vmem:[%s2598_s23 + $0x5c] sm:$0xf] }
  0x42   : > { %1452 = vmatpush.bf16.msrb.mxu3 %v2470_v22  ;;  %v2403_v22 = vld [vmem:[%s2598_s23 + $0x1c4] sm:$0xf]  ;;  %v2057_v28 = vor.u32 %v2407_v21, %v2056_v20  ;;  %v1912_v21 = vld [vmem:[%s2598_s23 + $0x90] sm:$0xf] }
  0x43   : > { %1306 = vmatpush.bf16.msrb.mxu0 %v2445_v37  ;;  %v2061_v29 = vor.u32 %v2403_v22, %v2058_v23  ;;  %v1856_v37 = vld [vmem:[%s2598_s23 + $0x18] sm:$0xf]  ;;  %v2369_v22 = vld [vmem:[%s2598_s23 + $0xac] sm:$0xf0]  ;;  %v2365_v23 = vld [vmem:[%s2598_s23 + $0x94] sm:$0xf] }
  0x44   : > { %1355 = vmatpush.bf16.msrb.mxu1 %v2453_v39  ;;  %v2350_v39 = vld [vmem:[%s2598_s23 + $0x1c] sm:$0xf] }
  0x45   : > { %1404 = vmatpush.bf16.msrb.mxu2 %v2461_v36  ;;  %v1850_v36 = vld [vmem:[%s2598_s23 + $0x30] sm:$0xf0]  ;;  %v1861_v46 = vor.u32 %v2350_v39, %v1858_v40 }
  0x46   : > { %1453 = vmatpush.bf16.msrb.mxu3 %v2469_v38  ;;  %v2354_v38 = vld [vmem:[%s2598_s23 + $0x34] sm:$0xf0] }
  0x47   : > { %1307 = vmatpush.bf16.msrb.mxu0 %v2444_v53  ;;  %v1857_v45 = vor.u32 %v2354_v38, %v1856_v37  ;;  %v1921_v37 = vor.u32 %v2370_v26, %v1920_v25 }
  0x48   : > { %1356 = vmatpush.bf16.msrb.mxu1 %v2452_v55 }
  0x49   : > { %1405 = vmatpush.bf16.msrb.mxu2 %v2460_v52 }
  0x4a   : > { %1454 = vmatpush.bf16.msrb.mxu3 %v2468_v54 }
  0x4b   : > { %1308 = vmatpush.bf16.msrb.mxu0 %v2443_v5 }
  0x4c   : > { %1357 = vmatpush.bf16.msrb.mxu1 %v2451_v7 }
  0x4d   : > { %1406 = vmatpush.bf16.msrb.mxu2 %v2459_v4  ;;  %v1885_v4 = vor.u32 %v2357_v59, %v1882_v60 }
  0x4e   : > { %1123 = vmatmul.bf16.gmra.mxu0 %v1897_v16  ;;  %1455 = vmatpush.bf16.msrb.mxu3 %v2467_v6  ;;  %v2025_v16 = vor.u32 %v2399_v9, %v2024_v8  ;;  %v1889_v8 = vor.u32 %v2362_v62, %v1888_v61 }
  0x4f   : > { %1172 = vmatmul.bf16.gmra.mxu1 %v1901_v17  ;;  %v2029_v17 = vor.u32 %v2395_v10, %v2026_v11 }
  0x50   : > { %1221 = vmatmul.bf16.gmra.mxu2 %v1905_v18  ;;  %v2033_v18 = vor.u32 %v2400_v13, %v2032_v12 }
  0x51   : > { %1270 = vmatmul.bf16.gmra.mxu3 %v1909_v19  ;;  %v2037_v19 = vor.u32 %v2396_v14, %v2034_v15 }
  0x5e   : > { %1128 = vmatmul.bf16.gmra.mxu0 %v1929_v32  ;;  %v2707_v32 = vld [vmem:[%s199_s20] ss:$0 sm:$0xff] }
  0x5f   : > { %1177 = vmatmul.bf16.gmra.mxu1 %v1933_v33  ;;  %v1848_v33 = vld [vmem:[%s2598_s23 + $0x10] sm:$0xf] }
  0x60   : > { %1226 = vmatmul.bf16.gmra.mxu2 %v1937_v34  ;;  %v2353_v34 = vld [vmem:[%s2598_s23 + $0x2c] sm:$0xf0] }
  0x61   : > { %1275 = vmatmul.bf16.gmra.mxu3 %v1941_v35  ;;  %v2349_v35 = vld [vmem:[%s2598_s23 + $0x14] sm:$0xf]  ;;  %v1849_v41 = vor.u32 %v2353_v34, %v1848_v33  ;;  %v1917_v33 = vor.u32 %v2365_v23, %v1914_v24  ;;  %v2382_v23 = vld [vmem:[%s2598_s23 + $0x11c] sm:$0xf] }
  0x62   : > { %v1853_v42 = vor.u32 %v2349_v35, %v1850_v36  ;;  %v1986_v24 = vld [vmem:[%s2598_s23 + $0x138] sm:$0xf0] }
  0x6e   : > { %1133 = vmatmul.bf16.gmra.mxu0 %v1961_v48 }
  0x6f   : > { %1182 = vmatmul.bf16.gmra.mxu1 %v1965_v49 }
  0x70   : > { %1231 = vmatmul.bf16.gmra.mxu2 %v1969_v50 }
  0x71   : > { %1280 = vmatmul.bf16.gmra.mxu3 %v1973_v51 }
  0x7e   : > { %1138 = vmatmul.bf16.gmra.mxu0 %v1993_v0  ;;  %v1890_v0 = vld [vmem:[%s2598_s23 + $0x78] sm:$0xf0] }
  0x7f   : > { %1187 = vmatmul.bf16.gmra.mxu1 %v1997_v1  ;;  %v1893_v9 = vor.u32 %v2358_v63, %v1890_v0 }
  0x80   : > { %1236 = vmatmul.bf16.gmra.mxu2 %v2001_v2 }
  0x81   : > { %1285 = vmatmul.bf16.gmra.mxu3 %v2005_v3  ;;  %v1881_v3 = vor.u32 %v2361_v58, %v1880_v57  ;;  %v2374_v57 = vld [vmem:[%s2598_s23 + $0xdc] sm:$0xf] }
  0x82   : > { %v1954_v58 = vld [vmem:[%s2598_s23 + $0xf8] sm:$0xf0] }
  0x8e   : > { %1143 = vmatmul.bf16.gmra.mxu0 %v2025_v16 }
  0x8f   : > { %1192 = vmatmul.bf16.gmra.mxu1 %v2029_v17 }
  0x90   : > { %1241 = vmatmul.bf16.gmra.mxu2 %v2033_v18 }
  0x91   : > { %1290 = vmatmul.bf16.gmra.mxu3 %v2037_v19 }
  0x9e   : > { %1148 = vmatmul.bf16.gmra.mxu0 %v2057_v28  ;;  %v1922_v28 = vld [vmem:[%s2598_s23 + $0xb8] sm:$0xf0] }
  0x9f   : > { %1197 = vmatmul.bf16.gmra.mxu1 %v2061_v29  ;;  %v1925_v38 = vor.u32 %v2366_v27, %v1922_v28 }
  0xa0   : > { %1246 = vmatmul.bf16.gmra.mxu2 %v2065_v30 }
  0xa1   : > { %1295 = vmatmul.bf16.gmra.mxu3 %v2069_v31  ;;  %v1913_v31 = vor.u32 %v2369_v22, %v1912_v21  ;;  %v1984_v21 = vld [vmem:[%s2598_s23 + $0x118] sm:$0xf] }
  0xa2   : > { %v2386_v22 = vld [vmem:[%s2598_s23 + $0x134] sm:$0xf0] }
  0xab   : > { %v1114_v43 = vpop.f32.mrf.mxu0 }
  0xac   : > { %v1163_v44 = vpop.f32.mrf.mxu1  ;;  %v1115_v47 = vadd.f32 %v2707_v32, %v1114_v43 }
  0xae   : > { %v1164_v48 = vadd.f32 %v1163_v44, %v1115_v47  ;;  %1309 = vmatmul.bf16.vlgmr.msrb.gmra.mxu0 %v1849_v41 }
  0xaf   : > { %1358 = vmatmul.bf16.vlgmr.msrb.gmra.mxu1 %v1853_v42 }
  0xb0   : > { %1407 = vmatmul.bf16.vlgmr.msrb.gmra.mxu2 %v1857_v45 }
  0xb1   : > { %1456 = vmatmul.bf16.vlgmr.msrb.gmra.mxu3 %v1861_v46 }
  0xb3   : > { %v1212_v49 = vpop.f32.mrf.mxu2  ;;  %v1116_v52 = vpop.f32.mrf.mxu0 }
  0xb4   : > { %v1261_v50 = vpop.f32.mrf.mxu3  ;;  %v1213_v51 = vadd.f32 %v1212_v49, %v1164_v48  ;;  %v1165_v53 = vpop.f32.mrf.mxu1  ;;  %v1117_v54 = vadd.f32 %v2707_v32, %v1116_v52  ;;  %v2373_v52 = vld [vmem:[%s2598_s23 + $0xd4] sm:$0xf] }
  0xb6   : > { %v2719_v55 = vadd.f32 %v1261_v50, %v1213_v51  ;;  %v1166_v56 = vadd.f32 %v1165_v53, %v1117_v54  ;;  %v1944_v50 = vld [vmem:[%s2598_s23 + $0xd0] sm:$0xf]  ;;  %v1946_v53 = vld [vmem:[%s2598_s23 + $0xf0] sm:$0xf0]  ;;  %v1952_v54 = vld [vmem:[%s2598_s23 + $0xd8] sm:$0xf] }
  0xb7   : > { %v2377_v51 = vld [vmem:[%s2598_s23 + $0xec] sm:$0xf0]  ;;  %v1949_v62 = vor.u32 %v2373_v52, %v1946_v53  ;;  %v2016_v52 = vld [vmem:[%s2598_s23 + $0x158] sm:$0xf] }
  0xb8   : > { %v1945_v61 = vor.u32 %v2377_v51, %v1944_v50  ;;  %v2389_v50 = vld [vmem:[%s2598_s23 + $0x154] sm:$0xf]  ;;  %v2394_v53 = vld [vmem:[%s2598_s23 + $0x174] sm:$0xf0] }
  0xb9   : > { %v2010_v51 = vld [vmem:[%s2598_s23 + $0x170] sm:$0xf0] }
  0xbb   : > { %v1214_v1 = vpop.f32.mrf.mxu2  ;;  %v1119_v6 = vpop.f32.mrf.mxu0 }
  0xbc   : > { %v1263_v2 = vpop.f32.mrf.mxu3  ;;  %v1215_v5 = vadd.f32 %v1214_v1, %v1166_v56  ;;  %v1168_v7 = vpop.f32.mrf.mxu1  ;;  %v1120_v10 = vadd.f32 %v2707_v32, %v1119_v6  ;;  %v2378_v56 = vld [vmem:[%s2598_s23 + $0xf4] sm:$0xf0] }
  0xbe   : > { %v2730_v11 = vadd.f32 %v1263_v2, %v1215_v5  ;;  %v1169_v12 = vadd.f32 %v1168_v7, %v1120_v10  ;;  %1314 = vmatmul.bf16.gmra.mxu0 %v1881_v3  ;;  %v1953_v2 = vor.u32 %v2378_v56, %v1952_v54  ;;  %v1957_v3 = vor.u32 %v2374_v57, %v1954_v58  ;;  %v2390_v54 = vld [vmem:[%s2598_s23 + $0x15c] sm:$0xf] }
  0xbf   : > { %1363 = vmatmul.bf16.gmra.mxu1 %v1885_v4  ;;  %v2018_v56 = vld [vmem:[%s2598_s23 + $0x178] sm:$0xf0] }
  0xc0   : > { %1412 = vmatmul.bf16.gmra.mxu2 %v1889_v8 }
  0xc1   : > { %1461 = vmatmul.bf16.gmra.mxu3 %v1893_v9 }
  0xc3   : > { %v1217_v13 = vpop.f32.mrf.mxu2  ;;  %v1121_v16 = vpop.f32.mrf.mxu0 }
  0xc4   : > { %v1266_v14 = vpop.f32.mrf.mxu3  ;;  %v1218_v15 = vadd.f32 %v1217_v13, %v1169_v12  ;;  %v1170_v17 = vpop.f32.mrf.mxu1  ;;  %v1122_v18 = vadd.f32 %v2707_v32, %v1121_v16  ;;  %v1976_v16 = vld [vmem:[%s2598_s23 + $0x110] sm:$0xf] }
  0xc6   : > { %v2733_v19 = vadd.f32 %v1266_v14, %v1218_v15  ;;  %v1171_v20 = vadd.f32 %v1170_v17, %v1122_v18  ;;  %v2385_v17 = vld [vmem:[%s2598_s23 + $0x12c] sm:$0xf0]  ;;  %v2381_v18 = vld [vmem:[%s2598_s23 + $0x114] sm:$0xf] }
  0xc7   : > { %v1977_v27 = vor.u32 %v2385_v17, %v1976_v16  ;;  %v2040_v16 = vld [vmem:[%s2598_s23 + $0x190] sm:$0xf] }
  0xc8   : > { %v2401_v17 = vld [vmem:[%s2598_s23 + $0x1ac] sm:$0xf0] }
  0xcb   : > { %v1219_v29 = vpop.f32.mrf.mxu2  ;;  %v1124_v35 = vpop.f32.mrf.mxu0 }
  0xcc   : > { %v1268_v30 = vpop.f32.mrf.mxu3  ;;  %v1220_v34 = vadd.f32 %v1219_v29, %v1171_v20  ;;  %v1173_v36 = vpop.f32.mrf.mxu1  ;;  %v1125_v39 = vadd.f32 %v2707_v32, %v1124_v35  ;;  %v1978_v20 = vld [vmem:[%s2598_s23 + $0x130] sm:$0xf0] }
  0xcd   : > { %v1981_v28 = vor.u32 %v2381_v18, %v1978_v20  ;;  %v2397_v18 = vld [vmem:[%s2598_s23 + $0x194] sm:$0xf] }
  0xce   : > { %v2744_v40 = vadd.f32 %v1268_v30, %v1220_v34  ;;  %v1174_v41 = vadd.f32 %v1173_v36, %v1125_v39  ;;  %1319 = vmatmul.bf16.gmra.mxu0 %v1913_v31  ;;  %v1989_v34 = vor.u32 %v2382_v23, %v1986_v24  ;;  %v2042_v20 = vld [vmem:[%s2598_s23 + $0x1b0] sm:$0xf0]  ;;  %v2398_v23 = vld [vmem:[%s2598_s23 + $0x19c] sm:$0xf] }
  0xcf   : > { %1368 = vmatmul.bf16.gmra.mxu1 %v1917_v33  ;;  %v1985_v33 = vor.u32 %v2386_v22, %v1984_v21  ;;  %v2048_v21 = vld [vmem:[%s2598_s23 + $0x198] sm:$0xf]  ;;  %v2050_v24 = vld [vmem:[%s2598_s23 + $0x1b8] sm:$0xf0] }
  0xd0   : > { %1417 = vmatmul.bf16.gmra.mxu2 %v1921_v37  ;;  %v2402_v22 = vld [vmem:[%s2598_s23 + $0x1b4] sm:$0xf0] }
  0xd1   : > { %1466 = vmatmul.bf16.gmra.mxu3 %v1925_v38 }
  0xd3   : > { %v1222_v42 = vpop.f32.mrf.mxu2  ;;  %v1126_v45 = vpop.f32.mrf.mxu0 }
  0xd4   : > { %v1271_v43 = vpop.f32.mrf.mxu3  ;;  %v1223_v44 = vadd.f32 %v1222_v42, %v1174_v41  ;;  %v1175_v46 = vpop.f32.mrf.mxu1  ;;  %v1127_v47 = vadd.f32 %v2707_v32, %v1126_v45 }
  0xd6   : > { %v2747_v48 = vadd.f32 %v1271_v43, %v1223_v44  ;;  %v1176_v49 = vadd.f32 %v1175_v46, %v1127_v47  ;;  %v2008_v47 = vld [vmem:[%s2598_s23 + $0x150] sm:$0xf] }
  0xdb   : > { %v1224_v59 = vpop.f32.mrf.mxu2  ;;  %v1129_v0 = vpop.f32.mrf.mxu0 }
  0xdc   : > { %v1273_v60 = vpop.f32.mrf.mxu3  ;;  %v1225_v63 = vadd.f32 %v1224_v59, %v1176_v49  ;;  %v1178_v1 = vpop.f32.mrf.mxu1  ;;  %v1130_v4 = vadd.f32 %v2707_v32, %v1129_v0  ;;  %v2393_v49 = vld [vmem:[%s2598_s23 + $0x16c] sm:$0xf0]  ;;  %v2017_v0 = vor.u32 %v2394_v53, %v2016_v52  ;;  %v2405_v52 = vld [vmem:[%s2598_s23 + $0x1d4] sm:$0xf] }
  0xdd   : > { %v2009_v59 = vor.u32 %v2393_v49, %v2008_v47  ;;  %v2074_v53 = vld [vmem:[%s2598_s23 + $0x1f0] sm:$0xf0] }
  0xde   : > { %v2758_v5 = vadd.f32 %v1273_v60, %v1225_v63  ;;  %v1179_v6 = vadd.f32 %v1178_v1, %v1130_v4  ;;  %1324 = vmatmul.bf16.gmra.mxu0 %v1945_v61  ;;  %v2013_v60 = vor.u32 %v2389_v50, %v2010_v51  ;;  %v2021_v1 = vor.u32 %v2390_v54, %v2018_v56  ;;  %v2072_v50 = vld [vmem:[%s2598_s23 + $0x1d0] sm:$0xf]  ;;  %v2080_v54 = vld [vmem:[%s2598_s23 + $0x1d8] sm:$0xf] }
  0xdf   : > { %1373 = vmatmul.bf16.gmra.mxu1 %v1949_v62  ;;  %v2409_v51 = vld [vmem:[%s2598_s23 + $0x1ec] sm:$0xf0]  ;;  %v2410_v56 = vld [vmem:[%s2598_s23 + $0x1f4] sm:$0xf0] }
  0xe0   : > { %1422 = vmatmul.bf16.gmra.mxu2 %v1953_v2 }
  0xe1   : > { %1471 = vmatmul.bf16.gmra.mxu3 %v1957_v3 }
  0xe3   : > { %v1227_v7 = vpop.f32.mrf.mxu2  ;;  %v1131_v10 = vpop.f32.mrf.mxu0 }
  0xe4   : > { %v1276_v8 = vpop.f32.mrf.mxu3  ;;  %v1228_v9 = vadd.f32 %v1227_v7, %v1179_v6  ;;  %v1180_v12 = vpop.f32.mrf.mxu1  ;;  %v1132_v13 = vadd.f32 %v2707_v32, %v1131_v10 }
  0xe6   : > { %v2761_v14 = vadd.f32 %v1276_v8, %v1228_v9  ;;  %v1181_v15 = vadd.f32 %v1180_v12, %v1132_v13 }
  0xeb   : > { %v1229_v25 = vpop.f32.mrf.mxu2  ;;  %v1134_v30 = vpop.f32.mrf.mxu0 }
  0xec   : > { %v1278_v26 = vpop.f32.mrf.mxu3  ;;  %v1230_v29 = vadd.f32 %v1229_v25, %v1181_v15  ;;  %v1183_v31 = vpop.f32.mrf.mxu1  ;;  %v1135_v35 = vadd.f32 %v2707_v32, %v1134_v30 }
  0xee   : > { %v2772_v36 = vadd.f32 %v1278_v26, %v1230_v29  ;;  %v1184_v37 = vadd.f32 %v1183_v31, %v1135_v35  ;;  %1329 = vmatmul.bf16.gmra.mxu0 %v1977_v27  ;;  %v2041_v27 = vor.u32 %v2401_v17, %v2040_v16 }
  0xef   : > { %1378 = vmatmul.bf16.gmra.mxu1 %v1981_v28  ;;  %v2045_v28 = vor.u32 %v2397_v18, %v2042_v20 }
  0xf0   : > { %1427 = vmatmul.bf16.gmra.mxu2 %v1985_v33  ;;  %v2049_v33 = vor.u32 %v2402_v22, %v2048_v21 }
  0xf1   : > { %1476 = vmatmul.bf16.gmra.mxu3 %v1989_v34  ;;  %v2053_v34 = vor.u32 %v2398_v23, %v2050_v24 }
  0xf3   : > { %v1232_v38 = vpop.f32.mrf.mxu2  ;;  %v1136_v42 = vpop.f32.mrf.mxu0 }
  0xf4   : > { %v1281_v39 = vpop.f32.mrf.mxu3  ;;  %v1233_v41 = vadd.f32 %v1232_v38, %v1184_v37  ;;  %v1185_v43 = vpop.f32.mrf.mxu1  ;;  %v1137_v44 = vadd.f32 %v2707_v32, %v1136_v42 }
  0xf6   : > { %v2775_v45 = vadd.f32 %v1281_v39, %v1233_v41  ;;  %v1186_v46 = vadd.f32 %v1185_v43, %v1137_v44 }
  0xfb   : > { %v1234_v57 = vpop.f32.mrf.mxu2  ;;  %v1139_v62 = vpop.f32.mrf.mxu0 }
  0xfc   : > { %v1283_v58 = vpop.f32.mrf.mxu3  ;;  %v1235_v61 = vadd.f32 %v1234_v57, %v1186_v46  ;;  %v1188_v63 = vpop.f32.mrf.mxu1  ;;  %v1140_v2 = vadd.f32 %v2707_v32, %v1139_v62  ;;  %v2406_v57 = vld [vmem:[%s2598_s23 + $0x1dc] sm:$0xf]  ;;  %v2077_v62 = vor.u32 %v2405_v52, %v2074_v53 }
  0xfe   : > { %v2786_v3 = vadd.f32 %v1283_v58, %v1235_v61  ;;  %v1189_v4 = vadd.f32 %v1188_v63, %v1140_v2  ;;  %1334 = vmatmul.bf16.gmra.mxu0 %v2009_v59  ;;  %v2082_v58 = vld [vmem:[%s2598_s23 + $0x1f8] sm:$0xf0]  ;;  %v2073_v61 = vor.u32 %v2409_v51, %v2072_v50  ;;  %v2081_v2 = vor.u32 %v2410_v56, %v2080_v54 }
  0xff   : > { %1383 = vmatmul.bf16.gmra.mxu1 %v2013_v60 }
 0x100   : > { %1432 = vmatmul.bf16.gmra.mxu2 %v2017_v0 }
 0x101   : > { %1481 = vmatmul.bf16.gmra.mxu3 %v2021_v1 }
 0x103   : > { %v1237_v6 = vpop.f32.mrf.mxu2  ;;  %v1141_v9 = vpop.f32.mrf.mxu0 }
 0x104   : > { %v1286_v7 = vpop.f32.mrf.mxu3  ;;  %v1238_v8 = vadd.f32 %v1237_v6, %v1189_v4  ;;  %v1190_v10 = vpop.f32.mrf.mxu1  ;;  %v1142_v12 = vadd.f32 %v2707_v32, %v1141_v9  ;;  %v2085_v4 = vor.u32 %v2406_v57, %v2082_v58 }
 0x106   : > { %v2789_v13 = vadd.f32 %v1286_v7, %v1238_v8  ;;  %v1191_v15 = vadd.f32 %v1190_v10, %v1142_v12 }
 0x10b   : > { %v1239_v25 = vpop.f32.mrf.mxu2  ;;  %v1144_v30 = vpop.f32.mrf.mxu0 }
 0x10c   : > { %v1288_v26 = vpop.f32.mrf.mxu3  ;;  %v1240_v29 = vadd.f32 %v1239_v25, %v1191_v15  ;;  %v1193_v31 = vpop.f32.mrf.mxu1  ;;  %v1145_v35 = vadd.f32 %v2707_v32, %v1144_v30 }
 0x10e   : > { %v2800_v37 = vadd.f32 %v1288_v26, %v1240_v29  ;;  %v1194_v38 = vadd.f32 %v1193_v31, %v1145_v35  ;;  %1339 = vmatmul.bf16.gmra.mxu0 %v2041_v27 }
 0x10f   : > { %1388 = vmatmul.bf16.gmra.mxu1 %v2045_v28 }
 0x110   : > { %1437 = vmatmul.bf16.gmra.mxu2 %v2049_v33 }
 0x111   : > { %1486 = vmatmul.bf16.gmra.mxu3 %v2053_v34 }
 0x113   : > { %v1242_v39 = vpop.f32.mrf.mxu2  ;;  %v1146_v43 = vpop.f32.mrf.mxu0 }
 0x114   : > { %v1291_v41 = vpop.f32.mrf.mxu3  ;;  %v1243_v42 = vadd.f32 %v1242_v39, %v1194_v38  ;;  %v1195_v44 = vpop.f32.mrf.mxu1  ;;  %v1147_v46 = vadd.f32 %v2707_v32, %v1146_v43 }
 0x116   : > { %v2803_v47 = vadd.f32 %v1291_v41, %v1243_v42  ;;  %v1196_v49 = vadd.f32 %v1195_v44, %v1147_v46 }
 0x11b   : > { %v1244_v59 = vpop.f32.mrf.mxu2  ;;  %v1149_v0 = vpop.f32.mrf.mxu0 }
 0x11c   : > { %v1293_v60 = vpop.f32.mrf.mxu3  ;;  %v1245_v63 = vadd.f32 %v1244_v59, %v1196_v49  ;;  %v1198_v1 = vpop.f32.mrf.mxu1  ;;  %v1150_v6 = vadd.f32 %v2707_v32, %v1149_v0 }
 0x11e   : > { %v2814_v7 = vadd.f32 %v1293_v60, %v1245_v63  ;;  %v1199_v8 = vadd.f32 %v1198_v1, %v1150_v6  ;;  %1344 = vmatmul.bf16.gmra.mxu0 %v2073_v61 }
 0x11f   : > { %1393 = vmatmul.bf16.gmra.mxu1 %v2077_v62 }
 0x120   : > { %1442 = vmatmul.bf16.gmra.mxu2 %v2081_v2 }
 0x121   : > { %1491 = vmatmul.bf16.gmra.mxu3 %v2085_v4 }
 0x123   : > { %v1247_v9 = vpop.f32.mrf.mxu2  ;;  %v1151_v15 = vpop.f32.mrf.mxu0 }
 0x124   : > { %v1296_v10 = vpop.f32.mrf.mxu3  ;;  %v1248_v12 = vadd.f32 %v1247_v9, %v1199_v8  ;;  %v1200_v16 = vpop.f32.mrf.mxu1  ;;  %v1152_v17 = vadd.f32 %v2707_v32, %v1151_v15 }
 0x126   : > { %v2817_v18 = vadd.f32 %v1296_v10, %v1248_v12  ;;  %v1201_v20 = vadd.f32 %v1200_v16, %v1152_v17 }
 0x12b   : > { %v1249_v21 = vpop.f32.mrf.mxu2  ;;  %v1310_v24 = vpop.f32.mrf.mxu0 }
 0x12c   : > { %v1298_v22 = vpop.f32.mrf.mxu3  ;;  %v1250_v23 = vadd.f32 %v1249_v21, %v1201_v20  ;;  %v1359_v25 = vpop.f32.mrf.mxu1  ;;  %v1311_v26 = vadd.f32 %v1310_v24, %v2719_v55 }
 0x12e   : > { %v2820_v27 = vadd.f32 %v1298_v22, %v1250_v23  ;;  %v1360_v28 = vadd.f32 %v1359_v25, %v1311_v26 }
 0x133   : > { %v1408_v29 = vpop.f32.mrf.mxu2  ;;  %v1312_v33 = vpop.f32.mrf.mxu0 }
 0x134   : > { %v1457_v30 = vpop.f32.mrf.mxu3  ;;  %v1409_v31 = vadd.f32 %v1408_v29, %v1360_v28  ;;  %v1361_v34 = vpop.f32.mrf.mxu1  ;;  %v1313_v32 = vadd.f32 %v1312_v33, %v2730_v11 }
 0x136   : > { %v2823_v35 = vadd.f32 %v1457_v30, %v1409_v31  ;;  %v1362_v38 = vadd.f32 %v1361_v34, %v1313_v32 }
 0x138   : > { %v1498_v50 = vsel %vm1497_vm0, %v2823_v35, 0.0 }
 0x13b   : > { %v1410_v39 = vpop.f32.mrf.mxu2  ;;  %v1315_v43 = vpop.f32.mrf.mxu0 }
 0x13c   : > { %v1459_v41 = vpop.f32.mrf.mxu3  ;;  %v1411_v42 = vadd.f32 %v1410_v39, %v1362_v38  ;;  %v1364_v44 = vpop.f32.mrf.mxu1  ;;  %v1316_v55 = vadd.f32 %v1315_v43, %v2733_v19  ;;  %v2523_v39 = vmov 64.0  }
 0x13d   : > { %2509 = vrcp.f32 %v2523_v39 }
 0x13e   : > { %v2826_v46 = vadd.f32 %v1459_v41, %v1411_v42  ;;  %v1365_v49 = vadd.f32 %v1364_v44, %v1316_v55 }
 0x140   : > { %v1499_v11 = vsel %vm1497_vm0, %v2826_v46, 0.0 }
 0x141   : > { %v1500_v51 = vadd.f32 %v1499_v11, %v1498_v50 }
 0x143   : > { %v1413_v52 = vpop.f32.mrf.mxu2  ;;  %v1317_v56 = vpop.f32.mrf.mxu0 }
 0x144   : > { %v1462_v53 = vpop.f32.mrf.mxu3  ;;  %v1414_v54 = vadd.f32 %v1413_v52, %v1365_v49  ;;  %v1366_v57 = vpop.f32.mrf.mxu1  ;;  %v1318_v58 = vadd.f32 %v1317_v56, %v2744_v40 }
 0x145   : > { %v2510_v11 = vpop.eup %2509 }
 0x146   : > { %v2833_v59 = vadd.f32 %v1462_v53, %v1414_v54  ;;  %v1367_v19 = vadd.f32 %v1366_v57, %v1318_v58  ;;  %v1520_v54 = vmul.f32 64.0, %v2510_v11  ;;  %vm1524_vm1 = vweird.f32 %v2510_v11 }
 0x148   : > { %v1501_v60 = vsel %vm1497_vm0, %v2833_v59, 0.0 }
 0x149   : > { %v1502_v61 = vadd.f32 %v1501_v60, %v1500_v51  ;;  %v1521_v60 = vsub.f32 1.0, %v1520_v54 }
 0x14b   : > { %v1415_v62 = vpop.f32.mrf.mxu2  ;;  %v1320_v1 = vpop.f32.mrf.mxu0 }
 0x14c   : > { %v1464_v63 = vpop.f32.mrf.mxu3  ;;  %v1416_v0 = vadd.f32 %v1415_v62, %v1367_v19  ;;  %v1369_v2 = vpop.f32.mrf.mxu1  ;;  %v1321_v4 = vadd.f32 %v1320_v1, %v2747_v48 }
 0x14e   : > { %v2838_v6 = vadd.f32 %v1464_v63, %v1416_v0  ;;  %v1370_v8 = vadd.f32 %v1369_v2, %v1321_v4  ;;  %v1522_v0 = vmul.f32 %v2510_v11, %v1521_v60 }
 0x150   : > { %v1503_v40 = vsel %vm1497_vm0, %v2838_v6, 0.0 }
 0x151   : > { %v1504_v9 = vadd.f32 %v1503_v40, %v1502_v61 }
 0x153   : > { %v1418_v10 = vpop.f32.mrf.mxu2  ;;  %v1322_v16 = vpop.f32.mrf.mxu0 }
 0x154   : > { %v1467_v12 = vpop.f32.mrf.mxu3  ;;  %v1419_v15 = vadd.f32 %v1418_v10, %v1370_v8  ;;  %v1371_v17 = vpop.f32.mrf.mxu1  ;;  %v1323_v20 = vadd.f32 %v1322_v16, %v2758_v5  ;;  %v1523_v10 = vadd.f32 %v2510_v11, %v1522_v0 }
 0x156   : > { %v2843_v21 = vadd.f32 %v1467_v12, %v1419_v15  ;;  %v1372_v22 = vadd.f32 %v1371_v17, %v1323_v20 }
 0x158   : > { %v1505_v48 = vsel %vm1497_vm0, %v2843_v21, 0.0 }
 0x159   : > { %v1506_v23 = vadd.f32 %v1505_v48, %v1504_v9  ;;  %v2854_v48 = vsel %vm1524_vm1, %v2510_v11, %v1523_v10 }
 0x15b   : > { %v1420_v24 = vpop.f32.mrf.mxu2  ;;  %v1325_v28 = vpop.f32.mrf.mxu0 }
 0x15c   : > { %v1469_v25 = vpop.f32.mrf.mxu3  ;;  %v1421_v26 = vadd.f32 %v1420_v24, %v1372_v22  ;;  %v1374_v29 = vpop.f32.mrf.mxu1  ;;  %v1326_v30 = vadd.f32 %v1325_v28, %v2761_v14 }
 0x15e   : > { %v1470_v31 = vadd.f32 %v1469_v25, %v1421_v26  ;;  %v1375_v33 = vadd.f32 %v1374_v29, %v1326_v30 }
 0x160   : > { %v1507_v34 = vsel %vm1497_vm0, %v1470_v31, 0.0 }
 0x161   : > { %v1508_v32 = vadd.f32 %v1507_v34, %v1506_v23 }
 0x163   : > { %v1423_v5 = vpop.f32.mrf.mxu2  ;;  %v1327_v42 = vpop.f32.mrf.mxu0 }
 0x164   : > { %v1472_v38 = vpop.f32.mrf.mxu3  ;;  %v1424_v41 = vadd.f32 %v1423_v5, %v1375_v33  ;;  %v1376_v43 = vpop.f32.mrf.mxu1  ;;  %v1328_v44 = vadd.f32 %v1327_v42, %v2772_v36 }
 0x166   : > { %v1473_v55 = vadd.f32 %v1472_v38, %v1424_v41  ;;  %v1377_v49 = vadd.f32 %v1376_v43, %v1328_v44 }
 0x168   : > { %v1509_v50 = vsel %vm1497_vm0, %v1473_v55, 0.0 }
 0x169   : > { %v1510_v14 = vadd.f32 %v1509_v50, %v1508_v32 }
 0x16b   : > { %v1425_v51 = vpop.f32.mrf.mxu2  ;;  %v1330_v56 = vpop.f32.mrf.mxu0 }
 0x16c   : > { %v1474_v52 = vpop.f32.mrf.mxu3  ;;  %v1426_v53 = vadd.f32 %v1425_v51, %v1377_v49  ;;  %v1379_v57 = vpop.f32.mrf.mxu1  ;;  %v1331_v8 = vadd.f32 %v1330_v56, %v2775_v45 }
 0x16e   : > { %v1475_v58 = vadd.f32 %v1474_v52, %v1426_v53  ;;  %v1380_v15 = vadd.f32 %v1379_v57, %v1331_v8 }
 0x170   : > { %v1511_v19 = vsel %vm1497_vm0, %v1475_v58, 0.0 }
 0x171   : > { %v1512_v61 = vadd.f32 %v1511_v19, %v1510_v14 }
 0x173   : > { %v1513_v62 = vrot.slane %v1512_v61, 4  ;;  %v1428_v63 = vpop.f32.mrf.mxu2  ;;  %v1332_v1 = vpop.f32.mrf.mxu0 }
 0x174   : > { %v1477_v36 = vpop.f32.mrf.mxu3  ;;  %v1381_v2 = vpop.f32.mrf.mxu1  ;;  %v1333_v40 = vadd.f32 %v1332_v1, %v2786_v3  ;;  %v1429_v23 = vadd.f32 %v1428_v63, %v1380_v15 }
 0x175   : > { %v1514_v4 = vadd.f32 %v1513_v62, %v1512_v61 }
 0x176   : > { %v1382_v16 = vadd.f32 %v1381_v2, %v1333_v40  ;;  %v2857_v29 = vadd.f32 %v1477_v36, %v1429_v23 }
 0x177   : > { %v1515_v9 = vrot.slane %v1514_v4, 2 }
 0x178   : > { %v1584_v51 = vsel %vm1497_vm0, %v2857_v29, 0.0 }
 0x179   : > { %v1516_v12 = vadd.f32 %v1515_v9, %v1514_v4 }
 0x17b   : > { %v1517_v17 = vrot.slane %v1516_v12, 1  ;;  %v1430_v20 = vpop.f32.mrf.mxu2  ;;  %v1335_v25 = vpop.f32.mrf.mxu0 }
 0x17c   : > { %v1479_v22 = vpop.f32.mrf.mxu3  ;;  %v1431_v24 = vadd.f32 %v1430_v20, %v1382_v16  ;;  %v1384_v26 = vpop.f32.mrf.mxu1  ;;  %v1336_v30 = vadd.f32 %v1335_v25, %v2789_v13 }
 0x17d   : > { %v1518_v28 = vadd.f32 %v1517_v17, %v1516_v12 }
 0x17e   : > { %v2859_v3 = vadd.f32 %v1479_v22, %v1431_v24  ;;  %v1385_v50 = vadd.f32 %v1384_v26, %v1336_v30 }
 0x17f   : > { %v1526_v45 = vmul.f32 %v2854_v48, %v1518_v28 }
 0x181   : > { %v2863_v33 = vsub.f32 %v2823_v35, %v1526_v45  ;;  %v2866_v34 = vsub.f32 %v2826_v46, %v1526_v45  ;;  %v2869_v32 = vsub.f32 %v2833_v59, %v1526_v45  ;;  %v2872_v5 = vsub.f32 %v2838_v6, %v1526_v45 }
 0x182   : > { %v2875_v38 = vsub.f32 %v2843_v21, %v1526_v45  ;;  %v2877_v39 = vsub.f32 %v1470_v31, %v1526_v45  ;;  %v2879_v41 = vsub.f32 %v1473_v55, %v1526_v45  ;;  %v2881_v13 = vsub.f32 %v1475_v58, %v1526_v45 }
 0x183   : > { %v1535_v35 = vmul.f32 %v2863_v33, %v2863_v33  ;;  %v1536_v46 = vmul.f32 %v2866_v34, %v2866_v34  ;;  %v1537_v59 = vmul.f32 %v2869_v32, %v2869_v32  ;;  %v1433_v6 = vpop.f32.mrf.mxu2  ;;  %v1585_v21 = vsel %vm1497_vm0, %v2859_v3, 0.0  ;;  %v1337_v31 = vpop.f32.mrf.mxu0 }
 0x184   : > { %v1482_v42 = vpop.f32.mrf.mxu3  ;;  %v1386_v43 = vpop.f32.mrf.mxu1  ;;  %v1538_v44 = vmul.f32 %v2872_v5, %v2872_v5  ;;  %v1539_v11 = vmul.f32 %v2875_v38, %v2875_v38  ;;  %v1586_v53 = vadd.f32 %v1585_v21, %v1584_v51  ;;  %v1434_v54 = vadd.f32 %v1433_v6, %v1385_v50 }
 0x185   : > { %v1543_v55 = vsel %vm1497_vm0, %v1535_v35, 0.0  ;;  %v1544_v49 = vsel %vm1497_vm0, %v1536_v46, 0.0  ;;  %v1546_v52 = vsel %vm1497_vm0, %v1537_v59, 0.0  ;;  %v1338_v56 = vadd.f32 %v1337_v31, %v2800_v37 }
 0x186   : > { %v1545_v14 = vadd.f32 %v1544_v49, %v1543_v55  ;;  %v1540_v58 = vmul.f32 %v2877_v39, %v2877_v39  ;;  %v1548_v19 = vsel %vm1497_vm0, %v1538_v44, 0.0  ;;  %v2904_v60 = vadd.f32 %v1482_v42, %v1434_v54 }
 0x187   : > { %v1387_v62 = vadd.f32 %v1386_v43, %v1338_v56  ;;  %v1541_v63 = vmul.f32 %v2879_v41, %v2879_v41  ;;  %v1550_v36 = vsel %vm1497_vm0, %v1539_v11, 0.0  ;;  %v1542_v10 = vmul.f32 %v2881_v13, %v2881_v13 }
 0x188   : > { %v1547_v57 = vadd.f32 %v1546_v52, %v1545_v14  ;;  %v1587_v0 = vsel %vm1497_vm0, %v2904_v60, 0.0  ;;  %v1552_v12 = vsel %vm1497_vm0, %v1540_v58, 0.0 }
 0x189   : > { %v1588_v4 = vadd.f32 %v1587_v0, %v1586_v53  ;;  %v1554_v20 = vsel %vm1497_vm0, %v1541_v63, 0.0  ;;  %v1556_v24 = vsel %vm1497_vm0, %v1542_v10, 0.0 }
 0x18a   : > { %v1549_v61 = vadd.f32 %v1548_v19, %v1547_v57 }
 0x18b   : > { %v1435_v1 = vpop.f32.mrf.mxu2  ;;  %v1340_v40 = vpop.f32.mrf.mxu0 }
 0x18c   : > { %v1484_v37 = vpop.f32.mrf.mxu3  ;;  %v1551_v2 = vadd.f32 %v1550_v36, %v1549_v61  ;;  %v1436_v8 = vadd.f32 %v1435_v1, %v1387_v62  ;;  %v1389_v9 = vpop.f32.mrf.mxu1  ;;  %v1341_v17 = vadd.f32 %v1340_v40, %v2803_v47 }
 0x18e   : > { %v1553_v15 = vadd.f32 %v1552_v12, %v1551_v2  ;;  %v2914_v16 = vadd.f32 %v1484_v37, %v1436_v8  ;;  %v1390_v28 = vadd.f32 %v1389_v9, %v1341_v17 }
 0x190   : > { %v1555_v22 = vadd.f32 %v1554_v20, %v1553_v15  ;;  %v1589_v23 = vsel %vm1497_vm0, %v2914_v16, 0.0 }
 0x191   : > { %v1590_v25 = vadd.f32 %v1589_v23, %v1588_v4 }
 0x192   : > { %v1557_v26 = vadd.f32 %v1556_v24, %v1555_v22 }
 0x193   : > { %v1438_v45 = vpop.f32.mrf.mxu2  ;;  %v1342_v59 = vpop.f32.mrf.mxu0 }
 0x194   : > { %v1487_v30 = vpop.f32.mrf.mxu3  ;;  %v1558_v35 = vrot.slane %v1557_v26, 4  ;;  %v1439_v46 = vadd.f32 %v1438_v45, %v1390_v28  ;;  %v1391_v6 = vpop.f32.mrf.mxu1  ;;  %v1343_v47 = vadd.f32 %v1342_v59, %v2814_v7 }
 0x196   : > { %v1559_v42 = vadd.f32 %v1558_v35, %v1557_v26  ;;  %v2921_v21 = vadd.f32 %v1487_v30, %v1439_v46  ;;  %v1392_v49 = vadd.f32 %v1391_v6, %v1343_v47 }
 0x198   : > { %v1560_v31 = vrot.slane %v1559_v42, 2  ;;  %v1591_v43 = vsel %vm1497_vm0, %v2921_v21, 0.0 }
 0x199   : > { %v1592_v44 = vadd.f32 %v1591_v43, %v1590_v25 }
 0x19a   : > { %v1561_v55 = vadd.f32 %v1560_v31, %v1559_v42 }
 0x19b   : > { %v1440_v50 = vpop.f32.mrf.mxu2  ;;  %v1345_v52 = vpop.f32.mrf.mxu0 }
 0x19c   : > { %v1489_v11 = vpop.f32.mrf.mxu3  ;;  %v1562_v14 = vrot.slane %v1561_v55, 1  ;;  %v1441_v51 = vadd.f32 %v1440_v50, %v1392_v49  ;;  %v1346_v56 = vadd.f32 %v1345_v52, %v2817_v18  ;;  %v1394_v57 = vpop.f32.mrf.mxu1 }
 0x19e   : > { %v1563_v53 = vadd.f32 %v1562_v14, %v1561_v55  ;;  %v1490_v54 = vadd.f32 %v1489_v11, %v1441_v51  ;;  %v1395_v62 = vadd.f32 %v1394_v57, %v1346_v56 }
 0x1a0   : > { %v1564_v58 = vmul.f32 %v1563_v53, %v2854_v48  ;;  %v1593_v7 = vsel %vm1497_vm0, %v1490_v54, 0.0 }
 0x1a1   : > { %v1594_v19 = vadd.f32 %v1593_v7, %v1592_v44 }
 0x1a2   : > { %v1565_v61 = vadd.f32 1e-05, %v1564_v58 }
 0x1a3   : > { %v1443_v63 = vpop.f32.mrf.mxu2  ;;  %v1347_v1 = vpop.f32.mrf.mxu0 }
 0x1a4   : > { %v1492_v36 = vpop.f32.mrf.mxu3  ;;  %2511 = vrsqrt.f32 %v1565_v61  ;;  %v1444_v0 = vadd.f32 %v1443_v63, %v1395_v62  ;;  %v1348_v2 = vadd.f32 %v1347_v1, %v2820_v27  ;;  %v1396_v18 = vpop.f32.mrf.mxu1  ;;  %vm1572_vm3 = vweird.f32 %v1565_v61 }
 0x1a6   : > { %v1493_v37 = vadd.f32 %v1492_v36, %v1444_v0  ;;  %v1397_v9 = vadd.f32 %v1396_v18, %v1348_v2 }
 0x1a8   : > { %v1595_v4 = vsel %vm1497_vm0, %v1493_v37, 0.0 }
 0x1a9   : > { %v1596_v8 = vadd.f32 %v1595_v4, %v1594_v19 }
 0x1aa   : > { %v2512_v40 = vpop.eup %2511 }
 0x1ab   : > { %v1567_v10 = vmul.f32 %v2512_v40, %v1565_v61  ;;  %v1445_v12 = vpop.f32.mrf.mxu2  ;;  %vm1573_vm2 = vweird.f32 %v2512_v40 }
 0x1ac   : > { %v1446_v15 = vadd.f32 %v1445_v12, %v1397_v9  ;;  %v1494_v20 = vpop.f32.mrf.mxu3  ;;  %vm1574_vm4 = vmor %vm1572_vm3, %vm1573_vm2 }
 0x1ad   : > { %v1568_v17 = vmul.f32 %v2512_v40, %v1567_v10 }
 0x1ae   : > { %v1495_v22 = vadd.f32 %v1494_v20, %v1446_v15 }
 0x1af   : > { %v1569_v23 = vmul.f32 0.5, %v1568_v17 }
 0x1b0   : > { %v1597_v24 = vsel %vm1497_vm0, %v1495_v22, 0.0 }
 0x1b1   : > { %v1570_v25 = vsub.f32 1.5, %v1569_v23  ;;  %v1598_v26 = vadd.f32 %v1597_v24, %v1596_v8 }
 0x1b3   : > { %v1571_v28 = vmul.f32 %v2512_v40, %v1570_v25  ;;  %v1599_v27 = vrot.slane %v1598_v26, 4 }
 0x1b5   : > { %v1575_v45 = vsel %vm1574_vm4, %v2512_v40, %v1571_v28  ;;  %v1600_v30 = vadd.f32 %v1599_v27, %v1598_v26 }
 0x1b6   : > { %v2933_v35 = vmul.f32 %v1575_v45, %v2881_v13  ;;  %v2936_v46 = vmul.f32 %v1575_v45, %v2875_v38  ;;  %v2939_v59 = vmul.f32 %v1575_v45, %v2877_v39  ;;  %v2942_v6 = vmul.f32 %v1575_v45, %v2869_v32 }
 0x1b7   : > { %v1601_v42 = vrot.slane %v1600_v30, 2  ;;  %v2945_v47 = vmul.f32 %v1575_v45, %v2863_v33  ;;  %v2948_v31 = vmul.f32 %v1575_v45, %v2872_v5  ;;  %v2951_v43 = vmul.f32 %v1575_v45, %v2866_v34 }
 0x1b8   : > { %v2954_v13 = vmul.f32 %v1575_v45, %v2879_v41 }
 0x1b9   : > { %v1602_v38 = vadd.f32 %v1601_v42, %v1600_v30 }
 0x1bb   : > { %v1603_v44 = vrot.slane %v1602_v38, 1 }
 0x1bd   : > { %v1604_v39 = vadd.f32 %v1603_v44, %v1602_v38 }
 0x1bf   : > { %v1605_v55 = vmul.f32 %v1604_v39, %v2854_v48 }
 0x1c1   : > { %v1613_v32 = vsub.f32 %v1495_v22, %v1605_v55  ;;  %v1606_v49 = vsub.f32 %v2857_v29, %v1605_v55  ;;  %v1607_v33 = vsub.f32 %v2859_v3, %v1605_v55  ;;  %v1608_v50 = vsub.f32 %v2904_v60, %v1605_v55 }
 0x1c2   : > { %v1609_v5 = vsub.f32 %v2914_v16, %v1605_v55  ;;  %v1610_v34 = vsub.f32 %v2921_v21, %v1605_v55  ;;  %v1611_v11 = vsub.f32 %v1490_v54, %v1605_v55  ;;  %v1612_v14 = vsub.f32 %v1493_v37, %v1605_v55 }
 0x1c3   : > { %v1614_v41 = vmul.f32 %v1606_v49, %v1606_v49  ;;  %v1615_v51 = vmul.f32 %v1607_v33, %v1607_v33  ;;  %v1616_v52 = vmul.f32 %v1608_v50, %v1608_v50  ;;  %v1621_v62 = vmul.f32 %v1613_v32, %v1613_v32 }
 0x1c4   : > { %v1617_v53 = vmul.f32 %v1609_v5, %v1609_v5  ;;  %v1618_v29 = vmul.f32 %v1610_v34, %v1610_v34  ;;  %v1619_v60 = vmul.f32 %v1611_v11, %v1611_v11  ;;  %v1620_v21 = vmul.f32 %v1612_v14, %v1612_v14 }
 0x1c5   : > { %v1622_v56 = vsel %vm1497_vm0, %v1614_v41, 0.0  ;;  %v1623_v57 = vsel %vm1497_vm0, %v1615_v51, 0.0  ;;  %v1625_v3 = vsel %vm1497_vm0, %v1616_v52, 0.0  ;;  %v1635_v37 = vsel %vm1497_vm0, %v1621_v62, 0.0 }
 0x1c6   : > { %v1624_v58 = vadd.f32 %v1623_v57, %v1622_v56  ;;  %v1627_v16 = vsel %vm1497_vm0, %v1617_v53, 0.0  ;;  %v1629_v54 = vsel %vm1497_vm0, %v1618_v29, 0.0  ;;  %v1631_v63 = vsel %vm1497_vm0, %v1619_v60, 0.0 }
 0x1c7   : > { %v1633_v0 = vsel %vm1497_vm0, %v1620_v21, 0.0 }
 0x1c8   : > { %v1626_v7 = vadd.f32 %v1625_v3, %v1624_v58 }
 0x1ca   : > { %v1628_v19 = vadd.f32 %v1627_v16, %v1626_v7 }
 0x1cc   : > { %v1630_v61 = vadd.f32 %v1629_v54, %v1628_v19 }
 0x1ce   : > { %v1632_v36 = vadd.f32 %v1631_v63, %v1630_v61 }
 0x1d0   : > { %v1634_v1 = vadd.f32 %v1633_v0, %v1632_v36 }
 0x1d2   : > { %v1636_v2 = vadd.f32 %v1635_v37, %v1634_v1 }
 0x1d4   : > { %v1637_v4 = vrot.slane %v1636_v2, 4 }
 0x1d6   : > { %v1638_v8 = vadd.f32 %v1637_v4, %v1636_v2 }
 0x1d8   : > { %v1639_v18 = vrot.slane %v1638_v8, 2 }
 0x1da   : > { %v1640_v40 = vadd.f32 %v1639_v18, %v1638_v8 }
 0x1dc   : > { %v1641_v9 = vrot.slane %v1640_v40, 1 }
 0x1de   : > { %v1642_v10 = vadd.f32 %v1641_v9, %v1640_v40 }
 0x1e0   : > { %v1643_v12 = vmul.f32 %v1642_v10, %v2854_v48 }
 0x1e2   : > { %v1644_v15 = vadd.f32 1e-05, %v1643_v12 }
 0x1e4   : > { %2513 = vrsqrt.f32 %v1644_v15  ;;  %vm1651_vm6 = vweird.f32 %v1644_v15 }
 0x1ea   : > { %v2514_v17 = vpop.eup %2513 }
 0x1eb   : > { %v1646_v20 = vmul.f32 %v2514_v17, %v1644_v15  ;;  %vm1652_vm5 = vweird.f32 %v2514_v17 }
 0x1ec   : > { %vm1653_vm7 = vmor %vm1651_vm6, %vm1652_vm5 }
 0x1ed   : > { %v1647_v22 = vmul.f32 %v2514_v17, %v1646_v20 }
 0x1ef   : > { %v1648_v23 = vmul.f32 0.5, %v1647_v22 }
 0x1f1   : > { %v1649_v24 = vsub.f32 1.5, %v1648_v23 }
 0x1f3   : > { %v1650_v25 = vmul.f32 %v2514_v17, %v1649_v24 }
 0x1f5   : > { %v1654_v26 = vsel %vm1653_vm7, %v2514_v17, %v1650_v25 }
 0x1f6   : > { %v1659_v28 = vmul.f32 %v1654_v26, %v1610_v34  ;;  %v1657_v27 = vmul.f32 %v1654_v26, %v1608_v50  ;;  %v1655_v45 = vmul.f32 %v1654_v26, %v1606_v49  ;;  %v1660_v30 = vmul.f32 %v1654_v26, %v1611_v11 }
 0x1f7   : > { %v1658_v42 = vmul.f32 %v1654_v26, %v1609_v5  ;;  %v1656_v38 = vmul.f32 %v1654_v26, %v1607_v33  ;;  %v1662_v44 = vmul.f32 %v1654_v26, %v1613_v32  ;;  %v1661_v48 = vmul.f32 %v1654_v26, %v1612_v14 }
 0x1f8   : > { %1679 = vrot.lane.b32.xlu2 %v1659_v28, %s2524_s26  ;;  %1675 = vrot.lane.b32.xlu1 %v1657_v27, %s2524_s26 }
 0x1f9   : > { %1671 = vrot.lane.b32.xlu0 %v1655_v45, %s2524_s26 }
 0x200   : > { %1681 = vrot.lane.b32.xlu2 %v1660_v30, %s2524_s26  ;;  %1677 = vrot.lane.b32.xlu1 %v1658_v42, %s2524_s26 }
 0x201   : > { %1673 = vrot.lane.b32.xlu0 %v1656_v38, %s2524_s26 }
 0x208   : > { %1685 = vrot.lane.b32.xlu1 %v1662_v44, %s2524_s26 }
 0x209   : > { %1683 = vrot.lane.b32.xlu0 %v1661_v48, %s2524_s26 }
 0x252   : > { %v1680_v39 = vpop.permute.xlu2 %1679 }
 0x253   : > { %v1699_v55 = vsel %vm1497_vm0, %v2936_v46, %v1680_v39 }
 0x254   : > { %v1715_v49 = vmul.f32 0.1, %v1699_v55  ;;  %vm1707_vm8 = vcmp.gt.f32.partialorder %v1699_v55, 0.0 }
 0x256   : > { %v1723_v5 = vsel %vm1707_vm8, %v1699_v55, %v1715_v49 }
 0x25a   : > { %v1682_v50 = vpop.permute.xlu2 %1681 }
 0x25b   : > { %v1700_v32 = vsel %vm1497_vm0, %v2939_v59, %v1682_v50 }
 0x25c   : > { %vm1708_vm9 = vcmp.gt.f32.partialorder %v1700_v32, 0.0  ;;  %v1716_v33 = vmul.f32 0.1, %v1700_v32 }
 0x25e   : > { %v1724_v34 = vsel %vm1708_vm9, %v1700_v32, %v1716_v33 }
 0x25f   : > { %v2488_v11 = vpack.c.bf16 %v1724_v34, %v1723_v5 }
 0x261   : > { %2496 = vst [vmem:[%s2979_s30 + $0x10] sm:$0xff] %v2488_v11  }
 0x26a   : > { %v1676_v46 = vpop.permute.xlu1 %1675 }
 0x26b   : > { %v1672_v14 = vpop.permute.xlu0 %1671  ;;  %v1697_v41 = vsel %vm1497_vm0, %v2942_v6, %v1676_v46 }
 0x26c   : > { %v1695_v59 = vsel %vm1497_vm0, %v2945_v47, %v1672_v14  ;;  %v1713_v51 = vmul.f32 0.1, %v1697_v41  ;;  %vm1705_vm10 = vcmp.gt.f32.partialorder %v1697_v41, 0.0 }
 0x26d   : > { %v1711_v53 = vmul.f32 0.1, %v1695_v59  ;;  %vm1703_vm11 = vcmp.gt.f32.partialorder %v1695_v59, 0.0 }
 0x26e   : > { %v1721_v3 = vsel %vm1705_vm10, %v1697_v41, %v1713_v51 }
 0x26f   : > { %v1719_v7 = vsel %vm1703_vm11, %v1695_v59, %v1711_v53 }
 0x272   : > { %v1678_v52 = vpop.permute.xlu1 %1677 }
 0x273   : > { %v1698_v56 = vsel %vm1497_vm0, %v2948_v31, %v1678_v52  ;;  %v1674_v57 = vpop.permute.xlu0 %1673 }
 0x274   : > { %vm1706_vm12 = vcmp.gt.f32.partialorder %v1698_v56, 0.0  ;;  %v1714_v58 = vmul.f32 0.1, %v1698_v56  ;;  %v1696_v29 = vsel %vm1497_vm0, %v2951_v43, %v1674_v57 }
 0x275   : > { %vm1704_vm13 = vcmp.gt.f32.partialorder %v1696_v29, 0.0  ;;  %v1712_v6 = vmul.f32 0.1, %v1696_v29 }
 0x276   : > { %v1722_v47 = vsel %vm1706_vm12, %v1698_v56, %v1714_v58 }
 0x277   : > { %v2483_v60 = vpack.c.bf16 %v1722_v47, %v1721_v3  ;;  %v1720_v16 = vsel %vm1704_vm13, %v1696_v29, %v1712_v6 }
 0x278   : > { %v2478_v19 = vpack.c.bf16 %v1720_v16, %v1719_v7 }
 0x279   : > { %2495 = vst [vmem:[%s2979_s30 + $0x8] sm:$0xff] %v2483_v60  }
 0x27a   : > { %2479 = vst [vmem:[%s2979_s30] sm:$0xff] %v2478_v19   ;;  %v1686_v21 = vpop.permute.xlu1 %1685 }
 0x27b   : > { %v1702_v31 = vsel %vm1497_vm0, %v2933_v35, %v1686_v21  ;;  %v1684_v54 = vpop.permute.xlu0 %1683 }
 0x27c   : > { %vm1710_vm14 = vcmp.gt.f32.partialorder %v1702_v31, 0.0  ;;  %v1718_v61 = vmul.f32 0.1, %v1702_v31  ;;  %v1701_v43 = vsel %vm1497_vm0, %v2954_v13, %v1684_v54 }
 0x27d   : > { %vm1709_vm15 = vcmp.gt.f32.partialorder %v1701_v43, 0.0  ;;  %v1717_v62 = vmul.f32 0.1, %v1701_v43 }
 0x27e   : > { %v1726_v63 = vsel %vm1710_vm14, %v1702_v31, %v1718_v61 }
 0x27f   : > { %v1725_v36 = vsel %vm1709_vm15, %v1701_v43, %v1717_v62 }
 0x280   : > { %v2493_v0 = vpack.c.bf16 %v1726_v63, %v1725_v36 }
 0x282   : > { %2497 = vst [vmem:[%s2979_s30 + $0x18] sm:$0xff] %v2493_v0  }
 0x283 PF: > { %s13_s12 = sadd.s32 1, %s2521_s12  }
 0x284   : > { %p10_p4 = scmp.ge.s32.totalorder %s13_s12, 4  }
 0x286   :  { %12 = sbr.rel (!%p10_p4) target bundleno = 1 (0x1), region = 68 }

// kernel: discriminatorxx_forward.7
= control target key start
LH: loop header
LB: loop body
LE: loop exit
PB: predicated region body
PF: predicated region fallthrough
CT: control target
= control target key end

     0   :  { %s1615_s12 = smov 0   ;;  %s1759_s0 = inlined_call_operand.vmem [shape: bf16[2,32,1024], index: 0, kind: input, shape index: {}]   ;;  %s1760_s1 = inlined_call_operand.vmem [shape: bf16[2,1024,64], index: 1, kind: input, shape index: {}]   ;;  %s1761_s2 = inlined_call_operand.vmem [shape: f32[2,1,64], index: 2, kind: input, shape index: {}]   ;;  %s1762_s3 = inlined_call_operand.vmem [shape: bf16[2,16,128], index: 3, kind: output, shape index: {}]  }
   0x1 LB: > { %s1147_s13 = sadd.s32 4294967295, %s1591_s12   ;;  %p1151_p0 = scmp.ge.s32.totalorder %s1591_s12, 1  ;;  %s1591_s12 = sphi %s1615_s12, %s13_s12  }
   0x2   : > { %p155_p1 = scmp.lt.s32.totalorder %s1591_s12, 3 }
   0x4   : > { %p156_p2 = pnand %p1151_p0, %p155_p1 }
   0x5   : > { %p187_p3 = scmp.lt.s32.totalorder (!%p156_p2), %s1147_s13, 1  ;;  %s1594_s27 = smov (!%p156_p2), 64  }
   0x6   : > { %159 = sbr.rel (%p156_p2) target bundleno = 430 (0x1ae), region = 32 }
   0xb   : > { %s1764_s13 = smov (!%p187_p3, %s1147_s13), 1  ;;  %vm969_vm0 = vcmask 523264  }
   0xc   : > { %s1481_s14 = sshll.u32 %s1764_s13, 9  ;;  %s1480_s18 = sshll.u32 %s1764_s13, 7 }
   0xd   : > { %s1629_s17 = scalar_lea.vmem %s1760_s1, %s1481_s14  ;;  %s1661_s21 = scalar_lea.vmem %s1759_s0, %s1480_s18 }
   0xe   : > { %v1506_v0 = vld [vmem:[%s1629_s17 + $0x38] sm:$0xff]  ;;  %v1505_v4 = vld [vmem:[%s1629_s17 + $0x30] sm:$0xff]  ;;  %v1504_v8 = vld [vmem:[%s1629_s17 + $0x28] sm:$0xff]  ;;  %s199_s24 = scalar_lea.vmem %s1761_s2, %s1764_s13  ;;  %s1482_s28 = sshll.u32 %s1764_s13, 3 }
   0xf   : > { %v1514_v1 = vld [vmem:[%s1629_s17 + $0x78] sm:$0xff]  ;;  %817 = vmatpush.bf16.msra.mxu0 %v1506_v0  ;;  %v1513_v5 = vld [vmem:[%s1629_s17 + $0x70] sm:$0xff]  ;;  %v1512_v9 = vld [vmem:[%s1629_s17 + $0x68] sm:$0xff]  ;;  %s204_s4 = scalar_lea.vmem %s1762_s3, %s1482_s28 }
  0x10   : > { %v1522_v2 = vld [vmem:[%s1629_s17 + $0xb8] sm:$0xff]  ;;  %836 = vmatpush.bf16.msra.mxu1 %v1514_v1  ;;  %v1521_v6 = vld [vmem:[%s1629_s17 + $0xb0] sm:$0xff]  ;;  %v1520_v10 = vld [vmem:[%s1629_s17 + $0xa8] sm:$0xff] }
  0x11   : > { %v1530_v3 = vld [vmem:[%s1629_s17 + $0xf8] sm:$0xff]  ;;  %855 = vmatpush.bf16.msra.mxu2 %v1522_v2  ;;  %v1529_v7 = vld [vmem:[%s1629_s17 + $0xf0] sm:$0xff]  ;;  %v1528_v11 = vld [vmem:[%s1629_s17 + $0xe8] sm:$0xff] }
  0x12   : > { %874 = vmatpush.bf16.msra.mxu3 %v1530_v3  ;;  %v1503_v12 = vld [vmem:[%s1629_s17 + $0x20] sm:$0xff]  ;;  %v1502_v16 = vld [vmem:[%s1629_s17 + $0x18] sm:$0xff]  ;;  %v1501_v20 = vld [vmem:[%s1629_s17 + $0x10] sm:$0xff] }
  0x13   : > { %818 = vmatpush.bf16.msra.mxu0 %v1505_v4  ;;  %v1511_v13 = vld [vmem:[%s1629_s17 + $0x60] sm:$0xff]  ;;  %v1510_v17 = vld [vmem:[%s1629_s17 + $0x58] sm:$0xff]  ;;  %v1509_v21 = vld [vmem:[%s1629_s17 + $0x50] sm:$0xff] }
  0x14   : > { %837 = vmatpush.bf16.msra.mxu1 %v1513_v5  ;;  %v1519_v14 = vld [vmem:[%s1629_s17 + $0xa0] sm:$0xff]  ;;  %v1518_v18 = vld [vmem:[%s1629_s17 + $0x98] sm:$0xff]  ;;  %v1517_v22 = vld [vmem:[%s1629_s17 + $0x90] sm:$0xff] }
  0x15   : > { %856 = vmatpush.bf16.msra.mxu2 %v1521_v6  ;;  %v1527_v15 = vld [vmem:[%s1629_s17 + $0xe0] sm:$0xff]  ;;  %v1526_v19 = vld [vmem:[%s1629_s17 + $0xd8] sm:$0xff]  ;;  %v1525_v23 = vld [vmem:[%s1629_s17 + $0xd0] sm:$0xff] }
  0x16   : > { %875 = vmatpush.bf16.msra.mxu3 %v1529_v7  ;;  %v1500_v24 = vld [vmem:[%s1629_s17 + $0x8] sm:$0xff]  ;;  %v1499_v28 = vld [vmem:[%s1629_s17] sm:$0xff]  ;;  %v1554_v40 = vld [vmem:[%s1629_s17 + $0x1b8] sm:$0xff] }
  0x17   : > { %819 = vmatpush.bf16.msra.mxu0 %v1504_v8  ;;  %v1508_v25 = vld [vmem:[%s1629_s17 + $0x48] sm:$0xff]  ;;  %v1507_v29 = vld [vmem:[%s1629_s17 + $0x40] sm:$0xff]  ;;  %v1538_v41 = vld [vmem:[%s1629_s17 + $0x138] sm:$0xff] }
  0x18   : > { %838 = vmatpush.bf16.msra.mxu1 %v1512_v9  ;;  %v1516_v26 = vld [vmem:[%s1629_s17 + $0x88] sm:$0xff]  ;;  %v1515_v30 = vld [vmem:[%s1629_s17 + $0x80] sm:$0xff]  ;;  %v1546_v46 = vld [vmem:[%s1629_s17 + $0x178] sm:$0xff] }
  0x19   : > { %857 = vmatpush.bf16.msra.mxu2 %v1520_v10  ;;  %v1524_v27 = vld [vmem:[%s1629_s17 + $0xc8] sm:$0xff]  ;;  %v1523_v31 = vld [vmem:[%s1629_s17 + $0xc0] sm:$0xff]  ;;  %v1562_v47 = vld [vmem:[%s1629_s17 + $0x1f8] sm:$0xff] }
  0x1a   : > { %876 = vmatpush.bf16.msra.mxu3 %v1528_v11  ;;  %v1160_v32 = vld [vmem:[%s1661_s21] sm:$0xf]  ;;  %v1483_v34 = vld [vmem:[%s1661_s21 + $0x4] sm:$0xf]  ;;  %v1168_v36 = vld [vmem:[%s1661_s21 + $0x8] sm:$0xf] }
  0x1b   : > { %820 = vmatpush.bf16.msra.mxu0 %v1503_v12  ;;  %v1487_v33 = vld [vmem:[%s1661_s21 + $0x1c] sm:$0xf0]  ;;  %v1162_v35 = vld [vmem:[%s1661_s21 + $0x20] sm:$0xf0]  ;;  %v1488_v37 = vld [vmem:[%s1661_s21 + $0x24] sm:$0xf0] }
  0x1c   : > { %839 = vmatpush.bf16.msra.mxu1 %v1511_v13  ;;  %v1484_v38 = vld [vmem:[%s1661_s21 + $0xc] sm:$0xf]  ;;  %v1161_v42 = vor.u32 %v1487_v33, %v1160_v32  ;;  %v1165_v43 = vor.u32 %v1483_v34, %v1162_v35  ;;  %v1169_v44 = vor.u32 %v1488_v37, %v1168_v36  ;;  %v1553_v48 = vld [vmem:[%s1629_s17 + $0x1b0] sm:$0xff]  ;;  %v1551_v56 = vld [vmem:[%s1629_s17 + $0x1a0] sm:$0xff] }
  0x1d   : > { %858 = vmatpush.bf16.msra.mxu2 %v1519_v14  ;;  %v1170_v39 = vld [vmem:[%s1661_s21 + $0x28] sm:$0xf0]  ;;  %v1537_v49 = vld [vmem:[%s1629_s17 + $0x130] sm:$0xff]  ;;  %v1535_v57 = vld [vmem:[%s1629_s17 + $0x120] sm:$0xff] }
  0x1e   : > { %877 = vmatpush.bf16.msra.mxu3 %v1527_v15  ;;  %v1173_v45 = vor.u32 %v1484_v38, %v1170_v39  ;;  %v1545_v50 = vld [vmem:[%s1629_s17 + $0x170] sm:$0xff]  ;;  %v1552_v52 = vld [vmem:[%s1629_s17 + $0x1a8] sm:$0xff]  ;;  %v1543_v58 = vld [vmem:[%s1629_s17 + $0x160] sm:$0xff] }
  0x1f   : > { %821 = vmatpush.bf16.msra.mxu0 %v1502_v16  ;;  %v1561_v51 = vld [vmem:[%s1629_s17 + $0x1f0] sm:$0xff]  ;;  %v1536_v53 = vld [vmem:[%s1629_s17 + $0x128] sm:$0xff]  ;;  %v1559_v59 = vld [vmem:[%s1629_s17 + $0x1e0] sm:$0xff] }
  0x20   : > { %840 = vmatpush.bf16.msra.mxu1 %v1510_v17  ;;  %v1544_v54 = vld [vmem:[%s1629_s17 + $0x168] sm:$0xff]  ;;  %v1192_v60 = vld [vmem:[%s1661_s21 + $0x40] sm:$0xf]  ;;  %v1491_v62 = vld [vmem:[%s1661_s21 + $0x44] sm:$0xf] }
  0x21   : > { %859 = vmatpush.bf16.msra.mxu2 %v1518_v18  ;;  %v1560_v55 = vld [vmem:[%s1629_s17 + $0x1e8] sm:$0xff]  ;;  %v1495_v61 = vld [vmem:[%s1661_s21 + $0x5c] sm:$0xf0]  ;;  %v1194_v63 = vld [vmem:[%s1661_s21 + $0x60] sm:$0xf0] }
  0x22   : > { %878 = vmatpush.bf16.msra.mxu3 %v1526_v19  ;;  %v1200_v0 = vld [vmem:[%s1661_s21 + $0x48] sm:$0xf]  ;;  %v1492_v2 = vld [vmem:[%s1661_s21 + $0x4c] sm:$0xf]  ;;  %v1550_v4 = vld [vmem:[%s1629_s17 + $0x198] sm:$0xff]  ;;  %v1193_v6 = vor.u32 %v1495_v61, %v1192_v60  ;;  %v1197_v7 = vor.u32 %v1491_v62, %v1194_v63 }
  0x23   : > { %822 = vmatpush.bf16.msra.mxu0 %v1501_v20  ;;  %v1496_v1 = vld [vmem:[%s1661_s21 + $0x64] sm:$0xf0]  ;;  %v1202_v3 = vld [vmem:[%s1661_s21 + $0x68] sm:$0xf0]  ;;  %v1534_v5 = vld [vmem:[%s1629_s17 + $0x118] sm:$0xff] }
  0x24   : > { %841 = vmatpush.bf16.msra.mxu1 %v1509_v21  ;;  %v1201_v8 = vor.u32 %v1496_v1, %v1200_v0  ;;  %v1205_v9 = vor.u32 %v1492_v2, %v1202_v3  ;;  %v1542_v10 = vld [vmem:[%s1629_s17 + $0x158] sm:$0xff]  ;;  %v1549_v12 = vld [vmem:[%s1629_s17 + $0x190] sm:$0xff]  ;;  %v1548_v16 = vld [vmem:[%s1629_s17 + $0x188] sm:$0xff] }
  0x25   : > { %860 = vmatpush.bf16.msra.mxu2 %v1517_v22  ;;  %v1558_v11 = vld [vmem:[%s1629_s17 + $0x1d8] sm:$0xff]  ;;  %v1533_v13 = vld [vmem:[%s1629_s17 + $0x110] sm:$0xff]  ;;  %v1532_v17 = vld [vmem:[%s1629_s17 + $0x108] sm:$0xff] }
  0x26   : > { %879 = vmatpush.bf16.msra.mxu3 %v1525_v23  ;;  %v1541_v14 = vld [vmem:[%s1629_s17 + $0x150] sm:$0xff]  ;;  %v1540_v18 = vld [vmem:[%s1629_s17 + $0x148] sm:$0xff]  ;;  %v1547_v20 = vld [vmem:[%s1629_s17 + $0x180] sm:$0xff] }
  0x27   : > { %823 = vmatpush.bf16.msra.mxu0 %v1500_v24  ;;  %v1557_v15 = vld [vmem:[%s1629_s17 + $0x1d0] sm:$0xff]  ;;  %v1556_v19 = vld [vmem:[%s1629_s17 + $0x1c8] sm:$0xff]  ;;  %v1531_v21 = vld [vmem:[%s1629_s17 + $0x100] sm:$0xff] }
  0x28   : > { %842 = vmatpush.bf16.msra.mxu1 %v1508_v25  ;;  %v1539_v22 = vld [vmem:[%s1629_s17 + $0x140] sm:$0xff]  ;;  %v1176_v24 = vld [vmem:[%s1661_s21 + $0x10] sm:$0xf]  ;;  %v1493_v38 = vld [vmem:[%s1661_s21 + $0x54] sm:$0xf] }
  0x29   : > { %861 = vmatpush.bf16.msra.mxu2 %v1516_v26  ;;  %v1555_v23 = vld [vmem:[%s1629_s17 + $0x1c0] sm:$0xff]  ;;  %v1489_v25 = vld [vmem:[%s1661_s21 + $0x2c] sm:$0xf0]  ;;  %v1485_v26 = vld [vmem:[%s1661_s21 + $0x14] sm:$0xf] }
  0x2a   : > { %880 = vmatpush.bf16.msra.mxu3 %v1524_v27  ;;  %v1178_v27 = vld [vmem:[%s1661_s21 + $0x30] sm:$0xf0]  ;;  %v1177_v32 = vor.u32 %v1489_v25, %v1176_v24  ;;  %v1208_v36 = vld [vmem:[%s1661_s21 + $0x50] sm:$0xf] }
  0x2b   : > { %824 = vmatpush.bf16.msra.mxu0 %v1499_v28  ;;  %v1184_v28 = vld [vmem:[%s1661_s21 + $0x18] sm:$0xf]  ;;  %v1181_v33 = vor.u32 %v1485_v26, %v1178_v27  ;;  %v1497_v37 = vld [vmem:[%s1661_s21 + $0x6c] sm:$0xf0]  ;;  %v1210_v39 = vld [vmem:[%s1661_s21 + $0x70] sm:$0xf0] }
  0x2c   : > { %843 = vmatpush.bf16.msra.mxu1 %v1507_v29  ;;  %v1490_v29 = vld [vmem:[%s1661_s21 + $0x34] sm:$0xf0] }
  0x2d   : > { %862 = vmatpush.bf16.msra.mxu2 %v1515_v30  ;;  %v1486_v30 = vld [vmem:[%s1661_s21 + $0x1c] sm:$0xf]  ;;  %v1185_v34 = vor.u32 %v1490_v29, %v1184_v28 }
  0x2e   : > { %881 = vmatpush.bf16.msra.mxu3 %v1523_v31  ;;  %825 = vmatmul.bf16.vlgmr.msra.gmra.mxu0 %v1161_v42  ;;  %v1186_v31 = vld [vmem:[%s1661_s21 + $0x38] sm:$0xf0] }
  0x2f   : > { %893 = vmatpush.bf16.msrb.mxu0 %v1538_v41  ;;  %844 = vmatmul.bf16.vlgmr.msra.gmra.mxu1 %v1165_v43  ;;  %v1189_v35 = vor.u32 %v1486_v30, %v1186_v31  ;;  %v1498_v41 = vld [vmem:[%s1661_s21 + $0x74] sm:$0xf0]  ;;  %v1494_v42 = vld [vmem:[%s1661_s21 + $0x5c] sm:$0xf] }
  0x30   : > { %863 = vmatmul.bf16.vlgmr.msra.gmra.mxu2 %v1169_v44  ;;  %912 = vmatpush.bf16.msrb.mxu1 %v1546_v46  ;;  %v1218_v43 = vld [vmem:[%s1661_s21 + $0x78] sm:$0xf0]  ;;  %v1209_v44 = vor.u32 %v1497_v37, %v1208_v36 }
  0x31   : > { %931 = vmatpush.bf16.msrb.mxu2 %v1554_v40  ;;  %882 = vmatmul.bf16.vlgmr.msra.gmra.mxu3 %v1173_v45  ;;  %v1216_v40 = vld [vmem:[%s1661_s21 + $0x58] sm:$0xf]  ;;  %v1213_v45 = vor.u32 %v1493_v38, %v1210_v39 }
  0x32   : > { %950 = vmatpush.bf16.msrb.mxu3 %v1562_v47  ;;  %v1217_v46 = vor.u32 %v1498_v41, %v1216_v40  ;;  %v1221_v47 = vor.u32 %v1494_v42, %v1218_v43 }
  0x33   : > { %894 = vmatpush.bf16.msrb.mxu0 %v1537_v49 }
  0x34   : > { %913 = vmatpush.bf16.msrb.mxu1 %v1545_v50 }
  0x35   : > { %932 = vmatpush.bf16.msrb.mxu2 %v1553_v48  ;;  %v1578_v48 = vld [vmem:[%s199_s24] ss:$0 sm:$0xff] }
  0x36   : > { %951 = vmatpush.bf16.msrb.mxu3 %v1561_v51 }
  0x37   : > { %895 = vmatpush.bf16.msrb.mxu0 %v1536_v53 }
  0x38   : > { %914 = vmatpush.bf16.msrb.mxu1 %v1544_v54 }
  0x39   : > { %933 = vmatpush.bf16.msrb.mxu2 %v1552_v52 }
  0x3a   : > { %952 = vmatpush.bf16.msrb.mxu3 %v1560_v55 }
  0x3b   : > { %896 = vmatpush.bf16.msrb.mxu0 %v1535_v57 }
  0x3c   : > { %915 = vmatpush.bf16.msrb.mxu1 %v1543_v58 }
  0x3d   : > { %934 = vmatpush.bf16.msrb.mxu2 %v1551_v56 }
  0x3e   : > { %953 = vmatpush.bf16.msrb.mxu3 %v1559_v59  ;;  %830 = vmatmul.bf16.gmra.mxu0 %v1193_v6 }
  0x3f   : > { %897 = vmatpush.bf16.msrb.mxu0 %v1534_v5  ;;  %849 = vmatmul.bf16.gmra.mxu1 %v1197_v7 }
  0x40   : > { %868 = vmatmul.bf16.gmra.mxu2 %v1201_v8  ;;  %916 = vmatpush.bf16.msrb.mxu1 %v1542_v10 }
  0x41   : > { %935 = vmatpush.bf16.msrb.mxu2 %v1550_v4  ;;  %887 = vmatmul.bf16.gmra.mxu3 %v1205_v9 }
  0x42   : > { %954 = vmatpush.bf16.msrb.mxu3 %v1558_v11 }
  0x43   : > { %898 = vmatpush.bf16.msrb.mxu0 %v1533_v13 }
  0x44   : > { %917 = vmatpush.bf16.msrb.mxu1 %v1541_v14 }
  0x45   : > { %936 = vmatpush.bf16.msrb.mxu2 %v1549_v12 }
  0x46   : > { %955 = vmatpush.bf16.msrb.mxu3 %v1557_v15  ;;  %v1593_v15 = vmov 16.0  }
  0x47   : > { %899 = vmatpush.bf16.msrb.mxu0 %v1532_v17  ;;  %1579 = vrcp.f32 %v1593_v15 }
  0x48   : > { %918 = vmatpush.bf16.msrb.mxu1 %v1540_v18 }
  0x49   : > { %937 = vmatpush.bf16.msrb.mxu2 %v1548_v16 }
  0x4a   : > { %956 = vmatpush.bf16.msrb.mxu3 %v1556_v19 }
  0x4b   : > { %900 = vmatpush.bf16.msrb.mxu0 %v1531_v21 }
  0x4c   : > { %919 = vmatpush.bf16.msrb.mxu1 %v1539_v22 }
  0x4d   : > { %938 = vmatpush.bf16.msrb.mxu2 %v1547_v20  ;;  %v1580_v24 = vpop.eup %1579 }
  0x4e   : > { %957 = vmatpush.bf16.msrb.mxu3 %v1555_v23  ;;  %901 = vmatmul.bf16.vlgmr.msrb.gmra.mxu0 %v1177_v32  ;;  %v980_v30 = vmul.f32 16.0, %v1580_v24  ;;  %vm984_vm1 = vweird.f32 %v1580_v24 }
  0x4f   : > { %920 = vmatmul.bf16.vlgmr.msrb.gmra.mxu1 %v1181_v33 }
  0x50   : > { %939 = vmatmul.bf16.vlgmr.msrb.gmra.mxu2 %v1185_v34  ;;  %v981_v39 = vsub.f32 1.0, %v980_v30 }
  0x51   : > { %958 = vmatmul.bf16.vlgmr.msrb.gmra.mxu3 %v1189_v35 }
  0x5e   : > { %906 = vmatmul.bf16.gmra.mxu0 %v1209_v44 }
  0x5f   : > { %925 = vmatmul.bf16.gmra.mxu1 %v1213_v45  ;;  %v982_v45 = vmul.f32 %v1580_v24, %v981_v39 }
  0x60   : > { %944 = vmatmul.bf16.gmra.mxu2 %v1217_v46 }
  0x61   : > { %963 = vmatmul.bf16.gmra.mxu3 %v1221_v47 }
  0xab   : > { %v826_v49 = vpop.f32.mrf.mxu0 }
  0xac   : > { %v845_v50 = vpop.f32.mrf.mxu1  ;;  %v827_v51 = vadd.f32 %v1578_v48, %v826_v49 }
  0xae   : > { %v846_v52 = vadd.f32 %v845_v50, %v827_v51 }
  0xb3   : > { %v864_v53 = vpop.f32.mrf.mxu2  ;;  %v828_v56 = vpop.f32.mrf.mxu0 }
  0xb4   : > { %v883_v54 = vpop.f32.mrf.mxu3  ;;  %v865_v55 = vadd.f32 %v864_v53, %v846_v52  ;;  %v847_v57 = vpop.f32.mrf.mxu1  ;;  %v829_v58 = vadd.f32 %v1578_v48, %v828_v56  ;;  %v983_v52 = vadd.f32 %v1580_v24, %v982_v45 }
  0xb6   : > { %v884_v59 = vadd.f32 %v883_v54, %v865_v55  ;;  %v848_v60 = vadd.f32 %v847_v57, %v829_v58 }
  0xbb   : > { %v866_v61 = vpop.f32.mrf.mxu2  ;;  %v831_v0 = vpop.f32.mrf.mxu0 }
  0xbc   : > { %v885_v62 = vpop.f32.mrf.mxu3  ;;  %v867_v63 = vadd.f32 %v866_v61, %v848_v60  ;;  %v850_v1 = vpop.f32.mrf.mxu1  ;;  %v832_v13 = vadd.f32 %v1578_v48, %v831_v0 }
  0xbe   : > { %v886_v2 = vadd.f32 %v885_v62, %v867_v63  ;;  %v851_v22 = vadd.f32 %v850_v1, %v832_v13 }
  0xc3   : > { %v869_v3 = vpop.f32.mrf.mxu2  ;;  %v833_v5 = vpop.f32.mrf.mxu0 }
  0xc4   : > { %v888_v4 = vpop.f32.mrf.mxu3  ;;  %v852_v6 = vpop.f32.mrf.mxu1  ;;  %v834_v25 = vadd.f32 %v1578_v48, %v833_v5  ;;  %v870_v26 = vadd.f32 %v869_v3, %v851_v22 }
  0xc6   : > { %v853_v32 = vadd.f32 %v852_v6, %v834_v25  ;;  %v889_v34 = vadd.f32 %v888_v4, %v870_v26 }
  0xcb   : > { %v871_v7 = vpop.f32.mrf.mxu2  ;;  %v902_v9 = vpop.f32.mrf.mxu0 }
  0xcc   : > { %v890_v8 = vpop.f32.mrf.mxu3  ;;  %v903_v10 = vadd.f32 %v902_v9, %v884_v59  ;;  %v921_v11 = vpop.f32.mrf.mxu1  ;;  %v872_v36 = vadd.f32 %v871_v7, %v853_v32  ;;  %v985_v59 = vsel %vm984_vm1, %v1580_v24, %v983_v52 }
  0xce   : > { %v922_v12 = vadd.f32 %v921_v11, %v903_v10  ;;  %v891_v44 = vadd.f32 %v890_v8, %v872_v36 }
  0xd3   : > { %v940_v14 = vpop.f32.mrf.mxu2  ;;  %v904_v18 = vpop.f32.mrf.mxu0 }
  0xd4   : > { %v941_v16 = vadd.f32 %v940_v14, %v922_v12  ;;  %v959_v17 = vpop.f32.mrf.mxu3  ;;  %v905_v19 = vadd.f32 %v904_v18, %v886_v2  ;;  %v923_v20 = vpop.f32.mrf.mxu1 }
  0xd6   : > { %v960_v21 = vadd.f32 %v959_v17, %v941_v16  ;;  %v924_v23 = vadd.f32 %v923_v20, %v905_v19 }
  0xd8   : > { %v970_v37 = vsel %vm969_vm0, %v960_v21, 0.0 }
  0xdb   : > { %v942_v27 = vpop.f32.mrf.mxu2  ;;  %v907_v31 = vpop.f32.mrf.mxu0 }
  0xdc   : > { %v943_v28 = vadd.f32 %v942_v27, %v924_v23  ;;  %v961_v29 = vpop.f32.mrf.mxu3  ;;  %v926_v35 = vpop.f32.mrf.mxu1  ;;  %v908_v41 = vadd.f32 %v907_v31, %v889_v34 }
  0xde   : > { %v962_v33 = vadd.f32 %v961_v29, %v943_v28  ;;  %v927_v49 = vadd.f32 %v926_v35, %v908_v41 }
  0xe0   : > { %v971_v38 = vsel %vm969_vm0, %v962_v33, 0.0 }
  0xe1   : > { %v972_v40 = vadd.f32 %v971_v38, %v970_v37 }
  0xe3   : > { %v973_v42 = vrot.slane %v972_v40, 4  ;;  %v945_v43 = vpop.f32.mrf.mxu2  ;;  %v909_v47 = vpop.f32.mrf.mxu0 }
  0xe4   : > { %v964_v46 = vpop.f32.mrf.mxu3  ;;  %v910_v50 = vadd.f32 %v909_v47, %v891_v44  ;;  %v946_v53 = vadd.f32 %v945_v43, %v927_v49  ;;  %v928_v55 = vpop.f32.mrf.mxu1 }
  0xe5   : > { %v974_v48 = vadd.f32 %v973_v42, %v972_v40 }
  0xe6   : > { %v929_v56 = vadd.f32 %v928_v55, %v910_v50  ;;  %v965_v60 = vadd.f32 %v964_v46, %v946_v53 }
  0xe7   : > { %v975_v51 = vrot.slane %v974_v48, 2 }
  0xe8   : > { %v1014_v2 = vsel %vm969_vm0, %v965_v60, 0.0 }
  0xe9   : > { %v976_v54 = vadd.f32 %v975_v51, %v974_v48 }
  0xeb   : > { %v977_v57 = vrot.slane %v976_v54, 1  ;;  %v947_v58 = vpop.f32.mrf.mxu2 }
  0xec   : > { %v948_v61 = vadd.f32 %v947_v58, %v929_v56  ;;  %v966_v63 = vpop.f32.mrf.mxu3 }
  0xed   : > { %v978_v62 = vadd.f32 %v977_v57, %v976_v54 }
  0xee   : > { %v967_v0 = vadd.f32 %v966_v63, %v948_v61 }
  0xef   : > { %v986_v1 = vmul.f32 %v985_v59, %v978_v62 }
  0xf0   : > { %v1015_v3 = vsel %vm969_vm0, %v967_v0, 0.0 }
  0xf1   : > { %v987_v4 = vsub.f32 %v960_v21, %v986_v1  ;;  %v988_v5 = vsub.f32 %v962_v33, %v986_v1  ;;  %v1016_v6 = vadd.f32 %v1015_v3, %v1014_v2 }
  0xf3   : > { %v989_v7 = vmul.f32 %v987_v4, %v987_v4  ;;  %v990_v8 = vmul.f32 %v988_v5, %v988_v5  ;;  %v1017_v9 = vrot.slane %v1016_v6, 4 }
  0xf5   : > { %v991_v10 = vsel %vm969_vm0, %v989_v7, 0.0  ;;  %v992_v11 = vsel %vm969_vm0, %v990_v8, 0.0  ;;  %v1018_v12 = vadd.f32 %v1017_v9, %v1016_v6 }
  0xf6   : > { %v993_v13 = vadd.f32 %v992_v11, %v991_v10 }
  0xf7   : > { %v1019_v14 = vrot.slane %v1018_v12, 2 }
  0xf8   : > { %v994_v15 = vrot.slane %v993_v13, 4 }
  0xf9   : > { %v1020_v16 = vadd.f32 %v1019_v14, %v1018_v12 }
  0xfa   : > { %v995_v17 = vadd.f32 %v994_v15, %v993_v13 }
  0xfb   : > { %v1021_v18 = vrot.slane %v1020_v16, 1 }
  0xfc   : > { %v996_v19 = vrot.slane %v995_v17, 2 }
  0xfd   : > { %v1022_v20 = vadd.f32 %v1021_v18, %v1020_v16 }
  0xfe   : > { %v997_v22 = vadd.f32 %v996_v19, %v995_v17 }
  0xff   : > { %v1023_v21 = vmul.f32 %v1022_v20, %v985_v59 }
 0x100   : > { %v998_v23 = vrot.slane %v997_v22, 1 }
 0x101   : > { %v1025_v24 = vsub.f32 %v967_v0, %v1023_v21  ;;  %v1024_v25 = vsub.f32 %v965_v60, %v1023_v21 }
 0x102   : > { %v999_v26 = vadd.f32 %v998_v23, %v997_v22 }
 0x103   : > { %v1027_v27 = vmul.f32 %v1025_v24, %v1025_v24  ;;  %v1026_v28 = vmul.f32 %v1024_v25, %v1024_v25 }
 0x104   : > { %v1000_v29 = vmul.f32 %v999_v26, %v985_v59 }
 0x105   : > { %v1029_v30 = vsel %vm969_vm0, %v1027_v27, 0.0  ;;  %v1028_v31 = vsel %vm969_vm0, %v1026_v28, 0.0 }
 0x106   : > { %v1001_v32 = vadd.f32 1e-05, %v1000_v29  ;;  %v1030_v33 = vadd.f32 %v1029_v30, %v1028_v31 }
 0x108   : > { %1581 = vrsqrt.f32 %v1001_v32  ;;  %v1031_v34 = vrot.slane %v1030_v33, 4  ;;  %vm1008_vm3 = vweird.f32 %v1001_v32 }
 0x10a   : > { %v1032_v35 = vadd.f32 %v1031_v34, %v1030_v33 }
 0x10c   : > { %v1033_v36 = vrot.slane %v1032_v35, 2 }
 0x10e   : > { %v1582_v37 = vpop.eup %1581  ;;  %v1034_v38 = vadd.f32 %v1033_v36, %v1032_v35 }
 0x10f   : > { %v1003_v39 = vmul.f32 %v1582_v37, %v1001_v32  ;;  %vm1009_vm2 = vweird.f32 %v1582_v37 }
 0x110   : > { %v1035_v40 = vrot.slane %v1034_v38, 1  ;;  %vm1010_vm4 = vmor %vm1008_vm3, %vm1009_vm2 }
 0x111   : > { %v1004_v41 = vmul.f32 %v1582_v37, %v1003_v39 }
 0x112   : > { %v1036_v42 = vadd.f32 %v1035_v40, %v1034_v38 }
 0x113   : > { %v1005_v43 = vmul.f32 0.5, %v1004_v41 }
 0x114   : > { %v1037_v44 = vmul.f32 %v1036_v42, %v985_v59 }
 0x115   : > { %v1006_v45 = vsub.f32 1.5, %v1005_v43 }
 0x116   : > { %v1038_v46 = vadd.f32 1e-05, %v1037_v44 }
 0x117   : > { %v1007_v47 = vmul.f32 %v1582_v37, %v1006_v45 }
 0x118   : > { %1583 = vrsqrt.f32 %v1038_v46  ;;  %vm1045_vm6 = vweird.f32 %v1038_v46 }
 0x119   : > { %v1011_v48 = vsel %vm1010_vm4, %v1582_v37, %v1007_v47 }
 0x11a   : > { %v1013_v49 = vmul.f32 %v1011_v48, %v988_v5  ;;  %v1012_v50 = vmul.f32 %v1011_v48, %v987_v4 }
 0x11e   : > { %v1584_v51 = vpop.eup %1583 }
 0x11f   : > { %v1040_v52 = vmul.f32 %v1584_v51, %v1038_v46  ;;  %vm1046_vm5 = vweird.f32 %v1584_v51 }
 0x120   : > { %vm1047_vm7 = vmor %vm1045_vm6, %vm1046_vm5 }
 0x121   : > { %v1041_v53 = vmul.f32 %v1584_v51, %v1040_v52 }
 0x123   : > { %v1042_v54 = vmul.f32 0.5, %v1041_v53 }
 0x125   : > { %v1043_v55 = vsub.f32 1.5, %v1042_v54 }
 0x127   : > { %v1044_v56 = vmul.f32 %v1584_v51, %v1043_v55 }
 0x129   : > { %v1048_v57 = vsel %vm1047_vm7, %v1584_v51, %v1044_v56 }
 0x12a   : > { %v1049_v58 = vmul.f32 %v1048_v57, %v1024_v25  ;;  %v1050_v59 = vmul.f32 %v1048_v57, %v1025_v24 }
 0x12c   : > { %1053 = vrot.lane.b32.xlu0 %v1049_v58, %s1594_s27 }
 0x134   : > { %1055 = vrot.lane.b32.xlu0 %v1050_v59, %s1594_s27 }
 0x19e   : > { %v1054_v60 = vpop.permute.xlu0 %1053 }
 0x19f   : > { %v1059_v61 = vsel %vm969_vm0, %v1012_v50, %v1054_v60 }
 0x1a0   : > { %v1063_v62 = vmul.f32 0.1, %v1059_v61  ;;  %vm1061_vm8 = vcmp.gt.f32.partialorder %v1059_v61, 0.0 }
 0x1a2   : > { %v1065_v2 = vsel %vm1061_vm8, %v1059_v61, %v1063_v62 }
 0x1a6   : > { %v1056_v63 = vpop.permute.xlu0 %1055 }
 0x1a7   : > { %v1060_v0 = vsel %vm969_vm0, %v1013_v49, %v1056_v63 }
 0x1a8   : > { %vm1062_vm9 = vcmp.gt.f32.partialorder %v1060_v0, 0.0  ;;  %v1064_v1 = vmul.f32 0.1, %v1060_v0 }
 0x1aa   : > { %v1066_v3 = vsel %vm1062_vm9, %v1060_v0, %v1064_v1 }
 0x1ab   : > { %v1566_v4 = vpack.c.bf16 %v1066_v3, %v1065_v2 }
 0x1ad   : > { %1567 = vst [vmem:[%s204_s4] sm:$0xff] %v1566_v4  }
 0x1ae PF: > { %s13_s12 = sadd.s32 1, %s1591_s12  }
 0x1af   : > { %p10_p4 = scmp.ge.s32.totalorder %s13_s12, 4  }
 0x1b1   :  { %12 = sbr.rel (!%p10_p4) target bundleno = 1 (0x1), region = 68 }

// kernel: discriminatorxx_forward.8
= control target key start
LH: loop header
LB: loop body
LE: loop exit
PB: predicated region body
PF: predicated region fallthrough
CT: control target
= control target key end

     0   :  { %s1396_s12 = smov 0   ;;  %s1506_s0 = inlined_call_operand.vmem [shape: bf16[2,8,1024], index: 0, kind: input, shape index: {}]   ;;  %s1507_s1 = inlined_call_operand.vmem [shape: bf16[2,1024,64], index: 1, kind: input, shape index: {}]   ;;  %s1508_s2 = inlined_call_operand.vmem [shape: f32[2,1,64], index: 2, kind: input, shape index: {}]   ;;  %s1509_s3 = inlined_call_operand.vmem [shape: bf16[2,4,128], index: 3, kind: output, shape index: {}]  }
   0x1 LB: > { %s1015_s13 = sadd.s32 4294967295, %s1372_s12   ;;  %p1019_p0 = scmp.ge.s32.totalorder %s1372_s12, 1  ;;  %s1372_s12 = sphi %s1396_s12, %s13_s12  }
   0x2   : > { %p155_p1 = scmp.lt.s32.totalorder %s1372_s12, 3 }
   0x4   : > { %p156_p2 = pnand %p1019_p0, %p155_p1 }
   0x5   : > { %p186_p3 = scmp.lt.s32.totalorder (!%p156_p2), %s1015_s13, 1  ;;  %s1375_s27 = smov (!%p156_p2), 64  }
   0x6   : > { %159 = sbr.rel (%p156_p2) target bundleno = 400 (0x190), region = 32 }
   0xb   : > { %s1511_s13 = smov (!%p186_p3, %s1015_s13), 1  ;;  %vm855_vm0 = vcmask 519168   ;;  %vm934_vm8 = vcmask 523264  }
   0xc   : > { %s1284_s14 = sshll.u32 %s1511_s13, 9  ;;  %s1283_s18 = sshll.u32 %s1511_s13, 5 }
   0xd   : > { %s1410_s17 = scalar_lea.vmem %s1507_s1, %s1284_s14  ;;  %s198_s21 = scalar_lea.vmem %s1508_s2, %s1511_s13 }
   0xe   : > { %v1292_v0 = vld [vmem:[%s1410_s17 + $0x38] sm:$0xff]  ;;  %v1291_v4 = vld [vmem:[%s1410_s17 + $0x30] sm:$0xff]  ;;  %v1290_v8 = vld [vmem:[%s1410_s17 + $0x28] sm:$0xff]  ;;  %s1444_s24 = scalar_lea.vmem %s1506_s0, %s1283_s18  ;;  %s1024_s28 = sshll.u32 %s1511_s13, 1 }
   0xf   : > { %v1300_v1 = vld [vmem:[%s1410_s17 + $0x78] sm:$0xff]  ;;  %751 = vmatpush.bf16.msra.mxu0 %v1292_v0  ;;  %v1299_v5 = vld [vmem:[%s1410_s17 + $0x70] sm:$0xff]  ;;  %v1298_v9 = vld [vmem:[%s1410_s17 + $0x68] sm:$0xff]  ;;  %s202_s4 = scalar_lea.vmem %s1509_s3, %s1024_s28 }
  0x10   : > { %v1308_v2 = vld [vmem:[%s1410_s17 + $0xb8] sm:$0xff]  ;;  %764 = vmatpush.bf16.msra.mxu1 %v1300_v1  ;;  %v1307_v6 = vld [vmem:[%s1410_s17 + $0xb0] sm:$0xff]  ;;  %v1306_v10 = vld [vmem:[%s1410_s17 + $0xa8] sm:$0xff] }
  0x11   : > { %v1316_v3 = vld [vmem:[%s1410_s17 + $0xf8] sm:$0xff]  ;;  %777 = vmatpush.bf16.msra.mxu2 %v1308_v2  ;;  %v1315_v7 = vld [vmem:[%s1410_s17 + $0xf0] sm:$0xff]  ;;  %v1314_v11 = vld [vmem:[%s1410_s17 + $0xe8] sm:$0xff] }
  0x12   : > { %790 = vmatpush.bf16.msra.mxu3 %v1316_v3  ;;  %v1289_v12 = vld [vmem:[%s1410_s17 + $0x20] sm:$0xff]  ;;  %v1288_v16 = vld [vmem:[%s1410_s17 + $0x18] sm:$0xff]  ;;  %v1287_v20 = vld [vmem:[%s1410_s17 + $0x10] sm:$0xff] }
  0x13   : > { %752 = vmatpush.bf16.msra.mxu0 %v1291_v4  ;;  %v1297_v13 = vld [vmem:[%s1410_s17 + $0x60] sm:$0xff]  ;;  %v1296_v17 = vld [vmem:[%s1410_s17 + $0x58] sm:$0xff]  ;;  %v1295_v21 = vld [vmem:[%s1410_s17 + $0x50] sm:$0xff] }
  0x14   : > { %765 = vmatpush.bf16.msra.mxu1 %v1299_v5  ;;  %v1305_v14 = vld [vmem:[%s1410_s17 + $0xa0] sm:$0xff]  ;;  %v1304_v18 = vld [vmem:[%s1410_s17 + $0x98] sm:$0xff]  ;;  %v1303_v22 = vld [vmem:[%s1410_s17 + $0x90] sm:$0xff] }
  0x15   : > { %778 = vmatpush.bf16.msra.mxu2 %v1307_v6  ;;  %v1313_v15 = vld [vmem:[%s1410_s17 + $0xe0] sm:$0xff]  ;;  %v1312_v19 = vld [vmem:[%s1410_s17 + $0xd8] sm:$0xff]  ;;  %v1311_v23 = vld [vmem:[%s1410_s17 + $0xd0] sm:$0xff] }
  0x16   : > { %791 = vmatpush.bf16.msra.mxu3 %v1315_v7  ;;  %v1286_v24 = vld [vmem:[%s1410_s17 + $0x8] sm:$0xff]  ;;  %v203_v29 = vld [vmem:[%s1444_s24] sm:$0xff]  ;;  %v1324_v38 = vld [vmem:[%s1410_s17 + $0x138] sm:$0xff] }
  0x17   : > { %753 = vmatpush.bf16.msra.mxu0 %v1290_v8  ;;  %v1294_v25 = vld [vmem:[%s1410_s17 + $0x48] sm:$0xff]  ;;  %v1285_v30 = vld [vmem:[%s1410_s17] sm:$0xff]  ;;  %v343_v33 = vunpack.c.l.b16 %v203_v29  ;;  %v344_v37 = vunpack.c.h.b16 %v203_v29  ;;  %v1332_v39 = vld [vmem:[%s1410_s17 + $0x178] sm:$0xff] }
  0x18   : > { %766 = vmatpush.bf16.msra.mxu1 %v1298_v9  ;;  %v1302_v26 = vld [vmem:[%s1410_s17 + $0x88] sm:$0xff]  ;;  %v1293_v31 = vld [vmem:[%s1410_s17 + $0x40] sm:$0xff]  ;;  %v1340_v40 = vld [vmem:[%s1410_s17 + $0x1b8] sm:$0xff] }
  0x19   : > { %779 = vmatpush.bf16.msra.mxu2 %v1306_v10  ;;  %v1310_v27 = vld [vmem:[%s1410_s17 + $0xc8] sm:$0xff]  ;;  %v1301_v34 = vld [vmem:[%s1410_s17 + $0x80] sm:$0xff]  ;;  %v1348_v41 = vld [vmem:[%s1410_s17 + $0x1f8] sm:$0xff]  ;;  %v351_v43 = vpack.c.b16 %v343_v33, %v343_v33  ;;  %v352_v45 = vpack.c.b16 %v344_v37, %v344_v37 }
  0x1a   : > { %792 = vmatpush.bf16.msra.mxu3 %v1314_v11  ;;  %v204_v28 = vld [vmem:[%s1444_s24 + $0x8] sm:$0xff]  ;;  %v1309_v35 = vld [vmem:[%s1410_s17 + $0xc0] sm:$0xff]  ;;  %v1323_v46 = vld [vmem:[%s1410_s17 + $0x130] sm:$0xff] }
  0x1b   : > { %754 = vmatpush.bf16.msra.mxu0 %v1289_v12  ;;  %v345_v32 = vunpack.c.l.b16 %v204_v28  ;;  %v346_v36 = vunpack.c.h.b16 %v204_v28  ;;  %v1331_v47 = vld [vmem:[%s1410_s17 + $0x170] sm:$0xff]  ;;  %v1322_v50 = vld [vmem:[%s1410_s17 + $0x128] sm:$0xff]  ;;  %v1321_v54 = vld [vmem:[%s1410_s17 + $0x120] sm:$0xff] }
  0x1c   : > { %767 = vmatpush.bf16.msra.mxu1 %v1297_v13  ;;  %v1339_v48 = vld [vmem:[%s1410_s17 + $0x1b0] sm:$0xff]  ;;  %v1330_v51 = vld [vmem:[%s1410_s17 + $0x168] sm:$0xff]  ;;  %v1329_v55 = vld [vmem:[%s1410_s17 + $0x160] sm:$0xff] }
  0x1d   : > { %780 = vmatpush.bf16.msra.mxu2 %v1305_v14  ;;  %v353_v42 = vpack.c.b16 %v345_v32, %v345_v32  ;;  %v354_v44 = vpack.c.b16 %v346_v36, %v346_v36  ;;  %v1347_v49 = vld [vmem:[%s1410_s17 + $0x1f0] sm:$0xff]  ;;  %v1338_v52 = vld [vmem:[%s1410_s17 + $0x1a8] sm:$0xff]  ;;  %v1337_v56 = vld [vmem:[%s1410_s17 + $0x1a0] sm:$0xff]  ;;  %v1374_v32 = vmov 4.0  }
  0x1e   : > { %793 = vmatpush.bf16.msra.mxu3 %v1313_v15  ;;  %v1346_v53 = vld [vmem:[%s1410_s17 + $0x1e8] sm:$0xff]  ;;  %v1345_v57 = vld [vmem:[%s1410_s17 + $0x1e0] sm:$0xff]  ;;  %v1320_v58 = vld [vmem:[%s1410_s17 + $0x118] sm:$0xff]  ;;  %1360 = vrcp.f32 %v1374_v32 }
  0x1f   : > { %755 = vmatpush.bf16.msra.mxu0 %v1288_v16  ;;  %v1328_v59 = vld [vmem:[%s1410_s17 + $0x158] sm:$0xff]  ;;  %v1319_v62 = vld [vmem:[%s1410_s17 + $0x110] sm:$0xff]  ;;  %v1318_v2 = vld [vmem:[%s1410_s17 + $0x108] sm:$0xff] }
  0x20   : > { %768 = vmatpush.bf16.msra.mxu1 %v1296_v17  ;;  %v1336_v60 = vld [vmem:[%s1410_s17 + $0x198] sm:$0xff]  ;;  %v1327_v63 = vld [vmem:[%s1410_s17 + $0x150] sm:$0xff]  ;;  %v1326_v3 = vld [vmem:[%s1410_s17 + $0x148] sm:$0xff] }
  0x21   : > { %781 = vmatpush.bf16.msra.mxu2 %v1304_v18  ;;  %v1344_v61 = vld [vmem:[%s1410_s17 + $0x1d8] sm:$0xff]  ;;  %v1335_v0 = vld [vmem:[%s1410_s17 + $0x190] sm:$0xff]  ;;  %v1334_v5 = vld [vmem:[%s1410_s17 + $0x188] sm:$0xff] }
  0x22   : > { %794 = vmatpush.bf16.msra.mxu3 %v1312_v19  ;;  %v1343_v1 = vld [vmem:[%s1410_s17 + $0x1d0] sm:$0xff]  ;;  %v1342_v6 = vld [vmem:[%s1410_s17 + $0x1c8] sm:$0xff]  ;;  %v206_v7 = vld [vmem:[%s1444_s24 + $0x18] sm:$0xff] }
  0x23   : > { %756 = vmatpush.bf16.msra.mxu0 %v1287_v20  ;;  %v205_v4 = vld [vmem:[%s1444_s24 + $0x10] sm:$0xff]  ;;  %v1317_v10 = vld [vmem:[%s1410_s17 + $0x100] sm:$0xff]  ;;  %v349_v12 = vunpack.c.l.b16 %v206_v7  ;;  %v350_v13 = vunpack.c.h.b16 %v206_v7 }
  0x24   : > { %769 = vmatpush.bf16.msra.mxu1 %v1295_v21  ;;  %v347_v8 = vunpack.c.l.b16 %v205_v4  ;;  %v348_v9 = vunpack.c.h.b16 %v205_v4  ;;  %v1325_v11 = vld [vmem:[%s1410_s17 + $0x140] sm:$0xff]  ;;  %v1361_v37 = vpop.eup %1360 }
  0x25   : > { %782 = vmatpush.bf16.msra.mxu2 %v1303_v22  ;;  %v1333_v14 = vld [vmem:[%s1410_s17 + $0x180] sm:$0xff]  ;;  %v357_v18 = vpack.c.b16 %v349_v12, %v349_v12  ;;  %v358_v19 = vpack.c.b16 %v350_v13, %v350_v13  ;;  %vm868_vm1 = vweird.f32 %v1361_v37 }
  0x26   : > { %795 = vmatpush.bf16.msra.mxu3 %v1311_v23  ;;  %v1341_v15 = vld [vmem:[%s1410_s17 + $0x1c0] sm:$0xff]  ;;  %v355_v16 = vpack.c.b16 %v347_v8, %v347_v8  ;;  %v356_v17 = vpack.c.b16 %v348_v9, %v348_v9 }
  0x27   : > { %757 = vmatpush.bf16.msra.mxu0 %v1286_v24 }
  0x28   : > { %770 = vmatpush.bf16.msra.mxu1 %v1294_v25 }
  0x29   : > { %783 = vmatpush.bf16.msra.mxu2 %v1302_v26  ;;  %v1359_v26 = vld [vmem:[%s198_s21] ss:$0 sm:$0xff] }
  0x2a   : > { %796 = vmatpush.bf16.msra.mxu3 %v1310_v27 }
  0x2b   : > { %758 = vmatpush.bf16.msra.mxu0 %v1285_v30 }
  0x2c   : > { %771 = vmatpush.bf16.msra.mxu1 %v1293_v31 }
  0x2d   : > { %784 = vmatpush.bf16.msra.mxu2 %v1301_v34 }
  0x2e   : > { %797 = vmatpush.bf16.msra.mxu3 %v1309_v35  ;;  %759 = vmatmul.bf16.vlgmr.msra.gmra.mxu0 %v351_v43 }
  0x2f   : > { %803 = vmatpush.bf16.msrb.mxu0 %v1324_v38  ;;  %772 = vmatmul.bf16.vlgmr.msra.gmra.mxu1 %v352_v45 }
  0x30   : > { %816 = vmatpush.bf16.msrb.mxu1 %v1332_v39  ;;  %785 = vmatmul.bf16.vlgmr.msra.gmra.mxu2 %v353_v42  ;;  %v864_v39 = vmul.f32 4.0, %v1361_v37 }
  0x31   : > { %829 = vmatpush.bf16.msrb.mxu2 %v1340_v40  ;;  %798 = vmatmul.bf16.vlgmr.msra.gmra.mxu3 %v354_v44 }
  0x32   : > { %842 = vmatpush.bf16.msrb.mxu3 %v1348_v41 }
  0x33   : > { %804 = vmatpush.bf16.msrb.mxu0 %v1323_v46  ;;  %v865_v46 = vsub.f32 1.0, %v864_v39 }
  0x34   : > { %817 = vmatpush.bf16.msrb.mxu1 %v1331_v47 }
  0x35   : > { %830 = vmatpush.bf16.msrb.mxu2 %v1339_v48 }
  0x36   : > { %843 = vmatpush.bf16.msrb.mxu3 %v1347_v49 }
  0x37   : > { %805 = vmatpush.bf16.msrb.mxu0 %v1322_v50 }
  0x38   : > { %818 = vmatpush.bf16.msrb.mxu1 %v1330_v51  ;;  %v866_v51 = vmul.f32 %v1361_v37, %v865_v46 }
  0x39   : > { %831 = vmatpush.bf16.msrb.mxu2 %v1338_v52 }
  0x3a   : > { %844 = vmatpush.bf16.msrb.mxu3 %v1346_v53 }
  0x3b   : > { %806 = vmatpush.bf16.msrb.mxu0 %v1321_v54 }
  0x3c   : > { %819 = vmatpush.bf16.msrb.mxu1 %v1329_v55 }
  0x3d   : > { %832 = vmatpush.bf16.msrb.mxu2 %v1337_v56 }
  0x3e   : > { %845 = vmatpush.bf16.msrb.mxu3 %v1345_v57 }
  0x3f   : > { %807 = vmatpush.bf16.msrb.mxu0 %v1320_v58  ;;  %v867_v58 = vadd.f32 %v1361_v37, %v866_v51 }
  0x40   : > { %820 = vmatpush.bf16.msrb.mxu1 %v1328_v59 }
  0x41   : > { %833 = vmatpush.bf16.msrb.mxu2 %v1336_v60 }
  0x42   : > { %846 = vmatpush.bf16.msrb.mxu3 %v1344_v61 }
  0x43   : > { %808 = vmatpush.bf16.msrb.mxu0 %v1319_v62 }
  0x44   : > { %821 = vmatpush.bf16.msrb.mxu1 %v1327_v63  ;;  %v869_v63 = vsel %vm868_vm1, %v1361_v37, %v867_v58 }
  0x45   : > { %834 = vmatpush.bf16.msrb.mxu2 %v1335_v0 }
  0x46   : > { %847 = vmatpush.bf16.msrb.mxu3 %v1343_v1 }
  0x47   : > { %809 = vmatpush.bf16.msrb.mxu0 %v1318_v2 }
  0x48   : > { %822 = vmatpush.bf16.msrb.mxu1 %v1326_v3 }
  0x49   : > { %835 = vmatpush.bf16.msrb.mxu2 %v1334_v5 }
  0x4a   : > { %848 = vmatpush.bf16.msrb.mxu3 %v1342_v6 }
  0x4b   : > { %810 = vmatpush.bf16.msrb.mxu0 %v1317_v10 }
  0x4c   : > { %823 = vmatpush.bf16.msrb.mxu1 %v1325_v11 }
  0x4d   : > { %836 = vmatpush.bf16.msrb.mxu2 %v1333_v14 }
  0x4e   : > { %849 = vmatpush.bf16.msrb.mxu3 %v1341_v15  ;;  %811 = vmatmul.bf16.vlgmr.msrb.gmra.mxu0 %v355_v16 }
  0x4f   : > { %824 = vmatmul.bf16.vlgmr.msrb.gmra.mxu1 %v356_v17 }
  0x50   : > { %837 = vmatmul.bf16.vlgmr.msrb.gmra.mxu2 %v357_v18 }
  0x51   : > { %850 = vmatmul.bf16.vlgmr.msrb.gmra.mxu3 %v358_v19 }
  0xab   : > { %v760_v20 = vpop.f32.mrf.mxu0 }
  0xac   : > { %v773_v21 = vpop.f32.mrf.mxu1  ;;  %v761_v29 = vadd.f32 %v1359_v26, %v760_v20 }
  0xae   : > { %v774_v30 = vadd.f32 %v773_v21, %v761_v29 }
  0xb3   : > { %v786_v22 = vpop.f32.mrf.mxu2  ;;  %v762_v24 = vpop.f32.mrf.mxu0 }
  0xb4   : > { %v799_v23 = vpop.f32.mrf.mxu3  ;;  %v775_v25 = vpop.f32.mrf.mxu1  ;;  %v787_v31 = vadd.f32 %v786_v22, %v774_v30 }
  0xb6   : > { %v800_v33 = vadd.f32 %v799_v23, %v787_v31 }
  0xbb   : > { %v788_v27 = vpop.f32.mrf.mxu2 }
  0xbc   : > { %v801_v28 = vpop.f32.mrf.mxu3 }
  0xcb   : > { %v812_v34 = vpop.f32.mrf.mxu0 }
  0xcc   : > { %v825_v35 = vpop.f32.mrf.mxu1  ;;  %v813_v36 = vadd.f32 %v812_v34, %v800_v33 }
  0xce   : > { %v826_v38 = vadd.f32 %v825_v35, %v813_v36 }
  0xd3   : > { %v838_v40 = vpop.f32.mrf.mxu2  ;;  %v814_v43 = vpop.f32.mrf.mxu0 }
  0xd4   : > { %v851_v41 = vpop.f32.mrf.mxu3  ;;  %v839_v42 = vadd.f32 %v838_v40, %v826_v38  ;;  %v827_v44 = vpop.f32.mrf.mxu1 }
  0xd6   : > { %v852_v45 = vadd.f32 %v851_v41, %v839_v42 }
  0xd8   : > { %v856_v47 = vsel %vm855_vm0, %v852_v45, 0.0  ;;  %v894_v48 = vrot.slane %v852_v45, 4 }
  0xd9   : > { %v857_v49 = vrot.slane %v856_v47, 4 }
  0xda   : > { %v896_v50 = vsel %vm855_vm0, %v894_v48, 0.0 }
  0xdb   : > { %v858_v52 = vadd.f32 %v857_v49, %v856_v47  ;;  %v897_v53 = vrot.slane %v896_v50, 4  ;;  %v840_v54 = vpop.f32.mrf.mxu2 }
  0xdc   : > { %v853_v55 = vpop.f32.mrf.mxu3 }
  0xdd   : > { %v859_v56 = vrot.slane %v858_v52, 2  ;;  %v898_v57 = vadd.f32 %v897_v53, %v896_v50 }
  0xdf   : > { %v860_v59 = vadd.f32 %v859_v56, %v858_v52  ;;  %v899_v60 = vrot.slane %v898_v57, 2 }
  0xe1   : > { %v861_v61 = vrot.slane %v860_v59, 1  ;;  %v900_v62 = vadd.f32 %v899_v60, %v898_v57 }
  0xe3   : > { %v901_v0 = vrot.slane %v900_v62, 1  ;;  %v862_v1 = vadd.f32 %v861_v61, %v860_v59 }
  0xe5   : > { %v902_v2 = vadd.f32 %v901_v0, %v900_v62  ;;  %v870_v3 = vmul.f32 %v869_v63, %v862_v1 }
  0xe7   : > { %v903_v4 = vmul.f32 %v902_v2, %v869_v63  ;;  %v871_v5 = vsub.f32 %v852_v45, %v870_v3 }
  0xe9   : > { %v904_v6 = vsub.f32 %v852_v45, %v903_v4  ;;  %v872_v7 = vmul.f32 %v871_v5, %v871_v5 }
  0xeb   : > { %v905_v8 = vmul.f32 %v904_v6, %v904_v6  ;;  %v873_v9 = vsel %vm855_vm0, %v872_v7, 0.0 }
  0xec   : > { %v874_v10 = vrot.slane %v873_v9, 4 }
  0xed   : > { %v907_v11 = vrot.slane %v905_v8, 4 }
  0xee   : > { %v875_v12 = vadd.f32 %v874_v10, %v873_v9 }
  0xef   : > { %v909_v13 = vsel %vm855_vm0, %v907_v11, 0.0 }
  0xf0   : > { %v910_v14 = vrot.slane %v909_v13, 4  ;;  %v876_v15 = vrot.slane %v875_v12, 2 }
  0xf2   : > { %v911_v16 = vadd.f32 %v910_v14, %v909_v13  ;;  %v877_v17 = vadd.f32 %v876_v15, %v875_v12 }
  0xf4   : > { %v912_v18 = vrot.slane %v911_v16, 2  ;;  %v878_v19 = vrot.slane %v877_v17, 1 }
  0xf6   : > { %v913_v20 = vadd.f32 %v912_v18, %v911_v16  ;;  %v879_v21 = vadd.f32 %v878_v19, %v877_v17 }
  0xf8   : > { %v914_v22 = vrot.slane %v913_v20, 1  ;;  %v880_v23 = vmul.f32 %v879_v21, %v869_v63 }
  0xfa   : > { %v915_v24 = vadd.f32 %v914_v22, %v913_v20  ;;  %v881_v25 = vadd.f32 1e-05, %v880_v23 }
  0xfc   : > { %v916_v26 = vmul.f32 %v915_v24, %v869_v63  ;;  %1362 = vrsqrt.f32 %v881_v25  ;;  %vm888_vm3 = vweird.f32 %v881_v25 }
  0xfe   : > { %v917_v27 = vadd.f32 1e-05, %v916_v26 }
 0x100   : > { %1364 = vrsqrt.f32 %v917_v27  ;;  %vm924_vm6 = vweird.f32 %v917_v27 }
 0x102   : > { %v1363_v28 = vpop.eup %1362 }
 0x103   : > { %v883_v29 = vmul.f32 %v1363_v28, %v881_v25  ;;  %vm889_vm2 = vweird.f32 %v1363_v28 }
 0x104   : > { %vm890_vm4 = vmor %vm888_vm3, %vm889_vm2 }
 0x105   : > { %v884_v30 = vmul.f32 %v1363_v28, %v883_v29 }
 0x106   : > { %v1365_v31 = vpop.eup %1364 }
 0x107   : > { %v919_v32 = vmul.f32 %v1365_v31, %v917_v27  ;;  %v885_v33 = vmul.f32 0.5, %v884_v30  ;;  %vm925_vm5 = vweird.f32 %v1365_v31 }
 0x108   : > { %vm926_vm7 = vmor %vm924_vm6, %vm925_vm5 }
 0x109   : > { %v920_v34 = vmul.f32 %v1365_v31, %v919_v32  ;;  %v886_v35 = vsub.f32 1.5, %v885_v33 }
 0x10b   : > { %v921_v36 = vmul.f32 0.5, %v920_v34  ;;  %v887_v37 = vmul.f32 %v1363_v28, %v886_v35 }
 0x10d   : > { %v922_v38 = vsub.f32 1.5, %v921_v36  ;;  %v891_v39 = vsel %vm890_vm4, %v1363_v28, %v887_v37 }
 0x10e   : > { %v892_v40 = vmul.f32 %v891_v39, %v871_v5 }
 0x10f   : > { %v923_v41 = vmul.f32 %v1365_v31, %v922_v38 }
 0x111   : > { %v927_v42 = vsel %vm926_vm7, %v1365_v31, %v923_v41 }
 0x112   : > { %v928_v43 = vmul.f32 %v927_v42, %v904_v6 }
 0x114   : > { %v930_v44 = vrot.slane %v928_v43, 4 }
 0x116   : > { %931 = vrot.lane.b32.xlu0 %v930_v44, %s1375_s27 }
 0x188   : > { %v932_v45 = vpop.permute.xlu0 %931 }
 0x189   : > { %v935_v46 = vsel %vm934_vm8, %v892_v40, %v932_v45 }
 0x18a   : > { %vm936_vm9 = vcmp.gt.f32.partialorder %v935_v46, 0.0  ;;  %v937_v47 = vmul.f32 0.1, %v935_v46 }
 0x18c   : > { %v938_v48 = vsel %vm936_vm9, %v935_v46, %v937_v47 }
 0x18d   : > { %v939_v49 = vpack.c.bf16 %v938_v48, %v938_v48 }
 0x18f   : > { %940 = vst [vmem:[%s202_s4] sm:$0x3] %v939_v49 }
 0x190 PF: > { %s13_s12 = sadd.s32 1, %s1372_s12  }
 0x191   : > { %p10_p4 = scmp.ge.s32.totalorder %s13_s12, 4  }
 0x193   :  { %12 = sbr.rel (!%p10_p4) target bundleno = 1 (0x1), region = 68 }

// kernel: discriminatorxx_forward.9
= control target key start
LH: loop header
LB: loop body
LE: loop exit
PB: predicated region body
PF: predicated region fallthrough
CT: control target
= control target key end

     0   :  { %s5777_s0 = inlined_call_operand.vmem [shape: bf16[2,512], index: 0, kind: input, shape index: {}]   ;;  %s5778_s1 = inlined_call_operand.vmem [shape: bf16[512,1024], index: 1, kind: input, shape index: {}]   ;;  %s5779_s2 = inlined_call_operand.vmem [shape: f32[1,1024], index: 2, kind: input, shape index: {}]   ;;  %s5780_s3 = inlined_call_operand.vmem [shape: f32[1024,1], index: 3, kind: input, shape index: {}]   ;;  %s5781_s4 = inlined_call_operand.<no memory space> [shape: f32[1,1], index: 4, kind: input, shape index: {}]   ;;  %s5782_s5 = inlined_call_operand.vmem [shape: f32[2,1], index: 5, kind: output, shape index: {0}]   ;;  %s5783_s6 = inlined_call_operand.hbm [shape: f32[2,1024], index: 6, kind: output, shape index: {1}]  }
   0x1   :  { %v12_v0 = vstv %s5781_s4 }
   0x2   :  { %13 = vst [vmem:[#allocation2] sm:$0x1] %v12_v0 }
   0x3   :  { %v2597_v1 = vld [vmem:[%s5778_s1 + $0x1c0] sm:$0xf] }
   0x4   :  { %v3455_v2 = vld [vmem:[%s5778_s1 + $0x1dc] sm:$0xf0] }
   0x5   :  { %v2853_v3 = vld [vmem:[%s5778_s1 + $0x3c0] sm:$0xf]  ;;  %v2598_v4 = vor.u32 %v3455_v2, %v2597_v1 }
   0x6   :  { %v3519_v5 = vld [vmem:[%s5778_s1 + $0x3dc] sm:$0xf0] }
   0x7   :  { %v3109_v6 = vld [vmem:[%s5778_s1 + $0x5c0] sm:$0xf]  ;;  %v2854_v8 = vor.u32 %v3519_v5, %v2853_v3  ;;  %1590 = vmatpush.bf16.msra.mxu0 %v2598_v4 }
   0x8   :  { %v3583_v7 = vld [vmem:[%s5778_s1 + $0x5dc] sm:$0xf0] }
   0x9   :  { %v3110_v9 = vor.u32 %v3583_v7, %v3109_v6  ;;  %v3365_v10 = vld [vmem:[%s5778_s1 + $0x7c0] sm:$0xf]  ;;  %1603 = vmatpush.bf16.msra.mxu1 %v2854_v8 }
   0xa   :  { %v3647_v11 = vld [vmem:[%s5778_s1 + $0x7dc] sm:$0xf0] }
   0xb   :  { %v2565_v12 = vld [vmem:[%s5778_s1 + $0x180] sm:$0xf]  ;;  %v3366_v13 = vor.u32 %v3647_v11, %v3365_v10  ;;  %1616 = vmatpush.bf16.msra.mxu2 %v3110_v9 }
   0xc   :  { %v3447_v14 = vld [vmem:[%s5778_s1 + $0x19c] sm:$0xf0] }
   0xd   :  { %v2821_v15 = vld [vmem:[%s5778_s1 + $0x380] sm:$0xf]  ;;  %v2566_v17 = vor.u32 %v3447_v14, %v2565_v12  ;;  %1629 = vmatpush.bf16.msra.mxu3 %v3366_v13 }
   0xe   :  { %v3511_v16 = vld [vmem:[%s5778_s1 + $0x39c] sm:$0xf0] }
   0xf   :  { %v2822_v18 = vor.u32 %v3511_v16, %v2821_v15  ;;  %v3077_v19 = vld [vmem:[%s5778_s1 + $0x580] sm:$0xf]  ;;  %1591 = vmatpush.bf16.msra.mxu0 %v2566_v17 }
  0x10   :  { %v3575_v20 = vld [vmem:[%s5778_s1 + $0x59c] sm:$0xf0] }
  0x11   :  { %v3333_v21 = vld [vmem:[%s5778_s1 + $0x780] sm:$0xf]  ;;  %v3078_v22 = vor.u32 %v3575_v20, %v3077_v19  ;;  %1604 = vmatpush.bf16.msra.mxu1 %v2822_v18 }
  0x12   :  { %v3639_v23 = vld [vmem:[%s5778_s1 + $0x79c] sm:$0xf0] }
  0x13   :  { %v2533_v24 = vld [vmem:[%s5778_s1 + $0x140] sm:$0xf]  ;;  %v3334_v26 = vor.u32 %v3639_v23, %v3333_v21  ;;  %1617 = vmatpush.bf16.msra.mxu2 %v3078_v22 }
  0x14   :  { %v3439_v25 = vld [vmem:[%s5778_s1 + $0x15c] sm:$0xf0] }
  0x15   :  { %v2789_v27 = vld [vmem:[%s5778_s1 + $0x340] sm:$0xf]  ;;  %v2534_v30 = vor.u32 %v3439_v25, %v2533_v24  ;;  %1630 = vmatpush.bf16.msra.mxu3 %v3334_v26 }
  0x16   :  { %v3503_v28 = vld [vmem:[%s5778_s1 + $0x35c] sm:$0xf0] }
  0x17   :  { %v3045_v29 = vld [vmem:[%s5778_s1 + $0x540] sm:$0xf]  ;;  %v2790_v34 = vor.u32 %v3503_v28, %v2789_v27  ;;  %1592 = vmatpush.bf16.msra.mxu0 %v2534_v30  ;;  %v2599_v30 = vld [vmem:[%s5778_s1 + $0x1e0] sm:$0xf0] }
  0x18   :  { %v3567_v31 = vld [vmem:[%s5778_s1 + $0x55c] sm:$0xf0] }
  0x19   :  { %v3301_v32 = vld [vmem:[%s5778_s1 + $0x740] sm:$0xf]  ;;  %v3046_v35 = vor.u32 %v3567_v31, %v3045_v29  ;;  %1605 = vmatpush.bf16.msra.mxu1 %v2790_v34  ;;  %v3451_v29 = vld [vmem:[%s5778_s1 + $0x1c4] sm:$0xf] }
  0x1a   :  { %v3631_v33 = vld [vmem:[%s5778_s1 + $0x75c] sm:$0xf0]  ;;  %v3515_v31 = vld [vmem:[%s5778_s1 + $0x3c4] sm:$0xf] }
  0x1b   :  { %v2501_v36 = vld [vmem:[%s5778_s1 + $0x100] sm:$0xf]  ;;  %v3302_v39 = vor.u32 %v3631_v33, %v3301_v32  ;;  %1618 = vmatpush.bf16.msra.mxu2 %v3046_v35  ;;  %v2855_v33 = vld [vmem:[%s5778_s1 + $0x3e0] sm:$0xf0] }
  0x1c   :  { %v3431_v37 = vld [vmem:[%s5778_s1 + $0x11c] sm:$0xf0]  ;;  %v3579_v34 = vld [vmem:[%s5778_s1 + $0x5c4] sm:$0xf] }
  0x1d   :  { %v2757_v38 = vld [vmem:[%s5778_s1 + $0x300] sm:$0xf]  ;;  %v2502_v45 = vor.u32 %v3431_v37, %v2501_v36  ;;  %1631 = vmatpush.bf16.msra.mxu3 %v3302_v39  ;;  %v3111_v35 = vld [vmem:[%s5778_s1 + $0x5e0] sm:$0xf0] }
  0x1e   :  { %v3495_v40 = vld [vmem:[%s5778_s1 + $0x31c] sm:$0xf0]  ;;  %v3367_v39 = vld [vmem:[%s5778_s1 + $0x7e0] sm:$0xf0] }
  0x1f   :  { %v3013_v41 = vld [vmem:[%s5778_s1 + $0x500] sm:$0xf]  ;;  %v2758_v46 = vor.u32 %v3495_v40, %v2757_v38  ;;  %1593 = vmatpush.bf16.msra.mxu0 %v2502_v45  ;;  %v3643_v38 = vld [vmem:[%s5778_s1 + $0x7c4] sm:$0xf] }
  0x20   :  { %v3559_v42 = vld [vmem:[%s5778_s1 + $0x51c] sm:$0xf0]  ;;  %v2567_v45 = vld [vmem:[%s5778_s1 + $0x1a0] sm:$0xf0] }
  0x21   :  { %v3269_v43 = vld [vmem:[%s5778_s1 + $0x700] sm:$0xf]  ;;  %v3014_v47 = vor.u32 %v3559_v42, %v3013_v41  ;;  %1606 = vmatpush.bf16.msra.mxu1 %v2758_v46  ;;  %v2602_v41 = vor.u32 %v3451_v29, %v2599_v30  ;;  %v2858_v42 = vor.u32 %v3515_v31, %v2855_v33  ;;  %v3507_v46 = vld [vmem:[%s5778_s1 + $0x384] sm:$0xf] }
  0x22   :  { %v3623_v44 = vld [vmem:[%s5778_s1 + $0x71c] sm:$0xf0]  ;;  %v3239_v29 = vld [vmem:[%s5778_s1 + $0x6e0] sm:$0xf0] }
  0x23   :  { %v2469_v48 = vld [vmem:[%s5778_s1 + $0xc0] sm:$0xf]  ;;  %v3270_v51 = vor.u32 %v3623_v44, %v3269_v43  ;;  %1619 = vmatpush.bf16.msra.mxu2 %v3014_v47  ;;  %v3114_v43 = vor.u32 %v3579_v34, %v3111_v35  ;;  %v3443_v44 = vld [vmem:[%s5778_s1 + $0x184] sm:$0xf]  ;;  %v3370_v47 = vor.u32 %v3643_v38, %v3367_v39 }
  0x24   :  { %v3423_v49 = vld [vmem:[%s5778_s1 + $0xdc] sm:$0xf0]  ;;  %v3411_v33 = vld [vmem:[%s5778_s1 + $0x84] sm:$0xf] }
  0x25   :  { %v2725_v50 = vld [vmem:[%s5778_s1 + $0x2c0] sm:$0xf]  ;;  %v2470_v57 = vor.u32 %v3423_v49, %v2469_v48  ;;  %1632 = vmatpush.bf16.msra.mxu3 %v3270_v51  ;;  %v2823_v48 = vld [vmem:[%s5778_s1 + $0x3a0] sm:$0xf0] }
  0x26   :  { %v3487_v52 = vld [vmem:[%s5778_s1 + $0x2dc] sm:$0xf0]  ;;  %v3571_v49 = vld [vmem:[%s5778_s1 + $0x584] sm:$0xf] }
  0x27   :  { %v2981_v53 = vld [vmem:[%s5778_s1 + $0x4c0] sm:$0xf]  ;;  %v2726_v58 = vor.u32 %v3487_v52, %v2725_v50  ;;  %1594 = vmatpush.bf16.msra.mxu0 %v2470_v57  ;;  %v3079_v50 = vld [vmem:[%s5778_s1 + $0x5a0] sm:$0xf0] }
  0x28   :  { %v3551_v54 = vld [vmem:[%s5778_s1 + $0x4dc] sm:$0xf0]  ;;  %v3635_v51 = vld [vmem:[%s5778_s1 + $0x784] sm:$0xf] }
  0x29   :  { %v3237_v55 = vld [vmem:[%s5778_s1 + $0x6c0] sm:$0xf]  ;;  %v2982_v59 = vor.u32 %v3551_v54, %v2981_v53  ;;  %1607 = vmatpush.bf16.msra.mxu1 %v2726_v58  ;;  %v3335_v52 = vld [vmem:[%s5778_s1 + $0x7a0] sm:$0xf0]  ;;  %v2570_v54 = vor.u32 %v3443_v44, %v2567_v45 }
  0x2a   :  { %v3615_v56 = vld [vmem:[%s5778_s1 + $0x6dc] sm:$0xf0]  ;;  %v3435_v57 = vld [vmem:[%s5778_s1 + $0x144] sm:$0xf] }
  0x2b   :  { %v2437_v60 = vld [vmem:[%s5778_s1 + $0x80] sm:$0xf]  ;;  %v3238_v63 = vor.u32 %v3615_v56, %v3237_v55  ;;  %1620 = vmatpush.bf16.msra.mxu2 %v2982_v59  ;;  %v2826_v55 = vor.u32 %v3507_v46, %v2823_v48  ;;  %v3082_v56 = vor.u32 %v3571_v49, %v3079_v50  ;;  %v2535_v58 = vld [vmem:[%s5778_s1 + $0x160] sm:$0xf0] }
  0x2c   :  { %v3415_v61 = vld [vmem:[%s5778_s1 + $0x9c] sm:$0xf0]  ;;  %v3499_v59 = vld [vmem:[%s5778_s1 + $0x344] sm:$0xf] }
  0x2d   :  { %v2693_v62 = vld [vmem:[%s5778_s1 + $0x280] sm:$0xf]  ;;  %v2438_v5 = vor.u32 %v3415_v61, %v2437_v60  ;;  %1633 = vmatpush.bf16.msra.mxu3 %v3238_v63  ;;  %v3338_v60 = vor.u32 %v3635_v51, %v3335_v52  ;;  %v2791_v61 = vld [vmem:[%s5778_s1 + $0x360] sm:$0xf0] }
  0x2e   :  { %v3479_v0 = vld [vmem:[%s5778_s1 + $0x29c] sm:$0xf0]  ;;  %v3047_v63 = vld [vmem:[%s5778_s1 + $0x560] sm:$0xf0] }
  0x2f   :  { %v2949_v1 = vld [vmem:[%s5778_s1 + $0x480] sm:$0xf]  ;;  %v2694_v6 = vor.u32 %v3479_v0, %v2693_v62  ;;  %1595 = vmatpush.bf16.msra.mxu0 %v2438_v5  ;;  %v3563_v62 = vld [vmem:[%s5778_s1 + $0x544] sm:$0xf] }
  0x30   :  { %v3543_v2 = vld [vmem:[%s5778_s1 + $0x49c] sm:$0xf0]  ;;  %v3627_v0 = vld [vmem:[%s5778_s1 + $0x744] sm:$0xf]  ;;  %v3050_v5 = vor.u32 %v3563_v62, %v3047_v63 }
  0x31   :  { %v3205_v3 = vld [vmem:[%s5778_s1 + $0x680] sm:$0xf]  ;;  %v2950_v7 = vor.u32 %v3543_v2, %v2949_v1  ;;  %1608 = vmatpush.bf16.msra.mxu1 %v2694_v6  ;;  %v3303_v1 = vld [vmem:[%s5778_s1 + $0x760] sm:$0xf0]  ;;  %v2538_v2 = vor.u32 %v3435_v57, %v2535_v58 }
  0x32   :  { %v3607_v4 = vld [vmem:[%s5778_s1 + $0x69c] sm:$0xf0]  ;;  %v2503_v6 = vld [vmem:[%s5778_s1 + $0x120] sm:$0xf0] }
  0x33   :  { %v2405_v8 = vld [vmem:[%s5778_s1 + $0x40] sm:$0xf]  ;;  %v3206_v11 = vor.u32 %v3607_v4, %v3205_v3  ;;  %1621 = vmatpush.bf16.msra.mxu2 %v2950_v7  ;;  %v3427_v3 = vld [vmem:[%s5778_s1 + $0x104] sm:$0xf]  ;;  %v2794_v4 = vor.u32 %v3499_v59, %v2791_v61 }
  0x34   :  { %v3407_v9 = vld [vmem:[%s5778_s1 + $0x5c] sm:$0xf0]  ;;  %v3491_v7 = vld [vmem:[%s5778_s1 + $0x304] sm:$0xf] }
  0x35   :  { %v2661_v10 = vld [vmem:[%s5778_s1 + $0x240] sm:$0xf]  ;;  %v2406_v17 = vor.u32 %v3407_v9, %v2405_v8  ;;  %1634 = vmatpush.bf16.msra.mxu3 %v3206_v11  ;;  %v2759_v8 = vld [vmem:[%s5778_s1 + $0x320] sm:$0xf0]  ;;  %v3306_v9 = vor.u32 %v3627_v0, %v3303_v1 }
  0x36   :  { %v3471_v12 = vld [vmem:[%s5778_s1 + $0x25c] sm:$0xf0]  ;;  %v3015_v11 = vld [vmem:[%s5778_s1 + $0x520] sm:$0xf0] }
  0x37   :  { %v2917_v13 = vld [vmem:[%s5778_s1 + $0x440] sm:$0xf]  ;;  %v2662_v20 = vor.u32 %v3471_v12, %v2661_v10  ;;  %1596 = vmatpush.bf16.msra.mxu0 %v2406_v17  ;;  %v3555_v10 = vld [vmem:[%s5778_s1 + $0x504] sm:$0xf] }
  0x38   :  { %v3535_v14 = vld [vmem:[%s5778_s1 + $0x45c] sm:$0xf0]  ;;  %v3619_v12 = vld [vmem:[%s5778_s1 + $0x704] sm:$0xf] }
  0x39   :  { %v3173_v15 = vld [vmem:[%s5778_s1 + $0x640] sm:$0xf]  ;;  %v2918_v21 = vor.u32 %v3535_v14, %v2917_v13  ;;  %1609 = vmatpush.bf16.msra.mxu1 %v2662_v20  ;;  %v3271_v13 = vld [vmem:[%s5778_s1 + $0x720] sm:$0xf0]  ;;  %v3018_v20 = vor.u32 %v3555_v10, %v3015_v11  ;;  %v3373_v11 = vld [vmem:[%s5778_s1 + $0x7c8] sm:$0xf] }
  0x3a   :  { %v3599_v16 = vld [vmem:[%s5778_s1 + $0x65c] sm:$0xf0]  ;;  %v2439_v34 = vld [vmem:[%s5778_s1 + $0xa0] sm:$0xf0] }
  0x3b   :  { %v2373_v18 = vld [vmem:[%s5778_s1] sm:$0xf]  ;;  %v3174_v25 = vor.u32 %v3599_v16, %v3173_v15  ;;  %1622 = vmatpush.bf16.msra.mxu2 %v2918_v21  ;;  %v2506_v16 = vor.u32 %v3427_v3, %v2503_v6  ;;  %v3419_v21 = vld [vmem:[%s5778_s1 + $0xc4] sm:$0xf]  ;;  %v3456_v3 = vld [vmem:[%s5778_s1 + $0x1e4] sm:$0xf0] }
  0x3c   :  { %v3399_v19 = vld [vmem:[%s5778_s1 + $0x1c] sm:$0xf0]  ;;  %v3475_v35 = vld [vmem:[%s5778_s1 + $0x284] sm:$0xf]  ;;  %v3520_v6 = vld [vmem:[%s5778_s1 + $0x3e4] sm:$0xf0] }
  0x3d   :  { %v2629_v22 = vld [vmem:[%s5778_s1 + $0x200] sm:$0xf]  ;;  %v2374_v32 = vor.u32 %v3399_v19, %v2373_v18  ;;  %1635 = vmatpush.bf16.msra.mxu3 %v3174_v25  ;;  %v2762_v19 = vor.u32 %v3491_v7, %v2759_v8  ;;  %v2727_v25 = vld [vmem:[%s5778_s1 + $0x2e0] sm:$0xf0]  ;;  %v3117_v7 = vld [vmem:[%s5778_s1 + $0x5c8] sm:$0xf] }
  0x3e   :  { %v3463_v23 = vld [vmem:[%s5778_s1 + $0x21c] sm:$0xf0]  ;;  %v3539_v38 = vld [vmem:[%s5778_s1 + $0x484] sm:$0xf]  ;;  %v3584_v8 = vld [vmem:[%s5778_s1 + $0x5e4] sm:$0xf0] }
  0x3f   :  { %v2885_v24 = vld [vmem:[%s5778_s1 + $0x400] sm:$0xf]  ;;  %v2630_v36 = vor.u32 %v3463_v23, %v2629_v22  ;;  %1597 = vmatpush.bf16.msra.mxu0 %v2374_v32  ;;  %v2471_v22 = vld [vmem:[%s5778_s1 + $0xe0] sm:$0xf0] }
  0x40   :  { %v3527_v26 = vld [vmem:[%s5778_s1 + $0x41c] sm:$0xf0]  ;;  %v3483_v23 = vld [vmem:[%s5778_s1 + $0x2c4] sm:$0xf]  ;;  %v2474_v30 = vor.u32 %v3419_v21, %v2471_v22  ;;  %v2573_v21 = vld [vmem:[%s5778_s1 + $0x188] sm:$0xf] }
  0x41   :  { %v3141_v27 = vld [vmem:[%s5778_s1 + $0x600] sm:$0xf]  ;;  %v2886_v37 = vor.u32 %v3527_v26, %v2885_v24  ;;  %1610 = vmatpush.bf16.msra.mxu1 %v2630_v36  ;;  %v3274_v24 = vor.u32 %v3619_v12, %v3271_v13  ;;  %v3547_v26 = vld [vmem:[%s5778_s1 + $0x4c4] sm:$0xf]  ;;  %v2730_v31 = vor.u32 %v3483_v23, %v2727_v25  ;;  %v3648_v12 = vld [vmem:[%s5778_s1 + $0x7e4] sm:$0xf0] }
  0x42   :  { %v3591_v28 = vld [vmem:[%s5778_s1 + $0x61c] sm:$0xf0]  ;;  %v2951_v39 = vld [vmem:[%s5778_s1 + $0x4a0] sm:$0xf0]  ;;  %v3448_v22 = vld [vmem:[%s5778_s1 + $0x1a4] sm:$0xf0] }
  0x43   :  { %v3142_v40 = vor.u32 %v3591_v28, %v3141_v27  ;;  %1623 = vmatpush.bf16.msra.mxu2 %v2886_v37  ;;  %v25_v53 = vld [vmem:[%s5777_s0] sm:$0xf]  ;;  %1642 = vmatpush.bf16.msrb.mxu0 %v2602_v41  ;;  %v2983_v27 = vld [vmem:[%s5778_s1 + $0x4e0] sm:$0xf0]  ;;  %v2954_v44 = vor.u32 %v3539_v38, %v2951_v39  ;;  %v2829_v23 = vld [vmem:[%s5778_s1 + $0x388] sm:$0xf] }
  0x44   :  { %301 = vst [vmem:[#allocation1] ss:$9 sm:$0xff] %v25_v53  ;;  %v3611_v28 = vld [vmem:[%s5778_s1 + $0x6c4] sm:$0xf]  ;;  %v2986_v32 = vor.u32 %v3547_v26, %v2983_v27  ;;  %v3512_v25 = vld [vmem:[%s5778_s1 + $0x3a4] sm:$0xf0] }
  0x45   :  { %1636 = vmatpush.bf16.msra.mxu3 %v3142_v40  ;;  %1655 = vmatpush.bf16.msrb.mxu1 %v2858_v42  ;;  %v3242_v36 = vor.u32 %v3611_v28, %v3239_v29  ;;  %v2695_v37 = vld [vmem:[%s5778_s1 + $0x2a0] sm:$0xf0]  ;;  %v2442_v42 = vor.u32 %v3411_v33, %v2439_v34  ;;  %v3085_v26 = vld [vmem:[%s5778_s1 + $0x588] sm:$0xf] }
  0x46   :  { %v3603_v40 = vld [vmem:[%s5778_s1 + $0x684] sm:$0xf]  ;;  %v3576_v27 = vld [vmem:[%s5778_s1 + $0x5a4] sm:$0xf0] }
  0x47   :  { %1668 = vmatpush.bf16.msrb.mxu2 %v3114_v43  ;;  %1643 = vmatpush.bf16.msrb.mxu0 %v2570_v54  ;;  %v3207_v41 = vld [vmem:[%s5778_s1 + $0x6a0] sm:$0xf0]  ;;  %v2698_v43 = vor.u32 %v3475_v35, %v2695_v37  ;;  %v3341_v28 = vld [vmem:[%s5778_s1 + $0x788] sm:$0xf] }
  0x48   :  { %v3403_v45 = vld [vmem:[%s5778_s1 + $0x44] sm:$0xf]  ;;  %v3210_v48 = vor.u32 %v3603_v40, %v3207_v41  ;;  %v3640_v29 = vld [vmem:[%s5778_s1 + $0x7a4] sm:$0xf0] }
  0x49   :  { %1681 = vmatpush.bf16.msrb.mxu3 %v3370_v47  ;;  %1656 = vmatpush.bf16.msrb.mxu1 %v2826_v55  ;;  %v2407_v46 = vld [vmem:[%s5778_s1 + $0x60] sm:$0xf0]  ;;  %v2541_v33 = vld [vmem:[%s5778_s1 + $0x148] sm:$0xf] }
  0x4a   :  { %v3467_v47 = vld [vmem:[%s5778_s1 + $0x244] sm:$0xf]  ;;  %v2410_v54 = vor.u32 %v3403_v45, %v2407_v46  ;;  %v3440_v34 = vld [vmem:[%s5778_s1 + $0x164] sm:$0xf0] }
  0x4b   :  { %1669 = vmatpush.bf16.msrb.mxu2 %v3082_v56  ;;  %v4014_v14 = vld [vmem:[#allocation1 + $0x12] sm:$0xff]  ;;  %v4016_v15 = vld [vmem:[#allocation1] sm:$0xff]  ;;  %1644 = vmatpush.bf16.msrb.mxu0 %v2538_v2  ;;  %v4021_v18 = vld [vmem:[#allocation1 + $0x9] sm:$0xff] }
  0x4c   :  { %1624 = vmatmul.bf16.vlgmr.msra.gmra.mxu2 %v4014_v14  ;;  %v4019_v17 = vld [vmem:[#allocation1 + $0x1b] sm:$0xff]  ;;  %1598 = vmatmul.bf16.vlgmr.msra.gmra.mxu0 %v4016_v15  ;;  %v2663_v49 = vld [vmem:[%s5778_s1 + $0x260] sm:$0xf0]  ;;  %v2605_v2 = vld [vmem:[%s5778_s1 + $0x1c8] sm:$0xf] }
  0x4d   :  { %1682 = vmatpush.bf16.msrb.mxu3 %v3338_v60  ;;  %1657 = vmatpush.bf16.msrb.mxu1 %v2794_v4  ;;  %v3531_v50 = vld [vmem:[%s5778_s1 + $0x444] sm:$0xf]  ;;  %v2666_v57 = vor.u32 %v3467_v47, %v2663_v49  ;;  %v2861_v4 = vld [vmem:[%s5778_s1 + $0x3c8] sm:$0xf] }
  0x4e   :  { %1637 = vmatmul.bf16.vlgmr.msra.gmra.mxu3 %v4019_v17  ;;  %1611 = vmatmul.bf16.vlgmr.msra.gmra.mxu1 %v4021_v18  ;;  %v2919_v51 = vld [vmem:[%s5778_s1 + $0x460] sm:$0xf0]  ;;  %v2797_v35 = vld [vmem:[%s5778_s1 + $0x348] sm:$0xf] }
  0x4f   :  { %1670 = vmatpush.bf16.msrb.mxu2 %v3050_v5  ;;  %1645 = vmatpush.bf16.msrb.mxu0 %v2506_v16  ;;  %v3595_v52 = vld [vmem:[%s5778_s1 + $0x644] sm:$0xf]  ;;  %v2922_v58 = vor.u32 %v3531_v50, %v2919_v51  ;;  %v2606_v16 = vor.u32 %v3456_v3, %v2605_v2  ;;  %v3504_v37 = vld [vmem:[%s5778_s1 + $0x364] sm:$0xf0] }
  0x50   :  { %v3175_v53 = vld [vmem:[%s5778_s1 + $0x660] sm:$0xf0]  ;;  %v3053_v38 = vld [vmem:[%s5778_s1 + $0x548] sm:$0xf] }
  0x51   :  { %1683 = vmatpush.bf16.msrb.mxu3 %v3306_v9  ;;  %1658 = vmatpush.bf16.msrb.mxu1 %v2762_v19  ;;  %v3395_v55 = vld [vmem:[%s5778_s1 + $0x4] sm:$0xf]  ;;  %v3178_v62 = vor.u32 %v3595_v52, %v3175_v53  ;;  %v2862_v19 = vor.u32 %v3520_v6, %v2861_v4  ;;  %v3568_v39 = vld [vmem:[%s5778_s1 + $0x564] sm:$0xf0] }
  0x52   :  { %v2375_v56 = vld [vmem:[%s5778_s1 + $0x20] sm:$0xf0]  ;;  %v3309_v40 = vld [vmem:[%s5778_s1 + $0x748] sm:$0xf] }
  0x53   :  { %1671 = vmatpush.bf16.msrb.mxu2 %v3018_v20  ;;  %1646 = vmatpush.bf16.msrb.mxu0 %v2474_v30  ;;  %v3459_v59 = vld [vmem:[%s5778_s1 + $0x204] sm:$0xf]  ;;  %v2378_v5 = vor.u32 %v3395_v55, %v2375_v56  ;;  %v3118_v20 = vor.u32 %v3584_v8, %v3117_v7  ;;  %v2574_v30 = vor.u32 %v3448_v22, %v2573_v21  ;;  %v3632_v41 = vld [vmem:[%s5778_s1 + $0x764] sm:$0xf0] }
  0x54   :  { %v2631_v60 = vld [vmem:[%s5778_s1 + $0x220] sm:$0xf0]  ;;  %v2509_v45 = vld [vmem:[%s5778_s1 + $0x108] sm:$0xf] }
  0x55   :  { %1684 = vmatpush.bf16.msrb.mxu3 %v3274_v24  ;;  %1659 = vmatpush.bf16.msrb.mxu1 %v2730_v31  ;;  %v3523_v61 = vld [vmem:[%s5778_s1 + $0x404] sm:$0xf]  ;;  %v2634_v9 = vor.u32 %v3459_v59, %v2631_v60  ;;  %v3374_v24 = vor.u32 %v3648_v12, %v3373_v11  ;;  %v2830_v31 = vor.u32 %v3512_v25, %v2829_v23  ;;  %v3432_v46 = vld [vmem:[%s5778_s1 + $0x124] sm:$0xf0] }
  0x56   :  { %v2887_v63 = vld [vmem:[%s5778_s1 + $0x420] sm:$0xf0]  ;;  %v2765_v47 = vld [vmem:[%s5778_s1 + $0x308] sm:$0xf] }
  0x57   :  { %1672 = vmatpush.bf16.msrb.mxu2 %v2986_v32  ;;  %1647 = vmatpush.bf16.msrb.mxu0 %v2442_v42  ;;  %v3587_v0 = vld [vmem:[%s5778_s1 + $0x604] sm:$0xf]  ;;  %v2890_v10 = vor.u32 %v3523_v61, %v2887_v63  ;;  %v3086_v32 = vor.u32 %v3576_v27, %v3085_v26  ;;  %v2542_v42 = vor.u32 %v3440_v34, %v2541_v33  ;;  %v3496_v49 = vld [vmem:[%s5778_s1 + $0x324] sm:$0xf0] }
  0x58   :  { %v3143_v1 = vld [vmem:[%s5778_s1 + $0x620] sm:$0xf0]  ;;  %v3021_v50 = vld [vmem:[%s5778_s1 + $0x508] sm:$0xf]  ;;  %v2766_v55 = vor.u32 %v3496_v49, %v2765_v47 }
  0x59   :  { %1685 = vmatpush.bf16.msrb.mxu3 %v3242_v36  ;;  %1660 = vmatpush.bf16.msrb.mxu1 %v2698_v43  ;;  %v3146_v13 = vor.u32 %v3587_v0, %v3143_v1  ;;  %v3342_v36 = vor.u32 %v3640_v29, %v3341_v28  ;;  %v2798_v43 = vor.u32 %v3504_v37, %v2797_v35  ;;  %v3560_v51 = vld [vmem:[%s5778_s1 + $0x524] sm:$0xf0] }
  0x5a   :  { %v3277_v52 = vld [vmem:[%s5778_s1 + $0x708] sm:$0xf]  ;;  %v3022_v56 = vor.u32 %v3560_v51, %v3021_v50 }
  0x5b   :  { %1673 = vmatpush.bf16.msrb.mxu2 %v2954_v44  ;;  %1648 = vmatpush.bf16.msrb.mxu0 %v2410_v54  ;;  %v3054_v44 = vor.u32 %v3568_v39, %v3053_v38  ;;  %v3624_v53 = vld [vmem:[%s5778_s1 + $0x724] sm:$0xf0]  ;;  %v2510_v54 = vor.u32 %v3432_v46, %v2509_v45 }
  0x5c   :  { %v2733_v59 = vld [vmem:[%s5778_s1 + $0x2c8] sm:$0xf]  ;;  %v3278_v60 = vor.u32 %v3624_v53, %v3277_v52 }
  0x5d   :  { %1686 = vmatpush.bf16.msrb.mxu3 %v3210_v48  ;;  %1661 = vmatpush.bf16.msrb.mxu1 %v2666_v57  ;;  %v3310_v48 = vor.u32 %v3632_v41, %v3309_v40  ;;  %v2477_v57 = vld [vmem:[%s5778_s1 + $0xc8] sm:$0xf] }
  0x5e   :  { %v3488_v61 = vld [vmem:[%s5778_s1 + $0x2e4] sm:$0xf0] }
  0x5f   :  { %1674 = vmatpush.bf16.msrb.mxu2 %v2922_v58  ;;  %1649 = vmatpush.bf16.msrb.mxu0 %v2378_v5  ;;  %v3424_v58 = vld [vmem:[%s5778_s1 + $0xe4] sm:$0xf0]  ;;  %v2734_v3 = vor.u32 %v3488_v61, %v2733_v59 }
  0x60   :  { %v3552_v63 = vld [vmem:[%s5778_s1 + $0x4e4] sm:$0xf0]  ;;  %v2478_v2 = vor.u32 %v3424_v58, %v2477_v57 }
  0x61   :  { %1687 = vmatpush.bf16.msrb.mxu3 %v3178_v62  ;;  %1662 = vmatpush.bf16.msrb.mxu1 %v2634_v9  ;;  %v2989_v62 = vld [vmem:[%s5778_s1 + $0x4c8] sm:$0xf] }
  0x62   :  { %1650 = vmatmul.bf16.vlgmr.msrb.gmra.mxu0 %v4016_v15  ;;  %v3245_v0 = vld [vmem:[%s5778_s1 + $0x6c8] sm:$0xf]  ;;  %v2990_v4 = vor.u32 %v3552_v63, %v2989_v62 }
  0x63   :  { %1675 = vmatpush.bf16.msrb.mxu2 %v2890_v10  ;;  %1694 = vmatpush.bf16.msra.mxu0 %v2606_v16  ;;  %v3616_v1 = vld [vmem:[%s5778_s1 + $0x6e4] sm:$0xf0] }
  0x64   :  { %1663 = vmatmul.bf16.vlgmr.msrb.gmra.mxu1 %v4021_v18  ;;  %v2445_v5 = vld [vmem:[%s5778_s1 + $0x88] sm:$0xf]  ;;  %v3246_v8 = vor.u32 %v3616_v1, %v3245_v0 }
  0x65   :  { %1688 = vmatpush.bf16.msrb.mxu3 %v3146_v13  ;;  %1707 = vmatpush.bf16.msra.mxu1 %v2862_v19  ;;  %v3416_v6 = vld [vmem:[%s5778_s1 + $0xa4] sm:$0xf0] }
  0x66   :  { %1676 = vmatmul.bf16.vlgmr.msrb.gmra.mxu2 %v4014_v14  ;;  %v2701_v7 = vld [vmem:[%s5778_s1 + $0x288] sm:$0xf]  ;;  %v2446_v16 = vor.u32 %v3416_v6, %v2445_v5 }
  0x67   :  { %1720 = vmatpush.bf16.msra.mxu2 %v3118_v20  ;;  %1695 = vmatpush.bf16.msra.mxu0 %v2574_v30  ;;  %v3480_v9 = vld [vmem:[%s5778_s1 + $0x2a4] sm:$0xf0] }
  0x68   :  { %1689 = vmatmul.bf16.vlgmr.msrb.gmra.mxu3 %v4019_v17  ;;  %v2957_v10 = vld [vmem:[%s5778_s1 + $0x488] sm:$0xf]  ;;  %v2702_v20 = vor.u32 %v3480_v9, %v2701_v7 }
  0x69   :  { %1733 = vmatpush.bf16.msra.mxu3 %v3374_v24  ;;  %1708 = vmatpush.bf16.msra.mxu1 %v2830_v31  ;;  %v3544_v11 = vld [vmem:[%s5778_s1 + $0x4a4] sm:$0xf0] }
  0x6a   :  { %v3213_v12 = vld [vmem:[%s5778_s1 + $0x688] sm:$0xf]  ;;  %v2958_v21 = vor.u32 %v3544_v11, %v2957_v10 }
  0x6b   :  { %1721 = vmatpush.bf16.msra.mxu2 %v3086_v32  ;;  %1696 = vmatpush.bf16.msra.mxu0 %v2542_v42  ;;  %v3608_v13 = vld [vmem:[%s5778_s1 + $0x6a4] sm:$0xf0] }
  0x6c   :  { %v2413_v19 = vld [vmem:[%s5778_s1 + $0x48] sm:$0xf]  ;;  %v3214_v25 = vor.u32 %v3608_v13, %v3213_v12 }
  0x6d   :  { %1734 = vmatpush.bf16.msra.mxu3 %v3342_v36  ;;  %1709 = vmatpush.bf16.msra.mxu1 %v2798_v43  ;;  %v3408_v22 = vld [vmem:[%s5778_s1 + $0x64] sm:$0xf0] }
  0x6e   :  { %v2669_v23 = vld [vmem:[%s5778_s1 + $0x248] sm:$0xf] }
  0x6f   :  { %1722 = vmatpush.bf16.msra.mxu2 %v3054_v44  ;;  %1697 = vmatpush.bf16.msra.mxu0 %v2510_v54  ;;  %v3472_v24 = vld [vmem:[%s5778_s1 + $0x264] sm:$0xf0] }
  0x70   :  { %v2925_v26 = vld [vmem:[%s5778_s1 + $0x448] sm:$0xf] }
  0x71   :  { %1735 = vmatpush.bf16.msra.mxu3 %v3310_v48  ;;  %1710 = vmatpush.bf16.msra.mxu1 %v2766_v55  ;;  %v3536_v27 = vld [vmem:[%s5778_s1 + $0x464] sm:$0xf0] }
  0x72   :  { %v3181_v28 = vld [vmem:[%s5778_s1 + $0x648] sm:$0xf] }
  0x73   :  { %1723 = vmatpush.bf16.msra.mxu2 %v3022_v56  ;;  %1698 = vmatpush.bf16.msra.mxu0 %v2478_v2  ;;  %v3600_v29 = vld [vmem:[%s5778_s1 + $0x664] sm:$0xf0] }
  0x75   :  { %1736 = vmatpush.bf16.msra.mxu3 %v3278_v60  ;;  %1711 = vmatpush.bf16.msra.mxu1 %v2734_v3 }
  0x77   :  { %1724 = vmatpush.bf16.msra.mxu2 %v2990_v4 }
  0x79   :  { %1737 = vmatpush.bf16.msra.mxu3 %v3246_v8 }
  0x7a   :  { %14 = vsyncpa [#allocation4], 0  ;;  %1699 = vmatpush.bf16.msra.mxu0 %v2446_v16  ;;  %v2414_v30 = vor.u32 %v3408_v22, %v2413_v19  ;;  %v2381_v31 = vld [vmem:[%s5778_s1 + $0x8] sm:$0xf]  ;;  %1712 = vmatpush.bf16.msra.mxu1 %v2702_v20  ;;  %v2670_v33 = vor.u32 %v3472_v24, %v2669_v23  ;;  %v2926_v34 = vor.u32 %v3536_v27, %v2925_v26  ;;  %v3452_v42 = vld [vmem:[%s5778_s1 + $0x1cc] sm:$0xf] }
  0x7b   :  { %v3400_v32 = vld [vmem:[%s5778_s1 + $0x24] sm:$0xf0]  ;;  %1725 = vmatpush.bf16.msra.mxu2 %v2958_v21  ;;  %v3182_v38 = vor.u32 %v3600_v29, %v3181_v28  ;;  %v2607_v43 = vld [vmem:[%s5778_s1 + $0x1e8] sm:$0xf0]  ;;  %vm2044_vm4 = vcmask 1041408   ;;  %vm2046_vm5 = vcmask 1045508  }
  0x7c   :  { %v2637_v35 = vld [vmem:[%s5778_s1 + $0x208] sm:$0xf]  ;;  %v3516_v44 = vld [vmem:[%s5778_s1 + $0x3cc] sm:$0xf]  ;;  %v2382_v45 = vor.u32 %v3400_v32, %v2381_v31  ;;  %v2610_v54 = vor.u32 %v3452_v42, %v2607_v43  ;;  %vm2048_vm6 = vcmask 1043456   ;;  %s2360_s28 = sshll.u32 %s5783_s6, 4  ;;  %s2361_s28 = int_to_ptr.hbm [resolvable:$true] %s2360_s28 }
  0x7d   :  { %v3464_v36 = vld [vmem:[%s5778_s1 + $0x224] sm:$0xf0]  ;;  %1738 = vmatpush.bf16.msra.mxu3 %v3214_v25  ;;  %v2863_v46 = vld [vmem:[%s5778_s1 + $0x3e8] sm:$0xf0]  ;;  %s3684_s29 = smov [#allocation3]   ;;  %vm2349_vm11 = vcmask 1024  }
  0x7e   :  { %v2893_v37 = vld [vmem:[%s5778_s1 + $0x408] sm:$0xf]  ;;  %1700 = vmatpush.bf16.msra.mxu0 %v2414_v30  ;;  %v3580_v47 = vld [vmem:[%s5778_s1 + $0x5cc] sm:$0xf]  ;;  %1713 = vmatpush.bf16.msra.mxu1 %v2670_v33  ;;  %v2638_v49 = vor.u32 %v3464_v36, %v2637_v35  ;;  %v2866_v55 = vor.u32 %v3516_v44, %v2863_v46  ;;  %s2358_s30 = sshll.u32 %s3684_s29, 4  ;;  %s2359_s30 = int_to_ptr.vmem [resolvable:$true] %s2358_s30 }
  0x7f   :  { %v3528_v39 = vld [vmem:[%s5778_s1 + $0x424] sm:$0xf0]  ;;  %v3119_v48 = vld [vmem:[%s5778_s1 + $0x5e8] sm:$0xf0]  ;;  %1726 = vmatpush.bf16.msra.mxu2 %v2926_v34 }
  0x80   :  { %v3149_v40 = vld [vmem:[%s5778_s1 + $0x608] sm:$0xf]  ;;  %v2894_v50 = vor.u32 %v3528_v39, %v2893_v37  ;;  %v3644_v51 = vld [vmem:[%s5778_s1 + $0x7cc] sm:$0xf]  ;;  %v3122_v56 = vor.u32 %v3580_v47, %v3119_v48 }
  0x81   :  { %v3592_v41 = vld [vmem:[%s5778_s1 + $0x624] sm:$0xf0]  ;;  %v3375_v52 = vld [vmem:[%s5778_s1 + $0x7e8] sm:$0xf0]  ;;  %1739 = vmatpush.bf16.msra.mxu3 %v3182_v38 }
  0x82   :  { %v3150_v53 = vor.u32 %v3592_v41, %v3149_v40  ;;  %v3444_v57 = vld [vmem:[%s5778_s1 + $0x18c] sm:$0xf]  ;;  %1701 = vmatpush.bf16.msra.mxu0 %v2382_v45  ;;  %v3378_v60 = vor.u32 %v3644_v51, %v3375_v52  ;;  %1714 = vmatpush.bf16.msra.mxu1 %v2638_v49 }
  0x83   :  { %v2575_v58 = vld [vmem:[%s5778_s1 + $0x1a8] sm:$0xf0]  ;;  %1727 = vmatpush.bf16.msra.mxu2 %v2894_v50 }
  0x84   :  { %v3508_v59 = vld [vmem:[%s5778_s1 + $0x38c] sm:$0xf]  ;;  %v2578_v2 = vor.u32 %v3444_v57, %v2575_v58 }
  0x85   :  { %v2831_v61 = vld [vmem:[%s5778_s1 + $0x3a8] sm:$0xf0]  ;;  %1740 = vmatpush.bf16.msra.mxu3 %v3150_v53  ;;  %1702 = vmatmul.bf16.vlgmr.msra.gmra.mxu0 %v4016_v15 }
  0x86   :  { %v3572_v62 = vld [vmem:[%s5778_s1 + $0x58c] sm:$0xf]  ;;  %1746 = vmatpush.bf16.msrb.mxu0 %v2610_v54  ;;  %1759 = vmatpush.bf16.msrb.mxu1 %v2866_v55  ;;  %v2834_v3 = vor.u32 %v3508_v59, %v2831_v61 }
  0x87   :  { %v3087_v63 = vld [vmem:[%s5778_s1 + $0x5a8] sm:$0xf0]  ;;  %1772 = vmatpush.bf16.msrb.mxu2 %v3122_v56  ;;  %1715 = vmatmul.bf16.vlgmr.msra.gmra.mxu1 %v4021_v18 }
  0x88   :  { %v3636_v0 = vld [vmem:[%s5778_s1 + $0x78c] sm:$0xf]  ;;  %v3090_v4 = vor.u32 %v3572_v62, %v3087_v63  ;;  %1728 = vmatmul.bf16.vlgmr.msra.gmra.mxu2 %v4014_v14  ;;  %1741 = vmatmul.bf16.vlgmr.msra.gmra.mxu3 %v4019_v17 }
  0x89   :  { %v3343_v1 = vld [vmem:[%s5778_s1 + $0x7a8] sm:$0xf0]  ;;  %1785 = vmatpush.bf16.msrb.mxu3 %v3378_v60 }
  0x8a   :  { %v3436_v5 = vld [vmem:[%s5778_s1 + $0x14c] sm:$0xf]  ;;  %v3346_v8 = vor.u32 %v3636_v0, %v3343_v1  ;;  %1747 = vmatpush.bf16.msrb.mxu0 %v2578_v2  ;;  %1760 = vmatpush.bf16.msrb.mxu1 %v2834_v3 }
  0x8b   :  { %v2543_v6 = vld [vmem:[%s5778_s1 + $0x168] sm:$0xf0]  ;;  %1773 = vmatpush.bf16.msrb.mxu2 %v3090_v4 }
  0x8c   :  { %v3500_v7 = vld [vmem:[%s5778_s1 + $0x34c] sm:$0xf]  ;;  %v2546_v16 = vor.u32 %v3436_v5, %v2543_v6 }
  0x8d   :  { %v2799_v9 = vld [vmem:[%s5778_s1 + $0x368] sm:$0xf0]  ;;  %1786 = vmatpush.bf16.msrb.mxu3 %v3346_v8 }
  0x8e   :  { %v3564_v10 = vld [vmem:[%s5778_s1 + $0x54c] sm:$0xf]  ;;  %v2802_v19 = vor.u32 %v3500_v7, %v2799_v9  ;;  %1748 = vmatpush.bf16.msrb.mxu0 %v2546_v16  ;;  %v2613_v16 = vld [vmem:[%s5778_s1 + $0x1d0] sm:$0xf] }
  0x8f   :  { %v3055_v11 = vld [vmem:[%s5778_s1 + $0x568] sm:$0xf0] }
  0x90   :  { %v3628_v12 = vld [vmem:[%s5778_s1 + $0x74c] sm:$0xf]  ;;  %v3058_v20 = vor.u32 %v3564_v10, %v3055_v11  ;;  %1761 = vmatpush.bf16.msrb.mxu1 %v2802_v19  ;;  %v3457_v19 = vld [vmem:[%s5778_s1 + $0x1ec] sm:$0xf0] }
  0x91   :  { %v3311_v13 = vld [vmem:[%s5778_s1 + $0x768] sm:$0xf0] }
  0x92   :  { %v3428_v21 = vld [vmem:[%s5778_s1 + $0x10c] sm:$0xf]  ;;  %v3314_v24 = vor.u32 %v3628_v12, %v3311_v13  ;;  %1774 = vmatpush.bf16.msrb.mxu2 %v3058_v20  ;;  %v2869_v20 = vld [vmem:[%s5778_s1 + $0x3d0] sm:$0xf] }
  0x93   :  { %v2511_v22 = vld [vmem:[%s5778_s1 + $0x128] sm:$0xf0] }
  0x94   :  { %v3492_v23 = vld [vmem:[%s5778_s1 + $0x30c] sm:$0xf]  ;;  %v2514_v30 = vor.u32 %v3428_v21, %v2511_v22  ;;  %1787 = vmatpush.bf16.msrb.mxu3 %v3314_v24  ;;  %v3521_v22 = vld [vmem:[%s5778_s1 + $0x3ec] sm:$0xf0] }
  0x95   :  { %v2767_v25 = vld [vmem:[%s5778_s1 + $0x328] sm:$0xf0]  ;;  %v3585_v24 = vld [vmem:[%s5778_s1 + $0x5ec] sm:$0xf0] }
  0x96   :  { %v3556_v26 = vld [vmem:[%s5778_s1 + $0x50c] sm:$0xf]  ;;  %v2770_v31 = vor.u32 %v3492_v23, %v2767_v25  ;;  %1749 = vmatpush.bf16.msrb.mxu0 %v2514_v30  ;;  %v3125_v23 = vld [vmem:[%s5778_s1 + $0x5d0] sm:$0xf]  ;;  %v2614_v30 = vor.u32 %v3457_v19, %v2613_v16 }
  0x97   :  { %v3023_v27 = vld [vmem:[%s5778_s1 + $0x528] sm:$0xf0]  ;;  %v3417_v16 = vld [vmem:[%s5778_s1 + $0xac] sm:$0xf0] }
  0x98   :  { %v3620_v28 = vld [vmem:[%s5778_s1 + $0x70c] sm:$0xf]  ;;  %v3026_v32 = vor.u32 %v3556_v26, %v3023_v27  ;;  %1762 = vmatpush.bf16.msrb.mxu1 %v2770_v31  ;;  %v3381_v27 = vld [vmem:[%s5778_s1 + $0x7d0] sm:$0xf]  ;;  %v2870_v31 = vor.u32 %v3521_v22, %v2869_v20 }
  0x99   :  { %v3279_v29 = vld [vmem:[%s5778_s1 + $0x728] sm:$0xf0]  ;;  %v2709_v19 = vld [vmem:[%s5778_s1 + $0x290] sm:$0xf] }
  0x9a   :  { %v3420_v33 = vld [vmem:[%s5778_s1 + $0xcc] sm:$0xf]  ;;  %v3282_v36 = vor.u32 %v3620_v28, %v3279_v29  ;;  %1775 = vmatpush.bf16.msrb.mxu2 %v3026_v32  ;;  %v3649_v28 = vld [vmem:[%s5778_s1 + $0x7ec] sm:$0xf0]  ;;  %v3126_v32 = vor.u32 %v3585_v24, %v3125_v23 }
  0x9b   :  { %v2479_v34 = vld [vmem:[%s5778_s1 + $0xe8] sm:$0xf0]  ;;  %v2965_v22 = vld [vmem:[%s5778_s1 + $0x490] sm:$0xf] }
  0x9c   :  { %v3484_v35 = vld [vmem:[%s5778_s1 + $0x2cc] sm:$0xf]  ;;  %v2482_v42 = vor.u32 %v3420_v33, %v2479_v34  ;;  %1788 = vmatpush.bf16.msrb.mxu3 %v3282_v36  ;;  %v2581_v33 = vld [vmem:[%s5778_s1 + $0x190] sm:$0xf]  ;;  %v3382_v36 = vor.u32 %v3649_v28, %v3381_v27 }
  0x9d   :  { %v2735_v37 = vld [vmem:[%s5778_s1 + $0x2e8] sm:$0xf0]  ;;  %v3449_v34 = vld [vmem:[%s5778_s1 + $0x1ac] sm:$0xf0] }
  0x9e   :  { %v3548_v38 = vld [vmem:[%s5778_s1 + $0x4cc] sm:$0xf]  ;;  %v2738_v43 = vor.u32 %v3484_v35, %v2735_v37  ;;  %1750 = vmatpush.bf16.msrb.mxu0 %v2482_v42  ;;  %v2837_v35 = vld [vmem:[%s5778_s1 + $0x390] sm:$0xf]  ;;  %v2582_v42 = vor.u32 %v3449_v34, %v2581_v33 }
  0x9f   :  { %v2991_v39 = vld [vmem:[%s5778_s1 + $0x4e8] sm:$0xf0]  ;;  %v3513_v37 = vld [vmem:[%s5778_s1 + $0x3ac] sm:$0xf0] }
  0xa0   :  { %v3612_v40 = vld [vmem:[%s5778_s1 + $0x6cc] sm:$0xf]  ;;  %v2994_v44 = vor.u32 %v3548_v38, %v2991_v39  ;;  %1763 = vmatpush.bf16.msrb.mxu1 %v2738_v43  ;;  %v3093_v38 = vld [vmem:[%s5778_s1 + $0x590] sm:$0xf]  ;;  %v2838_v43 = vor.u32 %v3513_v37, %v2837_v35 }
  0xa1   :  { %v3247_v41 = vld [vmem:[%s5778_s1 + $0x6e8] sm:$0xf0]  ;;  %v3577_v39 = vld [vmem:[%s5778_s1 + $0x5ac] sm:$0xf0] }
  0xa2   :  { %v3412_v45 = vld [vmem:[%s5778_s1 + $0x8c] sm:$0xf]  ;;  %v3250_v48 = vor.u32 %v3612_v40, %v3247_v41  ;;  %1776 = vmatpush.bf16.msrb.mxu2 %v2994_v44  ;;  %v3349_v40 = vld [vmem:[%s5778_s1 + $0x790] sm:$0xf]  ;;  %v3094_v44 = vor.u32 %v3577_v39, %v3093_v38 }
  0xa3   :  { %v2447_v46 = vld [vmem:[%s5778_s1 + $0xa8] sm:$0xf0]  ;;  %v3641_v41 = vld [vmem:[%s5778_s1 + $0x7ac] sm:$0xf0] }
  0xa4   :  { %v3476_v47 = vld [vmem:[%s5778_s1 + $0x28c] sm:$0xf]  ;;  %v2450_v54 = vor.u32 %v3412_v45, %v2447_v46  ;;  %1789 = vmatpush.bf16.msrb.mxu3 %v3250_v48  ;;  %v2549_v45 = vld [vmem:[%s5778_s1 + $0x150] sm:$0xf]  ;;  %v3350_v48 = vor.u32 %v3641_v41, %v3349_v40 }
  0xa5   :  { %v2703_v49 = vld [vmem:[%s5778_s1 + $0x2a8] sm:$0xf0]  ;;  %v3441_v46 = vld [vmem:[%s5778_s1 + $0x16c] sm:$0xf0] }
  0xa6   :  { %v3540_v50 = vld [vmem:[%s5778_s1 + $0x48c] sm:$0xf]  ;;  %v2706_v55 = vor.u32 %v3476_v47, %v2703_v49  ;;  %1751 = vmatpush.bf16.msrb.mxu0 %v2450_v54  ;;  %v2805_v47 = vld [vmem:[%s5778_s1 + $0x350] sm:$0xf] }
  0xa7   :  { %v2959_v51 = vld [vmem:[%s5778_s1 + $0x4a8] sm:$0xf0]  ;;  %v3505_v49 = vld [vmem:[%s5778_s1 + $0x36c] sm:$0xf0] }
  0xa8   :  { %v3604_v52 = vld [vmem:[%s5778_s1 + $0x68c] sm:$0xf]  ;;  %v2962_v56 = vor.u32 %v3540_v50, %v2959_v51  ;;  %1764 = vmatpush.bf16.msrb.mxu1 %v2706_v55  ;;  %v3061_v50 = vld [vmem:[%s5778_s1 + $0x550] sm:$0xf]  ;;  %v2806_v54 = vor.u32 %v3505_v49, %v2805_v47 }
  0xa9   :  { %v3215_v53 = vld [vmem:[%s5778_s1 + $0x6a8] sm:$0xf0]  ;;  %v3569_v51 = vld [vmem:[%s5778_s1 + $0x56c] sm:$0xf0] }
  0xaa   :  { %v3404_v57 = vld [vmem:[%s5778_s1 + $0x4c] sm:$0xf]  ;;  %v3218_v60 = vor.u32 %v3604_v52, %v3215_v53  ;;  %1777 = vmatpush.bf16.msrb.mxu2 %v2962_v56  ;;  %v3633_v52 = vld [vmem:[%s5778_s1 + $0x76c] sm:$0xf0]  ;;  %v2550_v53 = vor.u32 %v3441_v46, %v2549_v45  ;;  %v3062_v55 = vor.u32 %v3569_v51, %v3061_v50  ;;  %v3453_v50 = vld [vmem:[%s5778_s1 + $0x1d4] sm:$0xf] }
  0xab   :  { %v2415_v58 = vld [vmem:[%s5778_s1 + $0x68] sm:$0xf0]  ;;  %v2773_v56 = vld [vmem:[%s5778_s1 + $0x310] sm:$0xf]  ;;  %v2615_v51 = vld [vmem:[%s5778_s1 + $0x1f0] sm:$0xf0] }
  0xac   :  { %v3468_v59 = vld [vmem:[%s5778_s1 + $0x24c] sm:$0xf]  ;;  %v2418_v2 = vor.u32 %v3404_v57, %v2415_v58  ;;  %1790 = vmatpush.bf16.msrb.mxu3 %v3218_v60  ;;  %v3029_v58 = vld [vmem:[%s5778_s1 + $0x510] sm:$0xf] }
  0xad   :  { %v2671_v61 = vld [vmem:[%s5778_s1 + $0x268] sm:$0xf0]  ;;  %v3285_v60 = vld [vmem:[%s5778_s1 + $0x710] sm:$0xf] }
  0xae   :  { %v3532_v62 = vld [vmem:[%s5778_s1 + $0x44c] sm:$0xf]  ;;  %v2674_v5 = vor.u32 %v3468_v59, %v2671_v61  ;;  %1752 = vmatpush.bf16.msrb.mxu0 %v2418_v2  ;;  %v3561_v59 = vld [vmem:[%s5778_s1 + $0x52c] sm:$0xf0] }
  0xaf   :  { %v2927_v63 = vld [vmem:[%s5778_s1 + $0x468] sm:$0xf0]  ;;  %v3625_v61 = vld [vmem:[%s5778_s1 + $0x72c] sm:$0xf0] }
  0xb0   :  { %v3596_v0 = vld [vmem:[%s5778_s1 + $0x64c] sm:$0xf]  ;;  %v2930_v6 = vor.u32 %v3532_v62, %v2927_v63  ;;  %1765 = vmatpush.bf16.msrb.mxu1 %v2674_v5  ;;  %v3425_v2 = vld [vmem:[%s5778_s1 + $0xec] sm:$0xf0] }
  0xb1   :  { %v3183_v1 = vld [vmem:[%s5778_s1 + $0x668] sm:$0xf0]  ;;  %v3489_v5 = vld [vmem:[%s5778_s1 + $0x2ec] sm:$0xf0] }
  0xb2   :  { %v3396_v3 = vld [vmem:[%s5778_s1 + $0xc] sm:$0xf]  ;;  %v3186_v10 = vor.u32 %v3596_v0, %v3183_v1  ;;  %1778 = vmatpush.bf16.msrb.mxu2 %v2930_v6  ;;  %v3030_v0 = vor.u32 %v3561_v59, %v3029_v58  ;;  %v2485_v1 = vld [vmem:[%s5778_s1 + $0xd0] sm:$0xf]  ;;  %v2618_v58 = vor.u32 %v3453_v50, %v2615_v51  ;;  %v3255_v50 = vld [vmem:[%s5778_s1 + $0x6f0] sm:$0xf0] }
  0xb3   :  { %v2383_v4 = vld [vmem:[%s5778_s1 + $0x28] sm:$0xf0]  ;;  %v2997_v6 = vld [vmem:[%s5778_s1 + $0x4d0] sm:$0xf] }
  0xb4   :  { %v3460_v7 = vld [vmem:[%s5778_s1 + $0x20c] sm:$0xf]  ;;  %v2386_v21 = vor.u32 %v3396_v3, %v2383_v4  ;;  %1791 = vmatpush.bf16.msrb.mxu3 %v3186_v10  ;;  %v2741_v3 = vld [vmem:[%s5778_s1 + $0x2d0] sm:$0xf]  ;;  %v3286_v4 = vor.u32 %v3625_v61, %v3285_v60  ;;  %v2486_v10 = vor.u32 %v3425_v2, %v2485_v1  ;;  %v3445_v61 = vld [vmem:[%s5778_s1 + $0x194] sm:$0xf] }
  0xb5   :  { %v2639_v8 = vld [vmem:[%s5778_s1 + $0x228] sm:$0xf0]  ;;  %v3545_v23 = vld [vmem:[%s5778_s1 + $0x4ac] sm:$0xf0]  ;;  %v2839_v1 = vld [vmem:[%s5778_s1 + $0x3b0] sm:$0xf0] }
  0xb6   :  { %v3524_v9 = vld [vmem:[%s5778_s1 + $0x40c] sm:$0xf]  ;;  %v2642_v25 = vor.u32 %v3460_v7, %v2639_v8  ;;  %1753 = vmatpush.bf16.msrb.mxu0 %v2386_v21  ;;  %v3553_v7 = vld [vmem:[%s5778_s1 + $0x4ec] sm:$0xf0]  ;;  %v2966_v28 = vor.u32 %v3545_v23, %v2965_v22  ;;  %v3573_v2 = vld [vmem:[%s5778_s1 + $0x594] sm:$0xf] }
  0xb7   :  { %v2895_v11 = vld [vmem:[%s5778_s1 + $0x428] sm:$0xf0]  ;;  %v3253_v8 = vld [vmem:[%s5778_s1 + $0x6d0] sm:$0xf]  ;;  %v3319_v22 = vld [vmem:[%s5778_s1 + $0x770] sm:$0xf0] }
  0xb8   :  { %v3588_v12 = vld [vmem:[%s5778_s1 + $0x60c] sm:$0xf]  ;;  %v2898_v26 = vor.u32 %v3524_v9, %v2895_v11  ;;  %1766 = vmatpush.bf16.msrb.mxu1 %v2642_v25  ;;  %v3617_v9 = vld [vmem:[%s5778_s1 + $0x6ec] sm:$0xf0]  ;;  %v2742_v11 = vor.u32 %v3489_v5, %v2741_v3  ;;  %v3095_v3 = vld [vmem:[%s5778_s1 + $0x5b0] sm:$0xf0] }
  0xb9   :  { %v3151_v13 = vld [vmem:[%s5778_s1 + $0x628] sm:$0xf0]  ;;  %1754 = vmatmul.bf16.vlgmr.msrb.gmra.mxu0 %v4016_v15  ;;  %v2517_v15 = vld [vmem:[%s5778_s1 + $0x110] sm:$0xf]  ;;  %v3254_v20 = vor.u32 %v3617_v9, %v3253_v8  ;;  %v3351_v5 = vld [vmem:[%s5778_s1 + $0x7b0] sm:$0xf0]  ;;  %v3098_v8 = vor.u32 %v3573_v2, %v3095_v3 }
  0xba   :  { %v3154_v29 = vor.u32 %v3588_v12, %v3151_v13  ;;  %1779 = vmatpush.bf16.msrb.mxu2 %v2898_v26  ;;  %1798 = vmatpush.bf16.msra.mxu0 %v2614_v30  ;;  %v2998_v12 = vor.u32 %v3553_v7, %v2997_v6  ;;  %v2453_v13 = vld [vmem:[%s5778_s1 + $0x90] sm:$0xf]  ;;  %v3437_v9 = vld [vmem:[%s5778_s1 + $0x154] sm:$0xf]  ;;  %v4785_v23 = vld [vmem:[#allocation1] sm:$0xff] }
  0xbb   :  { %1767 = vmatmul.bf16.vlgmr.msrb.gmra.mxu1 %v4021_v18  ;;  %v3497_v18 = vld [vmem:[%s5778_s1 + $0x32c] sm:$0xf0]  ;;  %v2454_v26 = vor.u32 %v3417_v16, %v2453_v13  ;;  %v2807_v13 = vld [vmem:[%s5778_s1 + $0x370] sm:$0xf0] }
  0xbc   :  { %1792 = vmatpush.bf16.msrb.mxu3 %v3154_v29  ;;  %1811 = vmatpush.bf16.msra.mxu1 %v2870_v31  ;;  %v2774_v63 = vor.u32 %v3497_v18, %v2773_v56  ;;  %v3481_v21 = vld [vmem:[%s5778_s1 + $0x2ac] sm:$0xf0]  ;;  %v3645_v56 = vld [vmem:[%s5778_s1 + $0x7d4] sm:$0xf] }
  0xbd   :  { %1780 = vmatmul.bf16.vlgmr.msrb.gmra.mxu2 %v4014_v14  ;;  %v3317_v14 = vld [vmem:[%s5778_s1 + $0x750] sm:$0xf]  ;;  %v2710_v27 = vor.u32 %v3481_v21, %v2709_v19  ;;  %v3565_v16 = vld [vmem:[%s5778_s1 + $0x554] sm:$0xf] }
  0xbe   :  { %1824 = vmatpush.bf16.msra.mxu2 %v3126_v32  ;;  %1799 = vmatpush.bf16.msra.mxu0 %v2582_v42  ;;  %v3318_v57 = vor.u32 %v3633_v52, %v3317_v14  ;;  %v3221_v24 = vld [vmem:[%s5778_s1 + $0x690] sm:$0xf]  ;;  %v3517_v14 = vld [vmem:[%s5778_s1 + $0x3d4] sm:$0xf] }
  0xbf   :  { %1793 = vmatmul.bf16.vlgmr.msrb.gmra.mxu3 %v4019_v17  ;;  %v3433_v17 = vld [vmem:[%s5778_s1 + $0x12c] sm:$0xf0]  ;;  %v3063_v19 = vld [vmem:[%s5778_s1 + $0x570] sm:$0xf0] }
  0xc0   :  { %1837 = vmatpush.bf16.msra.mxu3 %v3382_v36  ;;  %1812 = vmatpush.bf16.msra.mxu1 %v2838_v43  ;;  %v2518_v62 = vor.u32 %v3433_v17, %v2517_v15  ;;  %v3609_v25 = vld [vmem:[%s5778_s1 + $0x6ac] sm:$0xf0]  ;;  %v3629_v21 = vld [vmem:[%s5778_s1 + $0x754] sm:$0xf] }
  0xc1   :  { %v2421_v29 = vld [vmem:[%s5778_s1 + $0x50] sm:$0xf]  ;;  %v3222_v32 = vor.u32 %v3609_v25, %v3221_v24  ;;  %v4788_v24 = vld [vmem:[#allocation1 + $0x1b] sm:$0xff]  ;;  %v3405_v2 = vld [vmem:[%s5778_s1 + $0x54] sm:$0xf] }
  0xc2   :  { %1825 = vmatpush.bf16.msra.mxu2 %v3094_v44  ;;  %1800 = vmatpush.bf16.msra.mxu0 %v2550_v53  ;;  %v3409_v30 = vld [vmem:[%s5778_s1 + $0x6c] sm:$0xf0]  ;;  %v2871_v53 = vld [vmem:[%s5778_s1 + $0x3f0] sm:$0xf0] }
  0xc3   :  { %v2677_v31 = vld [vmem:[%s5778_s1 + $0x250] sm:$0xf]  ;;  %v2422_v38 = vor.u32 %v3409_v30, %v2421_v29  ;;  %v2874_v59 = vor.u32 %v3517_v14, %v2871_v53  ;;  %v3429_v29 = vld [vmem:[%s5778_s1 + $0x114] sm:$0xf] }
  0xc4   :  { %1838 = vmatpush.bf16.msra.mxu3 %v3350_v48  ;;  %1813 = vmatpush.bf16.msra.mxu1 %v2806_v54  ;;  %v3473_v33 = vld [vmem:[%s5778_s1 + $0x26c] sm:$0xf0]  ;;  %v3581_v54 = vld [vmem:[%s5778_s1 + $0x5d4] sm:$0xf] }
  0xc5   :  { %v2933_v34 = vld [vmem:[%s5778_s1 + $0x450] sm:$0xf]  ;;  %v2678_v41 = vor.u32 %v3473_v33, %v2677_v31  ;;  %v2519_v30 = vld [vmem:[%s5778_s1 + $0x130] sm:$0xf0] }
  0xc6   :  { %1826 = vmatpush.bf16.msra.mxu2 %v3062_v55  ;;  %1801 = vmatpush.bf16.msra.mxu0 %v2518_v62  ;;  %v3537_v35 = vld [vmem:[%s5778_s1 + $0x46c] sm:$0xf0]  ;;  %v3127_v55 = vld [vmem:[%s5778_s1 + $0x5f0] sm:$0xf0] }
  0xc7   :  { %v3189_v36 = vld [vmem:[%s5778_s1 + $0x650] sm:$0xf]  ;;  %v2934_v42 = vor.u32 %v3537_v35, %v2933_v34  ;;  %v3130_v60 = vor.u32 %v3581_v54, %v3127_v55  ;;  %v2583_v62 = vld [vmem:[%s5778_s1 + $0x1b0] sm:$0xf0] }
  0xc8   :  { %1839 = vmatpush.bf16.msra.mxu3 %v3318_v57  ;;  %1814 = vmatpush.bf16.msra.mxu1 %v2774_v63  ;;  %v3601_v37 = vld [vmem:[%s5778_s1 + $0x66c] sm:$0xf0]  ;;  %v3383_v57 = vld [vmem:[%s5778_s1 + $0x7f0] sm:$0xf0]  ;;  %v2586_v6 = vor.u32 %v3445_v61, %v2583_v62 }
  0xc9   :  { %v2389_v39 = vld [vmem:[%s5778_s1 + $0x10] sm:$0xf]  ;;  %v3190_v46 = vor.u32 %v3601_v37, %v3189_v36  ;;  %v3509_v63 = vld [vmem:[%s5778_s1 + $0x394] sm:$0xf] }
  0xca   :  { %1827 = vmatpush.bf16.msra.mxu2 %v3030_v0  ;;  %1802 = vmatpush.bf16.msra.mxu0 %v2486_v10  ;;  %v3401_v40 = vld [vmem:[%s5778_s1 + $0x2c] sm:$0xf0]  ;;  %v3386_v0 = vor.u32 %v3645_v56, %v3383_v57  ;;  %v2842_v7 = vor.u32 %v3509_v63, %v2839_v1  ;;  %v2551_v10 = vld [vmem:[%s5778_s1 + $0x170] sm:$0xf0] }
  0xcb   :  { %v2645_v43 = vld [vmem:[%s5778_s1 + $0x210] sm:$0xf]  ;;  %v2390_v52 = vor.u32 %v3401_v40, %v2389_v39  ;;  %v2554_v25 = vor.u32 %v3437_v9, %v2551_v10  ;;  %v3493_v31 = vld [vmem:[%s5778_s1 + $0x314] sm:$0xf]  ;;  %v1612_v63 = vpop.f32.mrf.mxu1 }
  0xcc   :  { %1840 = vmatpush.bf16.msra.mxu3 %v3286_v4  ;;  %1815 = vmatpush.bf16.msra.mxu1 %v2742_v11  ;;  %v3465_v44 = vld [vmem:[%s5778_s1 + $0x22c] sm:$0xf0]  ;;  %v3637_v4 = vld [vmem:[%s5778_s1 + $0x794] sm:$0xf] }
  0xcd   :  { %v2901_v45 = vld [vmem:[%s5778_s1 + $0x410] sm:$0xf]  ;;  %v2646_v15 = vor.u32 %v3465_v44, %v2645_v43  ;;  %v3501_v11 = vld [vmem:[%s5778_s1 + $0x354] sm:$0xf]  ;;  %v4830_v44 = vld [vmem:[%s5779_s2] sm:$0xff] }
  0xce   :  { %1828 = vmatpush.bf16.msra.mxu2 %v2998_v12  ;;  %1803 = vmatpush.bf16.msra.mxu0 %v2454_v26  ;;  %v3529_v47 = vld [vmem:[%s5778_s1 + $0x42c] sm:$0xf0]  ;;  %v3354_v12 = vor.u32 %v3637_v4, %v3351_v5  ;;  %v2775_v33 = vld [vmem:[%s5778_s1 + $0x330] sm:$0xf0]  ;;  %v284_v14 = vperm.slane %v4830_v44, 0 }
  0xcf   :  { %v3157_v48 = vld [vmem:[%s5778_s1 + $0x610] sm:$0xf]  ;;  %v2902_v17 = vor.u32 %v3529_v47, %v2901_v45  ;;  %v3557_v34 = vld [vmem:[%s5778_s1 + $0x514] sm:$0xf]  ;;  %v2778_v40 = vor.u32 %v3493_v31, %v2775_v33 }
  0xd0   :  { %1841 = vmatpush.bf16.msra.mxu3 %v3254_v20  ;;  %1816 = vmatpush.bf16.msra.mxu1 %v2710_v27  ;;  %v3593_v49 = vld [vmem:[%s5778_s1 + $0x62c] sm:$0xf0]  ;;  %v2810_v27 = vor.u32 %v3501_v11, %v2807_v13  ;;  %v3031_v35 = vld [vmem:[%s5778_s1 + $0x530] sm:$0xf0] }
  0xd1   :  { %v3158_v18 = vor.u32 %v3593_v49, %v3157_v48  ;;  %v4776_v20 = vld [vmem:[#allocation1 + $0x12] sm:$0xff]  ;;  %v4791_v26 = vld [vmem:[#allocation1 + $0x9] sm:$0xff] }
  0xd2   :  { %1829 = vmatpush.bf16.msra.mxu2 %v2966_v28  ;;  %1804 = vmatpush.bf16.msra.mxu0 %v2422_v38  ;;  %v3066_v28 = vor.u32 %v3565_v16, %v3063_v19  ;;  %v3621_v36 = vld [vmem:[%s5778_s1 + $0x714] sm:$0xf]  ;;  %v2522_v38 = vor.u32 %v3429_v29, %v2519_v30 }
  0xd3   :  { %v3287_v37 = vld [vmem:[%s5778_s1 + $0x730] sm:$0xf0] }
  0xd4   :  { %1842 = vmatpush.bf16.msra.mxu3 %v3222_v32  ;;  %1817 = vmatpush.bf16.msra.mxu1 %v2678_v41  ;;  %v3322_v32 = vor.u32 %v3629_v21, %v3319_v22  ;;  %v3421_v39 = vld [vmem:[%s5778_s1 + $0xd4] sm:$0xf]  ;;  %v3034_v41 = vor.u32 %v3557_v34, %v3031_v35  ;;  %v3290_v45 = vor.u32 %v3621_v36, %v3287_v37  ;;  %v1638_v34 = vpop.f32.mrf.mxu3  ;;  %v2621_v35 = vld [vmem:[%s5778_s1 + $0x1d8] sm:$0xf] }
  0xd5   :  { %v3485_v43 = vld [vmem:[%s5778_s1 + $0x2d4] sm:$0xf]  ;;  %v3458_v36 = vld [vmem:[%s5778_s1 + $0x1f4] sm:$0xf0] }
  0xd6   :  { %1830 = vmatpush.bf16.msra.mxu2 %v2934_v42  ;;  %1805 = vmatpush.bf16.msra.mxu0 %v2390_v52  ;;  %v2487_v42 = vld [vmem:[%s5778_s1 + $0xf0] sm:$0xf0]  ;;  %v2877_v37 = vld [vmem:[%s5778_s1 + $0x3d8] sm:$0xf] }
  0xd7   :  { %v3549_v47 = vld [vmem:[%s5778_s1 + $0x4d4] sm:$0xf]  ;;  %v2490_v51 = vor.u32 %v3421_v39, %v2487_v42  ;;  %v3133_v42 = vld [vmem:[%s5778_s1 + $0x5d8] sm:$0xf] }
  0xd8   :  { %1843 = vmatpush.bf16.msra.mxu3 %v3190_v46  ;;  %1818 = vmatpush.bf16.msra.mxu1 %v2646_v15  ;;  %v2743_v46 = vld [vmem:[%s5778_s1 + $0x2f0] sm:$0xf0] }
  0xd9   :  { %1806 = vmatmul.bf16.vlgmr.msra.gmra.mxu0 %v4785_v23  ;;  %v2999_v48 = vld [vmem:[%s5778_s1 + $0x4f0] sm:$0xf0]  ;;  %v2746_v52 = vor.u32 %v3485_v43, %v2743_v46  ;;  %v3586_v43 = vld [vmem:[%s5778_s1 + $0x5f4] sm:$0xf0] }
  0xda   :  { %1831 = vmatpush.bf16.msra.mxu2 %v2902_v17  ;;  %1850 = vmatpush.bf16.msrb.mxu0 %v2618_v58  ;;  %v3613_v49 = vld [vmem:[%s5778_s1 + $0x6d4] sm:$0xf]  ;;  %v3002_v53 = vor.u32 %v3549_v47, %v2999_v48  ;;  %v3389_v48 = vld [vmem:[%s5778_s1 + $0x7d8] sm:$0xf] }
  0xdb   :  { %1819 = vmatmul.bf16.vlgmr.msra.gmra.mxu1 %v4791_v26  ;;  %v3413_v54 = vld [vmem:[%s5778_s1 + $0x94] sm:$0xf]  ;;  %v3258_v17 = vor.u32 %v3613_v49, %v3255_v50  ;;  %v3650_v49 = vld [vmem:[%s5778_s1 + $0x7f4] sm:$0xf0] }
  0xdc   :  { %1844 = vmatpush.bf16.msra.mxu3 %v3158_v18  ;;  %1863 = vmatpush.bf16.msrb.mxu1 %v2874_v59  ;;  %v2455_v55 = vld [vmem:[%s5778_s1 + $0xb0] sm:$0xf0] }
  0xdd   :  { %1832 = vmatmul.bf16.vlgmr.msra.gmra.mxu2 %v4776_v20  ;;  %v3477_v15 = vld [vmem:[%s5778_s1 + $0x294] sm:$0xf]  ;;  %v2458_v61 = vor.u32 %v3413_v54, %v2455_v55  ;;  %v3450_v54 = vld [vmem:[%s5778_s1 + $0x1b4] sm:$0xf0] }
  0xde   :  { %1876 = vmatpush.bf16.msrb.mxu2 %v3130_v60  ;;  %1851 = vmatpush.bf16.msrb.mxu0 %v2586_v6  ;;  %v2711_v56 = vld [vmem:[%s5778_s1 + $0x2b0] sm:$0xf0]  ;;  %v1599_v60 = vpop.f32.mrf.mxu0  ;;  %v2845_v55 = vld [vmem:[%s5778_s1 + $0x398] sm:$0xf] }
  0xdf   :  { %1845 = vmatmul.bf16.vlgmr.msra.gmra.mxu3 %v4788_v24  ;;  %v3541_v57 = vld [vmem:[%s5778_s1 + $0x494] sm:$0xf]  ;;  %v1600_v62 = vadd.f32 %v1599_v60, %v284_v14 }
  0xe0   :  { %1889 = vmatpush.bf16.msrb.mxu3 %v3386_v0  ;;  %1864 = vmatpush.bf16.msrb.mxu1 %v2842_v7  ;;  %v2967_v18 = vld [vmem:[%s5778_s1 + $0x4b0] sm:$0xf0]  ;;  %v2714_v0 = vor.u32 %v3477_v15, %v2711_v56  ;;  %v3514_v56 = vld [vmem:[%s5778_s1 + $0x3b4] sm:$0xf0] }
  0xe1   :  { %v3605_v58 = vld [vmem:[%s5778_s1 + $0x694] sm:$0xf]  ;;  %v2970_v1 = vor.u32 %v3541_v57, %v2967_v18  ;;  %v1613_v9 = vadd.f32 %v1612_v63, %v1600_v62  ;;  %v3101_v57 = vld [vmem:[%s5778_s1 + $0x598] sm:$0xf]  ;;  %v2846_v62 = vor.u32 %v3514_v56, %v2845_v55 }
  0xe2   :  { %1877 = vmatpush.bf16.msrb.mxu2 %v3098_v8  ;;  %1852 = vmatpush.bf16.msrb.mxu0 %v2554_v25  ;;  %v3223_v59 = vld [vmem:[%s5778_s1 + $0x6b0] sm:$0xf0]  ;;  %v3578_v18 = vld [vmem:[%s5778_s1 + $0x5b4] sm:$0xf0] }
  0xe3   :  { %v2423_v3 = vld [vmem:[%s5778_s1 + $0x70] sm:$0xf0]  ;;  %v3226_v5 = vor.u32 %v3605_v58, %v3223_v59  ;;  %v3357_v58 = vld [vmem:[%s5778_s1 + $0x798] sm:$0xf]  ;;  %v3102_v63 = vor.u32 %v3578_v18, %v3101_v57 }
  0xe4   :  { %1890 = vmatpush.bf16.msrb.mxu3 %v3354_v12  ;;  %1865 = vmatpush.bf16.msrb.mxu1 %v2810_v27  ;;  %v3469_v4 = vld [vmem:[%s5778_s1 + $0x254] sm:$0xf]  ;;  %v1625_v12 = vpop.f32.mrf.mxu2  ;;  %v2426_v13 = vor.u32 %v3405_v2, %v2423_v3  ;;  %v3642_v59 = vld [vmem:[%s5778_s1 + $0x7b4] sm:$0xf0] }
  0xe5   :  { %v2679_v6 = vld [vmem:[%s5778_s1 + $0x270] sm:$0xf0]  ;;  %v1626_v21 = vadd.f32 %v1625_v12, %v1613_v9  ;;  %v2813_v2 = vld [vmem:[%s5778_s1 + $0x358] sm:$0xf]  ;;  %v3358_v3 = vor.u32 %v3642_v59, %v3357_v58 }
  0xe6   :  { %1878 = vmatpush.bf16.msrb.mxu2 %v3066_v28  ;;  %1853 = vmatpush.bf16.msrb.mxu0 %v2522_v38  ;;  %v3533_v7 = vld [vmem:[%s5778_s1 + $0x454] sm:$0xf]  ;;  %v2682_v22 = vor.u32 %v3469_v4, %v2679_v6  ;;  %v1601_v39 = vpop.f32.mrf.mxu0  ;;  %v3506_v4 = vld [vmem:[%s5778_s1 + $0x374] sm:$0xf0] }
  0xe7   :  { %v2935_v8 = vld [vmem:[%s5778_s1 + $0x470] sm:$0xf0]  ;;  %v4929_v38 = vadd.f32 %v1638_v34, %v1626_v21  ;;  %v3570_v6 = vld [vmem:[%s5778_s1 + $0x574] sm:$0xf0] }
  0xe8   :  { %1891 = vmatpush.bf16.msrb.mxu3 %v3322_v32  ;;  %1866 = vmatpush.bf16.msrb.mxu1 %v2778_v40  ;;  %v3597_v10 = vld [vmem:[%s5778_s1 + $0x654] sm:$0xf]  ;;  %v2938_v25 = vor.u32 %v3533_v7, %v2935_v8  ;;  %v3325_v7 = vld [vmem:[%s5778_s1 + $0x758] sm:$0xf] }
  0xe9   :  { %v3191_v11 = vld [vmem:[%s5778_s1 + $0x670] sm:$0xf0]  ;;  %v3634_v8 = vld [vmem:[%s5778_s1 + $0x774] sm:$0xf0]  ;;  %vm2006_vm3 = vcmp.gt.f32.partialorder %v4929_v38, 0.0 }
  0xea   :  { %1879 = vmatpush.bf16.msrb.mxu2 %v3034_v41  ;;  %1854 = vmatpush.bf16.msrb.mxu0 %v2490_v51  ;;  %v3397_v16 = vld [vmem:[%s5778_s1 + $0x14] sm:$0xf]  ;;  %v3194_v30 = vor.u32 %v3597_v10, %v3191_v11  ;;  %v3522_v41 = vld [vmem:[%s5778_s1 + $0x3f4] sm:$0xf0]  ;;  %v2622_v51 = vor.u32 %v3458_v36, %v2621_v35  ;;  %v2814_v10 = vor.u32 %v3506_v4, %v2813_v2 }
  0xeb   :  { %v2391_v19 = vld [vmem:[%s5778_s1 + $0x30] sm:$0xf0]  ;;  %v2878_v14 = vor.u32 %v3522_v41, %v2877_v37  ;;  %v2525_v12 = vld [vmem:[%s5778_s1 + $0x118] sm:$0xf] }
  0xec   :  { %1892 = vmatpush.bf16.msrb.mxu3 %v3290_v45  ;;  %1867 = vmatpush.bf16.msrb.mxu1 %v2746_v52  ;;  %v3461_v27 = vld [vmem:[%s5778_s1 + $0x214] sm:$0xf]  ;;  %v2394_v40 = vor.u32 %v3397_v16, %v2391_v19  ;;  %v1614_v45 = vpop.f32.mrf.mxu1  ;;  %v3134_v52 = vor.u32 %v3586_v43, %v3133_v42  ;;  %v1627_v15 = vpop.f32.mrf.mxu2  ;;  %v2781_v16 = vld [vmem:[%s5778_s1 + $0x318] sm:$0xf]  ;;  %v3326_v19 = vor.u32 %v3634_v8, %v3325_v7 }
  0xed   :  { %v2647_v28 = vld [vmem:[%s5778_s1 + $0x230] sm:$0xf0]  ;;  %v3498_v21 = vld [vmem:[%s5778_s1 + $0x334] sm:$0xf0] }
  0xee   :  { %1880 = vmatpush.bf16.msrb.mxu2 %v3002_v53  ;;  %1855 = vmatpush.bf16.msrb.mxu0 %v2458_v61  ;;  %v3525_v29 = vld [vmem:[%s5778_s1 + $0x414] sm:$0xf]  ;;  %v2650_v46 = vor.u32 %v3461_v27, %v2647_v28  ;;  %v2589_v53 = vld [vmem:[%s5778_s1 + $0x198] sm:$0xf]  ;;  %v1640_v61 = vpop.f32.mrf.mxu3 }
  0xef   :  { %v2903_v31 = vld [vmem:[%s5778_s1 + $0x430] sm:$0xf0]  ;;  %v2590_v60 = vor.u32 %v3450_v54, %v2589_v53  ;;  %v3293_v27 = vld [vmem:[%s5778_s1 + $0x718] sm:$0xf] }
  0xf0   :  { %1893 = vmatpush.bf16.msrb.mxu3 %v3258_v17  ;;  %1868 = vmatpush.bf16.msrb.mxu1 %v2714_v0  ;;  %v3589_v32 = vld [vmem:[%s5778_s1 + $0x614] sm:$0xf]  ;;  %v2906_v47 = vor.u32 %v3525_v29, %v2903_v31  ;;  %v3390_v17 = vor.u32 %v3650_v49, %v3389_v48  ;;  %v2557_v0 = vld [vmem:[%s5778_s1 + $0x158] sm:$0xf]  ;;  %v2782_v31 = vor.u32 %v3498_v21, %v2781_v16 }
  0xf1   :  { %v3159_v33 = vld [vmem:[%s5778_s1 + $0x630] sm:$0xf0]  ;;  %v3626_v28 = vld [vmem:[%s5778_s1 + $0x734] sm:$0xf0] }
  0xf2   :  { %1881 = vmatpush.bf16.msrb.mxu2 %v2970_v1  ;;  %1856 = vmatpush.bf16.msrb.mxu0 %v2426_v13  ;;  %v3162_v50 = vor.u32 %v3589_v32, %v3159_v33  ;;  %v3442_v1 = vld [vmem:[%s5778_s1 + $0x174] sm:$0xf0]  ;;  %v3294_v37 = vor.u32 %v3626_v28, %v3293_v27  ;;  %v3454_v27 = vld [vmem:[%s5778_s1 + $0x1dc] sm:$0xf] }
  0xf3   :  { %v2558_v9 = vor.u32 %v3442_v1, %v2557_v0  ;;  %v3434_v13 = vld [vmem:[%s5778_s1 + $0x134] sm:$0xf0]  ;;  %v2623_v28 = vld [vmem:[%s5778_s1 + $0x1f8] sm:$0xf0] }
  0xf4   :  { %1894 = vmatpush.bf16.msrb.mxu3 %v3226_v5  ;;  %1869 = vmatpush.bf16.msrb.mxu1 %v2682_v22  ;;  %v3069_v5 = vld [vmem:[%s5778_s1 + $0x558] sm:$0xf]  ;;  %v2526_v29 = vor.u32 %v3434_v13, %v2525_v12  ;;  %v5024_v33 = vpop.f32.mrf.mxu1  ;;  %v5050_v48 = vpop.f32.mrf.mxu2 }
  0xf5   :  { %v3070_v11 = vor.u32 %v3570_v6, %v3069_v5  ;;  %v3037_v22 = vld [vmem:[%s5778_s1 + $0x518] sm:$0xf] }
  0xf6   :  { %1882 = vmatpush.bf16.msrb.mxu2 %v2938_v25  ;;  %1857 = vmatpush.bf16.msrb.mxu0 %v2394_v40  ;;  %v3562_v25 = vld [vmem:[%s5778_s1 + $0x534] sm:$0xf0] }
  0xf7   :  { %v3038_v32 = vor.u32 %v3562_v25, %v3037_v22  ;;  %v2493_v34 = vld [vmem:[%s5778_s1 + $0xd8] sm:$0xf] }
  0xf8   :  { %1895 = vmatpush.bf16.msrb.mxu3 %v3194_v30  ;;  %1870 = vmatpush.bf16.msrb.mxu1 %v2650_v46  ;;  %v5022_v30 = vpop.f32.mrf.mxu0  ;;  %v3426_v35 = vld [vmem:[%s5778_s1 + $0xf4] sm:$0xf0] }
  0xf9   :  { %1858 = vmatmul.bf16.vlgmr.msrb.gmra.mxu0 %v4785_v23  ;;  %v2749_v36 = vld [vmem:[%s5778_s1 + $0x2d8] sm:$0xf]  ;;  %v2494_v45 = vor.u32 %v3426_v35, %v2493_v34  ;;  %v3582_v34 = vld [vmem:[%s5778_s1 + $0x5dc] sm:$0xf] }
  0xfa   :  { %1883 = vmatpush.bf16.msrb.mxu2 %v2906_v47  ;;  %1902 = vmatpush.bf16.msra.mxu0 %v2622_v51  ;;  %v3490_v39 = vld [vmem:[%s5778_s1 + $0x2f4] sm:$0xf0]  ;;  %v3135_v35 = vld [vmem:[%s5778_s1 + $0x5f8] sm:$0xf0] }
  0xfb   :  { %1871 = vmatmul.bf16.vlgmr.msrb.gmra.mxu1 %v4791_v26  ;;  %v3005_v40 = vld [vmem:[%s5778_s1 + $0x4d8] sm:$0xf]  ;;  %v2750_v46 = vor.u32 %v3490_v39, %v2749_v36  ;;  %v3646_v39 = vld [vmem:[%s5778_s1 + $0x7dc] sm:$0xf] }
  0xfc   :  { %1896 = vmatpush.bf16.msrb.mxu3 %v3162_v50  ;;  %1915 = vmatpush.bf16.msra.mxu1 %v2878_v14  ;;  %v3554_v41 = vld [vmem:[%s5778_s1 + $0x4f4] sm:$0xf0]  ;;  %v1679_v13 = vpop.f32.mrf.mxu2 }
  0xfd   :  { %1884 = vmatmul.bf16.vlgmr.msrb.gmra.mxu2 %v4776_v20  ;;  %v3261_v42 = vld [vmem:[%s5778_s1 + $0x6d8] sm:$0xf]  ;;  %v3006_v47 = vor.u32 %v3554_v41, %v3005_v40  ;;  %v3391_v40 = vld [vmem:[%s5778_s1 + $0x7f8] sm:$0xf0] }
  0xfe   :  { %1928 = vmatpush.bf16.msra.mxu2 %v3134_v52  ;;  %1903 = vmatpush.bf16.msra.mxu0 %v2590_v60  ;;  %v3618_v43 = vld [vmem:[%s5778_s1 + $0x6f4] sm:$0xf0]  ;;  %v5061_v52 = vpop.f32.mrf.mxu3 }
  0xff   :  { %1897 = vmatmul.bf16.vlgmr.msrb.gmra.mxu3 %v4788_v24  ;;  %v2461_v49 = vld [vmem:[%s5778_s1 + $0x98] sm:$0xf]  ;;  %v3262_v14 = vor.u32 %v3618_v43, %v3261_v42  ;;  %v2626_v42 = vor.u32 %v3454_v27, %v2623_v28  ;;  %v3486_v27 = vld [vmem:[%s5778_s1 + $0x2dc] sm:$0xf] }
 0x100   :  { %1941 = vmatpush.bf16.msra.mxu3 %v3390_v17  ;;  %1916 = vmatpush.bf16.msra.mxu1 %v2846_v62  ;;  %v3418_v50 = vld [vmem:[%s5778_s1 + $0xb4] sm:$0xf0]  ;;  %v1653_v57 = vpop.f32.mrf.mxu0  ;;  %v1666_v62 = vpop.f32.mrf.mxu1 }
 0x101   :  { %v2717_v51 = vld [vmem:[%s5778_s1 + $0x298] sm:$0xf]  ;;  %v2462_v56 = vor.u32 %v3418_v50, %v2461_v49  ;;  %v3510_v49 = vld [vmem:[%s5778_s1 + $0x39c] sm:$0xf]  ;;  %v3394_v50 = vor.u32 %v3646_v39, %v3391_v40 }
 0x102   :  { %1929 = vmatpush.bf16.msra.mxu2 %v3102_v63  ;;  %1904 = vmatpush.bf16.msra.mxu0 %v2558_v9  ;;  %v3482_v53 = vld [vmem:[%s5778_s1 + $0x2b4] sm:$0xf0]  ;;  %v3438_v57 = vld [vmem:[%s5778_s1 + $0x15c] sm:$0xf] }
 0x103   :  { %v2973_v54 = vld [vmem:[%s5778_s1 + $0x498] sm:$0xf]  ;;  %v2718_v18 = vor.u32 %v3482_v53, %v2717_v51  ;;  %v2847_v51 = vld [vmem:[%s5778_s1 + $0x3b8] sm:$0xf0] }
 0x104   :  { %1942 = vmatpush.bf16.msra.mxu3 %v3358_v3  ;;  %1917 = vmatpush.bf16.msra.mxu1 %v2814_v10  ;;  %v3546_v55 = vld [vmem:[%s5778_s1 + $0x4b4] sm:$0xf0]  ;;  %v3103_v53 = vld [vmem:[%s5778_s1 + $0x5b8] sm:$0xf0] }
 0x105   :  { %v3229_v15 = vld [vmem:[%s5778_s1 + $0x698] sm:$0xf]  ;;  %v2974_v58 = vor.u32 %v3546_v55, %v2973_v54  ;;  %v3638_v54 = vld [vmem:[%s5778_s1 + $0x79c] sm:$0xf] }
 0x106   :  { %1930 = vmatpush.bf16.msra.mxu2 %v3070_v11  ;;  %1905 = vmatpush.bf16.msra.mxu0 %v2526_v29  ;;  %v3610_v17 = vld [vmem:[%s5778_s1 + $0x6b4] sm:$0xf0]  ;;  %v1692_v25 = vpop.f32.mrf.mxu3  ;;  %v3518_v29 = vld [vmem:[%s5778_s1 + $0x3dc] sm:$0xf] }
 0x107   :  { %v2429_v59 = vld [vmem:[%s5778_s1 + $0x58] sm:$0xf]  ;;  %v3230_v63 = vor.u32 %v3610_v17, %v3229_v15  ;;  %v3359_v55 = vld [vmem:[%s5778_s1 + $0x7b8] sm:$0xf0]  ;;  %v2850_v17 = vor.u32 %v3510_v49, %v2847_v51 }
 0x108   :  { %1943 = vmatpush.bf16.msra.mxu3 %v3326_v19  ;;  %1918 = vmatpush.bf16.msra.mxu1 %v2782_v31  ;;  %v3410_v60 = vld [vmem:[%s5778_s1 + $0x74] sm:$0xf0]  ;;  %v3071_v62 = vld [vmem:[%s5778_s1 + $0x578] sm:$0xf0]  ;;  %v5237_v28 = vpop.f32.mrf.mxu1 }
 0x109   :  { %v2685_v61 = vld [vmem:[%s5778_s1 + $0x258] sm:$0xf]  ;;  %v2430_v5 = vor.u32 %v3410_v60, %v2429_v59  ;;  %v3362_v59 = vor.u32 %v3638_v54, %v3359_v55  ;;  %v2815_v60 = vld [vmem:[%s5778_s1 + $0x378] sm:$0xf0] }
 0x10a   :  { %1931 = vmatpush.bf16.msra.mxu2 %v3038_v32  ;;  %1906 = vmatpush.bf16.msra.mxu0 %v2494_v45  ;;  %v3474_v0 = vld [vmem:[%s5778_s1 + $0x274] sm:$0xf0]  ;;  %v2879_v32 = vld [vmem:[%s5778_s1 + $0x3f8] sm:$0xf0]  ;;  %v3138_v45 = vor.u32 %v3582_v34, %v3135_v35 }
 0x10b   :  { %v2941_v1 = vld [vmem:[%s5778_s1 + $0x458] sm:$0xf]  ;;  %v2686_v8 = vor.u32 %v3474_v0, %v2685_v61  ;;  %v2882_v43 = vor.u32 %v3518_v29, %v2879_v32  ;;  %v3566_v61 = vld [vmem:[%s5778_s1 + $0x55c] sm:$0xf] }
 0x10c   :  { %1944 = vmatpush.bf16.msra.mxu3 %v3294_v37  ;;  %1919 = vmatpush.bf16.msra.mxu1 %v2750_v46  ;;  %v3538_v2 = vld [vmem:[%s5778_s1 + $0x474] sm:$0xf0]  ;;  %v3446_v46 = vld [vmem:[%s5778_s1 + $0x19c] sm:$0xf] }
 0x10d   :  { %v3197_v3 = vld [vmem:[%s5778_s1 + $0x658] sm:$0xf]  ;;  %v2942_v9 = vor.u32 %v3538_v2, %v2941_v1  ;;  %v3327_v0 = vld [vmem:[%s5778_s1 + $0x778] sm:$0xf0] }
 0x10e   :  { %1932 = vmatpush.bf16.msra.mxu2 %v3006_v47  ;;  %v3602_v4 = vld [vmem:[%s5778_s1 + $0x674] sm:$0xf0]  ;;  %1907 = vmatpush.bf16.msra.mxu0 %v2462_v56  ;;  %v2591_v47 = vld [vmem:[%s5778_s1 + $0x1b8] sm:$0xf0]  ;;  %v5274_v51 = vpop.f32.mrf.mxu3 }
 0x10f   :  { %v2397_v6 = vld [vmem:[%s5778_s1 + $0x18] sm:$0xf]  ;;  %v3198_v16 = vor.u32 %v3602_v4, %v3197_v3  ;;  %v2594_v15 = vor.u32 %v3446_v46, %v2591_v47  ;;  %v3074_v3 = vor.u32 %v3566_v61, %v3071_v62  ;;  %v3430_v4 = vld [vmem:[%s5778_s1 + $0x11c] sm:$0xf] }
 0x110   :  { %1945 = vmatpush.bf16.msra.mxu3 %v3262_v14  ;;  %v3402_v7 = vld [vmem:[%s5778_s1 + $0x34] sm:$0xf0]  ;;  %1920 = vmatpush.bf16.msra.mxu1 %v2718_v18  ;;  %v3574_v14 = vld [vmem:[%s5778_s1 + $0x59c] sm:$0xf] }
 0x111   :  { %v2653_v10 = vld [vmem:[%s5778_s1 + $0x218] sm:$0xf]  ;;  %v2398_v31 = vor.u32 %v3402_v7, %v2397_v6  ;;  %v3106_v56 = vor.u32 %v3574_v14, %v3103_v53  ;;  %v2559_v18 = vld [vmem:[%s5778_s1 + $0x178] sm:$0xf0] }
 0x112   :  { %1933 = vmatpush.bf16.msra.mxu2 %v2974_v58  ;;  %v3466_v11 = vld [vmem:[%s5778_s1 + $0x234] sm:$0xf0]  ;;  %1908 = vmatpush.bf16.msra.mxu0 %v2430_v5  ;;  %v3502_v58 = vld [vmem:[%s5778_s1 + $0x35c] sm:$0xf]  ;;  %v2562_v1 = vor.u32 %v3438_v57, %v2559_v18 }
 0x113   :  { %v2909_v12 = vld [vmem:[%s5778_s1 + $0x418] sm:$0xf]  ;;  %v2654_v36 = vor.u32 %v3466_v11, %v2653_v10  ;;  %v2818_v2 = vor.u32 %v3502_v58, %v2815_v60  ;;  %v2527_v5 = vld [vmem:[%s5778_s1 + $0x138] sm:$0xf0]  ;;  %v1718_v58 = vpop.f32.mrf.mxu1 }
 0x114   :  { %1946 = vmatpush.bf16.msra.mxu3 %v3230_v63  ;;  %v3530_v19 = vld [vmem:[%s5778_s1 + $0x434] sm:$0xf0]  ;;  %1921 = vmatpush.bf16.msra.mxu1 %v2686_v8  ;;  %v3630_v63 = vld [vmem:[%s5778_s1 + $0x75c] sm:$0xf]  ;;  %v2530_v13 = vor.u32 %v3430_v4, %v2527_v5  ;;  %v2066_v58 = vld [vmem:[%s5780_s3 + $0x48] sm:$0xff] }
 0x115   :  { %v3165_v21 = vld [vmem:[%s5778_s1 + $0x618] sm:$0xf]  ;;  %v2910_v37 = vor.u32 %v3530_v19, %v2909_v12  ;;  %v3494_v6 = vld [vmem:[%s5778_s1 + $0x31c] sm:$0xf]  ;;  %v3330_v7 = vor.u32 %v3630_v63, %v3327_v0 }
 0x116   :  { %v3594_v22 = vld [vmem:[%s5778_s1 + $0x634] sm:$0xf0]  ;;  %1934 = vmatpush.bf16.msra.mxu2 %v2942_v9  ;;  %1909 = vmatpush.bf16.msra.mxu0 %v2398_v31  ;;  %v2783_v8 = vld [vmem:[%s5778_s1 + $0x338] sm:$0xf0] }
 0x117   :  { %v3166_v41 = vor.u32 %v3594_v22, %v3165_v21  ;;  %v3558_v9 = vld [vmem:[%s5778_s1 + $0x51c] sm:$0xf]  ;;  %v2786_v19 = vor.u32 %v3494_v6, %v2783_v8 }
 0x118   :  { %1947 = vmatpush.bf16.msra.mxu3 %v3198_v16  ;;  %1922 = vmatpush.bf16.msra.mxu1 %v2654_v36  ;;  %v3039_v10 = vld [vmem:[%s5778_s1 + $0x538] sm:$0xf0]  ;;  %v5226_v16 = vpop.f32.mrf.mxu0 }
 0x119   :  { %1910 = vmatmul.bf16.vlgmr.msra.gmra.mxu0 %v4785_v23  ;;  %v3622_v11 = vld [vmem:[%s5778_s1 + $0x71c] sm:$0xf]  ;;  %v3042_v21 = vor.u32 %v3558_v9, %v3039_v10 }
 0x11a   :  { %1935 = vmatpush.bf16.msra.mxu2 %v2910_v37  ;;  %1954 = vmatpush.bf16.msrb.mxu0 %v2626_v42  ;;  %v3295_v12 = vld [vmem:[%s5778_s1 + $0x738] sm:$0xf0] }
 0x11b   :  { %1923 = vmatmul.bf16.vlgmr.msra.gmra.mxu1 %v4791_v26  ;;  %v3422_v22 = vld [vmem:[%s5778_s1 + $0xdc] sm:$0xf]  ;;  %v3298_v29 = vor.u32 %v3622_v11, %v3295_v12 }
 0x11c   :  { %1948 = vmatpush.bf16.msra.mxu3 %v3166_v41  ;;  %1967 = vmatpush.bf16.msrb.mxu1 %v2882_v43  ;;  %v2495_v25 = vld [vmem:[%s5778_s1 + $0xf8] sm:$0xf0] }
 0x11d   :  { %1936 = vmatmul.bf16.vlgmr.msra.gmra.mxu2 %v4776_v20  ;;  %v2751_v31 = vld [vmem:[%s5778_s1 + $0x2f8] sm:$0xf0]  ;;  %v2498_v37 = vor.u32 %v3422_v22, %v2495_v25  ;;  %v286_v22 = vperm.slane %v4830_v44, 2 }
 0x11e   :  { %1980 = vmatpush.bf16.msrb.mxu2 %v3138_v45  ;;  %1955 = vmatpush.bf16.msrb.mxu0 %v2594_v15  ;;  %v3550_v32 = vld [vmem:[%s5778_s1 + $0x4dc] sm:$0xf]  ;;  %v2754_v39 = vor.u32 %v3486_v27, %v2751_v31  ;;  %v5263_v45 = vpop.f32.mrf.mxu2 }
 0x11f   :  { %1949 = vmatmul.bf16.vlgmr.msra.gmra.mxu3 %v4788_v24  ;;  %v3007_v34 = vld [vmem:[%s5778_s1 + $0x4f8] sm:$0xf0] }
 0x120   :  { %1993 = vmatpush.bf16.msrb.mxu3 %v3394_v50  ;;  %1968 = vmatpush.bf16.msrb.mxu1 %v2850_v17  ;;  %v3614_v35 = vld [vmem:[%s5778_s1 + $0x6dc] sm:$0xf]  ;;  %v3010_v40 = vor.u32 %v3550_v32, %v3007_v34  ;;  %v1705_v55 = vpop.f32.mrf.mxu0 }
 0x121   :  { %v3263_v36 = vld [vmem:[%s5778_s1 + $0x6f8] sm:$0xf0]  ;;  %v2067_v55 = vld [vmem:[%s5780_s3 + $0x50] sm:$0xff] }
 0x122   :  { %1981 = vmatpush.bf16.msrb.mxu2 %v3106_v56  ;;  %1956 = vmatpush.bf16.msrb.mxu0 %v2562_v1  ;;  %v3414_v41 = vld [vmem:[%s5778_s1 + $0x9c] sm:$0xf]  ;;  %v3266_v46 = vor.u32 %v3614_v35, %v3263_v36  ;;  %v285_v1 = vperm.slane %v4830_v44, 1  ;;  %v1704_v35 = vadd.f32 %v5226_v16, %v286_v22  ;;  %v2071_v16 = vld [vmem:[%s5780_s3 + $0x70] sm:$0xff] }
 0x123   :  { %v2463_v42 = vld [vmem:[%s5778_s1 + $0xb8] sm:$0xf0]  ;;  %v2079_v22 = vld [vmem:[%s5780_s3 + $0xb0] sm:$0xff] }
 0x124   :  { %1994 = vmatpush.bf16.msrb.mxu3 %v3362_v59  ;;  %1969 = vmatpush.bf16.msrb.mxu1 %v2818_v2  ;;  %v3478_v43 = vld [vmem:[%s5778_s1 + $0x29c] sm:$0xf]  ;;  %v2466_v54 = vor.u32 %v3414_v41, %v2463_v42  ;;  %v1652_v31 = vadd.f32 %v5022_v30, %v285_v1  ;;  %v2102_v42 = vld [vmem:[%s5780_s3 + $0x168] sm:$0xff] }
 0x125   :  { %v2719_v47 = vld [vmem:[%s5778_s1 + $0x2b8] sm:$0xf0] }
 0x126   :  { %1982 = vmatpush.bf16.msrb.mxu2 %v3074_v3  ;;  %1957 = vmatpush.bf16.msrb.mxu0 %v2530_v13  ;;  %v3542_v49 = vld [vmem:[%s5778_s1 + $0x49c] sm:$0xf]  ;;  %v2722_v15 = vor.u32 %v3478_v43, %v2719_v47  ;;  %v1731_v8 = vpop.f32.mrf.mxu2  ;;  %v1744_v13 = vpop.f32.mrf.mxu3  ;;  %v1665_v30 = vadd.f32 %v5024_v33, %v1652_v31  ;;  %v2103_v33 = vld [vmem:[%s5780_s3 + $0x170] sm:$0xff]  ;;  %v287_v43 = vperm.slane %v4830_v44, 3  ;;  %v2101_v47 = vld [vmem:[%s5780_s3 + $0x160] sm:$0xff] }
 0x127   :  { %v2975_v50 = vld [vmem:[%s5778_s1 + $0x4b8] sm:$0xf0] }
 0x128   :  { %1995 = vmatpush.bf16.msrb.mxu3 %v3330_v7  ;;  %1970 = vmatpush.bf16.msrb.mxu1 %v2786_v19  ;;  %v3606_v14 = vld [vmem:[%s5778_s1 + $0x69c] sm:$0xf]  ;;  %v2978_v17 = vor.u32 %v3542_v49, %v2975_v50  ;;  %v2118_v49 = vld [vmem:[%s5780_s3 + $0x1e8] sm:$0xff] }
 0x129   :  { %v3231_v53 = vld [vmem:[%s5778_s1 + $0x6b8] sm:$0xf0] }
 0x12a   :  { %1983 = vmatpush.bf16.msrb.mxu2 %v3042_v21  ;;  %1958 = vmatpush.bf16.msrb.mxu0 %v2498_v37  ;;  %v3406_v56 = vld [vmem:[%s5778_s1 + $0x5c] sm:$0xf]  ;;  %v3234_v59 = vor.u32 %v3606_v14, %v3231_v53  ;;  %v2117_v53 = vld [vmem:[%s5780_s3 + $0x1e0] sm:$0xff] }
 0x12b   :  { %v2431_v57 = vld [vmem:[%s5778_s1 + $0x78] sm:$0xf0] }
 0x12c   :  { %1996 = vmatpush.bf16.msrb.mxu3 %v3298_v29  ;;  %1971 = vmatpush.bf16.msrb.mxu1 %v2754_v39  ;;  %v3470_v18 = vld [vmem:[%s5778_s1 + $0x25c] sm:$0xf]  ;;  %v2434_v2 = vor.u32 %v3406_v56, %v2431_v57  ;;  %v2087_v39 = vld [vmem:[%s5780_s3 + $0xf0] sm:$0xff] }
 0x12d   :  { %v2687_v60 = vld [vmem:[%s5778_s1 + $0x278] sm:$0xf0]  ;;  %v2099_v57 = vld [vmem:[%s5780_s3 + $0x150] sm:$0xff] }
 0x12e   :  { %1984 = vmatpush.bf16.msrb.mxu2 %v3010_v40  ;;  %v3534_v61 = vld [vmem:[%s5778_s1 + $0x45c] sm:$0xf]  ;;  %1959 = vmatpush.bf16.msrb.mxu0 %v2466_v54  ;;  %v2690_v3 = vor.u32 %v3470_v18, %v2687_v60  ;;  %v1717_v40 = vadd.f32 %v5237_v28, %v1704_v35  ;;  %v2070_v28 = vld [vmem:[%s5780_s3 + $0x68] sm:$0xff] }
 0x12f   :  { %v2943_v62 = vld [vmem:[%s5778_s1 + $0x478] sm:$0xf0]  ;;  %v2078_v35 = vld [vmem:[%s5780_s3 + $0xa8] sm:$0xff] }
 0x130   :  { %1997 = vmatpush.bf16.msrb.mxu3 %v3266_v46  ;;  %v3598_v63 = vld [vmem:[%s5778_s1 + $0x65c] sm:$0xf]  ;;  %1972 = vmatpush.bf16.msrb.mxu1 %v2722_v15  ;;  %v2946_v4 = vor.u32 %v3534_v61, %v2943_v62  ;;  %v1730_v46 = vadd.f32 %v5263_v45, %v1717_v40  ;;  %v2098_v61 = vld [vmem:[%s5780_s3 + $0x148] sm:$0xff]  ;;  %v2115_v62 = vld [vmem:[%s5780_s3 + $0x1d0] sm:$0xff] }
 0x131   :  { %v3199_v0 = vld [vmem:[%s5778_s1 + $0x678] sm:$0xf0]  ;;  %v2077_v40 = vld [vmem:[%s5780_s3 + $0xa0] sm:$0xff] }
 0x132   :  { %1985 = vmatpush.bf16.msrb.mxu2 %v2978_v17  ;;  %v3398_v5 = vld [vmem:[%s5778_s1 + $0x1c] sm:$0xf]  ;;  %v3202_v9 = vor.u32 %v3598_v63, %v3199_v0  ;;  %1960 = vmatpush.bf16.msrb.mxu0 %v2434_v2  ;;  %v1743_v56 = vadd.f32 %v5274_v51, %v1730_v46  ;;  %v2082_v51 = vld [vmem:[%s5780_s3 + $0xc8] sm:$0xff]  ;;  %v2065_v63 = vld [vmem:[%s5780_s3 + $0x40] sm:$0xff] }
 0x133   :  { %v2399_v6 = vld [vmem:[%s5778_s1 + $0x38] sm:$0xf0]  ;;  %v2081_v0 = vld [vmem:[%s5780_s3 + $0xc0] sm:$0xff] }
 0x134   :  { %v3462_v7 = vld [vmem:[%s5778_s1 + $0x21c] sm:$0xf]  ;;  %1998 = vmatpush.bf16.msrb.mxu3 %v3234_v59  ;;  %v2402_v25 = vor.u32 %v3398_v5, %v2399_v6  ;;  %1973 = vmatpush.bf16.msrb.mxu1 %v2690_v3  ;;  %v2016_v2 = vmul.f32 0.1, %v1743_v56  ;;  %v2097_v3 = vld [vmem:[%s5780_s3 + $0x140] sm:$0xff]  ;;  %vm2008_vm1 = vcmp.gt.f32.partialorder %v1743_v56, 0.0 }
 0x135   :  { %v2655_v10 = vld [vmem:[%s5778_s1 + $0x238] sm:$0xf0] }
 0x136   :  { %v3526_v11 = vld [vmem:[%s5778_s1 + $0x41c] sm:$0xf]  ;;  %1986 = vmatpush.bf16.msrb.mxu2 %v2946_v4  ;;  %v2658_v27 = vor.u32 %v3462_v7, %v2655_v10  ;;  %1961 = vmatpush.bf16.msrb.mxu0 %v2402_v25  ;;  %v1755_v54 = vpop.f32.mrf.mxu0  ;;  %v2114_v4 = vld [vmem:[%s5780_s3 + $0x1c8] sm:$0xff]  ;;  %v2113_v10 = vld [vmem:[%s5780_s3 + $0x1c0] sm:$0xff] }
 0x137   :  { %v2911_v12 = vld [vmem:[%s5778_s1 + $0x438] sm:$0xf0]  ;;  %v1756_v15 = vadd.f32 %v1755_v54, %v287_v43  ;;  %v2074_v54 = vld [vmem:[%s5780_s3 + $0x88] sm:$0xff] }
 0x138   :  { %v3590_v19 = vld [vmem:[%s5778_s1 + $0x61c] sm:$0xf]  ;;  %v2914_v29 = vor.u32 %v3526_v11, %v2911_v12  ;;  %1999 = vmatpush.bf16.msrb.mxu3 %v3202_v9  ;;  %1974 = vmatpush.bf16.msrb.mxu1 %v2658_v27  ;;  %v1768_v17 = vpop.f32.mrf.mxu1  ;;  %v2095_v27 = vld [vmem:[%s5780_s3 + $0x130] sm:$0xff] }
 0x139   :  { %v3167_v21 = vld [vmem:[%s5778_s1 + $0x638] sm:$0xf0]  ;;  %1962 = vmatmul.bf16.vlgmr.msrb.gmra.mxu0 %v4785_v23  ;;  %v2086_v23 = vld [vmem:[%s5780_s3 + $0xe8] sm:$0xff]  ;;  %v1769_v59 = vadd.f32 %v1768_v17, %v1756_v15  ;;  %v2057_v15 = vld [vmem:[%s5780_s3] sm:$0xff] }
 0x13a   :  { %v3170_v32 = vor.u32 %v3590_v19, %v3167_v21  ;;  %v2072_v34 = vld [vmem:[%s5780_s3 + $0x78] sm:$0xff]  ;;  %1987 = vmatpush.bf16.msrb.mxu2 %v2914_v29  ;;  %v2014_v19 = vmul.f32 0.1, %v4929_v38  ;;  %v2063_v21 = vld [vmem:[%s5780_s3 + $0x30] sm:$0xff]  ;;  %v2073_v17 = vld [vmem:[%s5780_s3 + $0x80] sm:$0xff] }
 0x13b   :  { %v2088_v36 = vld [vmem:[%s5780_s3 + $0xf8] sm:$0xff]  ;;  %2189 = vmatpush.msra.mxu0 %v2072_v34  ;;  %1975 = vmatmul.bf16.vlgmr.msrb.gmra.mxu1 %v4791_v26  ;;  %v1678_v26 = vadd.f32 %v5050_v48, %v1665_v30  ;;  %v2085_v48 = vld [vmem:[%s5780_s3 + $0xe0] sm:$0xff]  ;;  %v2062_v34 = vld [vmem:[%s5780_s3 + $0x28] sm:$0xff] }
 0x13c   :  { %v2104_v37 = vld [vmem:[%s5780_s3 + $0x178] sm:$0xff]  ;;  %2000 = vmatpush.bf16.msrb.mxu3 %v3170_v32  ;;  %2209 = vmatpush.msra.mxu1 %v2088_v36  ;;  %v5467_v32 = vsel %vm2008_vm1, %v1743_v56, %v2016_v2  ;;  %v2111_v30 = vld [vmem:[%s5780_s3 + $0x1b0] sm:$0xff]  ;;  %v2089_v56 = vld [vmem:[%s5780_s3 + $0x100] sm:$0xff] }
 0x13d   :  { %v2120_v41 = vld [vmem:[%s5780_s3 + $0x1f8] sm:$0xff]  ;;  %1988 = vmatmul.bf16.vlgmr.msrb.gmra.mxu2 %v4776_v20  ;;  %2190 = vmatpush.msra.mxu0 %v2071_v16  ;;  %v2119_v20 = vld [vmem:[%s5780_s3 + $0x1f0] sm:$0xff]  ;;  %v1691_v45 = vadd.f32 %v5061_v52, %v1678_v26  ;;  %v2110_v26 = vld [vmem:[%s5780_s3 + $0x1a8] sm:$0xff] }
 0x13e   :  { %2229 = vmatpush.msra.mxu2 %v2104_v37  ;;  %2210 = vmatpush.msra.mxu1 %v2087_v39  ;;  %v2068_v50 = vld [vmem:[%s5780_s3 + $0x58] sm:$0xff]  ;;  %v2083_v52 = vld [vmem:[%s5780_s3 + $0xd0] sm:$0xff]  ;;  %v1757_v13 = vpop.f32.mrf.mxu0  ;;  %v2094_v37 = vld [vmem:[%s5780_s3 + $0x128] sm:$0xff] }
 0x13f   :  { %2001 = vmatmul.bf16.vlgmr.msrb.gmra.mxu3 %v4788_v24  ;;  %v2069_v24 = vld [vmem:[%s5780_s3 + $0x60] sm:$0xff]  ;;  %2191 = vmatpush.msra.mxu0 %v2070_v28  ;;  %v2084_v44 = vld [vmem:[%s5780_s3 + $0xd8] sm:$0xff]  ;;  %v2015_v60 = vmul.f32 0.1, %v1691_v45  ;;  %vm2007_vm0 = vcmp.gt.f32.partialorder %v1691_v45, 0.0  ;;  %v2146_v13 = vld [vmem:[%s5780_s3 + $0x2c8] sm:$0xff] }
 0x140   :  { %2230 = vmatpush.msra.mxu2 %v2103_v33  ;;  %2249 = vmatpush.msra.mxu3 %v2120_v41  ;;  %v2100_v14 = vld [vmem:[%s5780_s3 + $0x158] sm:$0xff]  ;;  %v1781_v1 = vpop.f32.mrf.mxu2  ;;  %v1770_v25 = vpop.f32.mrf.mxu1  ;;  %v2061_v39 = vld [vmem:[%s5780_s3 + $0x20] sm:$0xff]  ;;  %v2039_v33 = vrot.slane %v5467_v32, 4 }
 0x141   :  { %2211 = vmatpush.msra.mxu1 %v2086_v23  ;;  %2192 = vmatpush.msra.mxu0 %v2069_v24  ;;  %v2116_v18 = vld [vmem:[%s5780_s3 + $0x1d8] sm:$0xff]  ;;  %v1782_v5 = vadd.f32 %v1781_v1, %v1769_v59  ;;  %v5451_v12 = vsel %vm2007_vm0, %v1691_v45, %v2015_v60  ;;  %v2093_v23 = vld [vmem:[%s5780_s3 + $0x120] sm:$0xff]  ;;  %v2091_v45 = vld [vmem:[%s5780_s3 + $0x110] sm:$0xff] }
 0x142   :  { %2231 = vmatpush.msra.mxu2 %v2102_v42  ;;  %2250 = vmatpush.msra.mxu3 %v2119_v20  ;;  %v1794_v6 = vpop.f32.mrf.mxu3  ;;  %v2064_v7 = vld [vmem:[%s5780_s3 + $0x38] sm:$0xff]  ;;  %v2038_v36 = vrot.slane %v5451_v12, 6  ;;  %v2022_v42 = vsel %vm2006_vm3, %v4929_v38, %v2014_v19  ;;  %v2135_v59 = vld [vmem:[%s5780_s3 + $0x270] sm:$0xff]  ;;  %v5583_v1 = vld [vmem:[%s5779_s2] sm:$0xff] }
 0x143   :  { %2212 = vmatpush.msra.mxu1 %v2085_v48  ;;  %2193 = vmatpush.msra.mxu0 %v2068_v50  ;;  %v2080_v8 = vld [vmem:[%s5780_s3 + $0xb8] sm:$0xff]  ;;  %v1795_v11 = vadd.f32 %v1794_v6, %v1782_v5  ;;  %v2059_v50 = vld [vmem:[%s5780_s3 + $0x10] sm:$0xff]  ;;  %v288_v2 = vperm.slane %v5583_v1, 4  ;;  %v2129_v19 = vld [vmem:[%s5780_s3 + $0x240] sm:$0xff] }
 0x144   :  { %2232 = vmatpush.msra.mxu2 %v2101_v47  ;;  %2251 = vmatpush.msra.mxu3 %v2118_v49  ;;  %v2096_v9 = vld [vmem:[%s5780_s3 + $0x138] sm:$0xff]  ;;  %v2045_v43 = vsel %vm2044_vm4, %v2022_v42, %v2038_v36  ;;  %v2109_v47 = vld [vmem:[%s5780_s3 + $0x1a0] sm:$0xff]  ;;  %v2151_v60 = vld [vmem:[%s5780_s3 + $0x2f0] sm:$0xff] }
 0x145   :  { %2213 = vmatpush.msra.mxu1 %v2084_v44  ;;  %2194 = vmatpush.msra.mxu0 %v2067_v55  ;;  %v2112_v29 = vld [vmem:[%s5780_s3 + $0x1b8] sm:$0xff]  ;;  %vm2009_vm2 = vcmp.gt.f32.partialorder %v1795_v11, 0.0  ;;  %v2017_v31 = vmul.f32 0.1, %v1795_v11  ;;  %v2075_v44 = vld [vmem:[%s5780_s3 + $0x90] sm:$0xff]  ;;  %v2090_v55 = vld [vmem:[%s5780_s3 + $0x108] sm:$0xff] }
 0x146   :  { %2233 = vmatpush.msra.mxu2 %v2100_v14  ;;  %2252 = vmatpush.msra.mxu3 %v2117_v53  ;;  %v2060_v24 = vld [vmem:[%s5780_s3 + $0x18] sm:$0xff]  ;;  %v2058_v53 = vld [vmem:[%s5780_s3 + $0x8] sm:$0xff]  ;;  %v2127_v36 = vld [vmem:[%s5780_s3 + $0x230] sm:$0xff] }
 0x147   :  { %2214 = vmatpush.msra.mxu1 %v2083_v52  ;;  %2195 = vmatpush.msra.mxu0 %v2066_v58  ;;  %v5483_v16 = vsel %vm2009_vm2, %v1795_v11, %v2017_v31  ;;  %v2076_v48 = vld [vmem:[%s5780_s3 + $0x98] sm:$0xff]  ;;  %v2107_v52 = vld [vmem:[%s5780_s3 + $0x190] sm:$0xff]  ;;  %v2105_v58 = vld [vmem:[%s5780_s3 + $0x180] sm:$0xff] }
 0x148   :  { %2234 = vmatpush.msra.mxu2 %v2099_v57  ;;  %2253 = vmatpush.msra.mxu3 %v2116_v18  ;;  %v2040_v41 = vrot.slane %v5483_v16, 2  ;;  %v1783_v28 = vpop.f32.mrf.mxu2  ;;  %v2092_v38 = vld [vmem:[%s5780_s3 + $0x118] sm:$0xff]  ;;  %v2106_v57 = vld [vmem:[%s5780_s3 + $0x188] sm:$0xff] }
 0x149   :  { %2215 = vmatpush.msra.mxu1 %v2082_v51  ;;  %2196 = vmatpush.msra.mxu0 %v2065_v63  ;;  %v2108_v14 = vld [vmem:[%s5780_s3 + $0x198] sm:$0xff]  ;;  %v2133_v63 = vld [vmem:[%s5780_s3 + $0x260] sm:$0xff]  ;;  %v2130_v11 = vld [vmem:[%s5780_s3 + $0x248] sm:$0xff] }
 0x14a   :  { %2235 = vmatpush.msra.mxu2 %v2098_v61  ;;  %2254 = vmatpush.msra.mxu3 %v2115_v62  ;;  %v1796_v20 = vpop.f32.mrf.mxu3  ;;  %v2047_v46 = vsel %vm2046_vm5, %v2039_v33, %v2040_v41  ;;  %v2136_v18 = vld [vmem:[%s5780_s3 + $0x278] sm:$0xff]  ;;  %v2134_v61 = vld [vmem:[%s5780_s3 + $0x268] sm:$0xff] }
 0x14b   :  { %2216 = vmatpush.msra.mxu1 %v2081_v0  ;;  %2197 = vmatpush.msra.mxu0 %v2064_v7  ;;  %v2049_v49 = vsel %vm2048_vm6, %v2045_v43, %v2047_v46  ;;  %v2152_v51 = vld [vmem:[%s5780_s3 + $0x2f8] sm:$0xff]  ;;  %v2150_v62 = vld [vmem:[%s5780_s3 + $0x2e8] sm:$0xff]  ;;  %v2131_v7 = vld [vmem:[%s5780_s3 + $0x250] sm:$0xff] }
 0x14c   :  { %2236 = vmatpush.msra.mxu2 %v2097_v3  ;;  %2255 = vmatpush.msra.mxu3 %v2114_v4  ;;  %2055 = vst [vmem:[#allocation3] sm:$0xff] %v2049_v49  ;;  %v2149_v4 = vld [vmem:[%s5780_s3 + $0x2e0] sm:$0xff]  ;;  %v2132_v5 = vld [vmem:[%s5780_s3 + $0x258] sm:$0xff]  ;;  %v2142_v41 = vld [vmem:[%s5780_s3 + $0x2a8] sm:$0xff] }
 0x14d   :  { %2217 = vmatpush.msra.mxu1 %v2080_v8  ;;  %2198 = vmatpush.msra.mxu0 %v2063_v21  ;;  %v2148_v6 = vld [vmem:[%s5780_s3 + $0x2d8] sm:$0xff]  ;;  %v2163_v20 = vld [vmem:[%s5780_s3 + $0x350] sm:$0xff]  ;;  %v2162_v43 = vld [vmem:[%s5780_s3 + $0x348] sm:$0xff] }
 0x14e   :  { %2237 = vmatpush.msra.mxu2 %v2096_v9  ;;  %2256 = vmatpush.msra.mxu3 %v2113_v10  ;;  %v2147_v10 = vld [vmem:[%s5780_s3 + $0x2d0] sm:$0xff]  ;;  %v2128_v31 = vld [vmem:[%s5780_s3 + $0x238] sm:$0xff]  ;;  %v2161_v49 = vld [vmem:[%s5780_s3 + $0x340] sm:$0xff] }
 0x14f   :  { %2218 = vmatpush.msra.mxu1 %v2079_v22  ;;  %2199 = vmatpush.msra.mxu0 %v2062_v34  ;;  %v2168_v22 = vld [vmem:[%s5780_s3 + $0x378] sm:$0xff]  ;;  %v2167_v34 = vld [vmem:[%s5780_s3 + $0x370] sm:$0xff] }
 0x150   :  { %2238 = vmatpush.msra.mxu2 %v2095_v27  ;;  %2257 = vmatpush.msra.mxu3 %v2112_v29  ;;  %v2145_v29 = vld [vmem:[%s5780_s3 + $0x2c0] sm:$0xff]  ;;  %v2164_v28 = vld [vmem:[%s5780_s3 + $0x358] sm:$0xff]  ;;  %v2123_v46 = vld [vmem:[%s5780_s3 + $0x210] sm:$0xff] }
 0x151   :  { %2219 = vmatpush.msra.mxu1 %v2078_v35  ;;  %2200 = vmatpush.msra.mxu0 %v2061_v39  ;;  %v2166_v35 = vld [vmem:[%s5780_s3 + $0x368] sm:$0xff]  ;;  %v2165_v39 = vld [vmem:[%s5780_s3 + $0x360] sm:$0xff] }
 0x152   :  { %2239 = vmatpush.msra.mxu2 %v2094_v37  ;;  %2258 = vmatpush.msra.mxu3 %v2111_v30 }
 0x153   :  { %2220 = vmatpush.msra.mxu1 %v2077_v40  ;;  %2201 = vmatpush.msra.mxu0 %v2060_v24  ;;  %v2126_v40 = vld [vmem:[%s5780_s3 + $0x228] sm:$0xff]  ;;  %v2124_v24 = vld [vmem:[%s5780_s3 + $0x218] sm:$0xff] }
 0x154   :  { %2240 = vmatpush.msra.mxu2 %v2093_v23  ;;  %2259 = vmatpush.msra.mxu3 %v2110_v26  ;;  %v2125_v23 = vld [vmem:[%s5780_s3 + $0x220] sm:$0xff] }
 0x155   :  { %2221 = vmatpush.msra.mxu1 %v2076_v48  ;;  %2202 = vmatpush.msra.mxu0 %v2059_v50  ;;  %v2140_v48 = vld [vmem:[%s5780_s3 + $0x298] sm:$0xff]  ;;  %v2122_v50 = vld [vmem:[%s5780_s3 + $0x208] sm:$0xff] }
 0x156   :  { %2241 = vmatpush.msra.mxu2 %v2092_v38  ;;  %2260 = vmatpush.msra.mxu3 %v2109_v47  ;;  %v1807_v0 = vpop.f32.mrf.mxu0  ;;  %v2139_v47 = vld [vmem:[%s5780_s3 + $0x290] sm:$0xff] }
 0x157   :  { %2222 = vmatpush.msra.mxu1 %v2075_v44  ;;  %2203 = vmatpush.msra.mxu0 %v2058_v53  ;;  %v1808_v8 = vadd.f32 %v1807_v0, %v288_v2  ;;  %v2138_v44 = vld [vmem:[%s5780_s3 + $0x288] sm:$0xff]  ;;  %v2155_v0 = vld [vmem:[%s5780_s3 + $0x310] sm:$0xff] }
 0x158   :  { %2242 = vmatpush.msra.mxu2 %v2091_v45  ;;  %2261 = vmatpush.msra.mxu3 %v2108_v14  ;;  %v1820_v3 = vpop.f32.mrf.mxu1  ;;  %v2160_v45 = vld [vmem:[%s5780_s3 + $0x338] sm:$0xff]  ;;  %v2121_v14 = vld [vmem:[%s5780_s3 + $0x200] sm:$0xff]  ;;  %v2154_v2 = vld [vmem:[%s5780_s3 + $0x308] sm:$0xff] }
 0x159   :  { %2223 = vmatpush.msra.mxu1 %v2074_v54  ;;  %2204 = vmatpush.msra.mxu0 %v2057_v15  ;;  %v1821_v25 = vadd.f32 %v1820_v3, %v1808_v8  ;;  %v2137_v54 = vld [vmem:[%s5780_s3 + $0x280] sm:$0xff]  ;;  %v2158_v15 = vld [vmem:[%s5780_s3 + $0x328] sm:$0xff]  ;;  %v2184_v3 = vld [vmem:[%s5780_s3 + $0x3f8] sm:$0xff] }
 0x15a   :  { %2243 = vmatpush.msra.mxu2 %v2090_v55  ;;  %2262 = vmatpush.msra.mxu3 %v2107_v52  ;;  %v2159_v55 = vld [vmem:[%s5780_s3 + $0x330] sm:$0xff]  ;;  %v289_v52 = vperm.slane %v5583_v1, 5  ;;  %v2182_v8 = vld [vmem:[%s5780_s3 + $0x3e8] sm:$0xff] }
 0x15b   :  { %2224 = vmatpush.msra.mxu1 %v2073_v17  ;;  %2205 = vmatmul.f32.vlgmr.msra.gmra.mxu0 %v2022_v42  ;;  %v2141_v42 = vld [vmem:[%s5780_s3 + $0x2a0] sm:$0xff] }
 0x15c   :  { %2244 = vmatpush.msra.mxu2 %v2089_v56  ;;  %2263 = vmatpush.msra.mxu3 %v2106_v57 }
 0x15d   :  { %2225 = vmatmul.f32.vlgmr.msra.gmra.mxu1 %v5451_v12  ;;  %2245 = vmatmul.f32.vlgmr.msra.gmra.mxu2 %v5467_v32  ;;  %v2144_v32 = vld [vmem:[%s5780_s3 + $0x2b8] sm:$0xff] }
 0x15e   :  { %2269 = vmatpush.msrb.mxu0 %v2136_v18  ;;  %2264 = vmatpush.msra.mxu3 %v2105_v58  ;;  %v1809_v21 = vpop.f32.mrf.mxu0  ;;  %v2157_v18 = vld [vmem:[%s5780_s3 + $0x320] sm:$0xff] }
 0x15f   :  { %2289 = vmatpush.msrb.mxu1 %v2152_v51  ;;  %2265 = vmatmul.f32.vlgmr.msra.gmra.mxu3 %v5483_v16  ;;  %v2143_v16 = vld [vmem:[%s5780_s3 + $0x2b0] sm:$0xff]  ;;  %v2156_v51 = vld [vmem:[%s5780_s3 + $0x318] sm:$0xff]  ;;  %v2178_v21 = vld [vmem:[%s5780_s3 + $0x3c8] sm:$0xff] }
 0x160   :  { %2270 = vmatpush.msrb.mxu0 %v2135_v59  ;;  %v1833_v9 = vpop.f32.mrf.mxu2  ;;  %v1822_v27 = vpop.f32.mrf.mxu1  ;;  %2309 = vmatpush.msrb.mxu2 %v2168_v22  ;;  %v2177_v22 = vld [vmem:[%s5780_s3 + $0x3c0] sm:$0xff] }
 0x161   :  { %2290 = vmatpush.msrb.mxu1 %v2151_v60  ;;  %v1834_v37 = vadd.f32 %v1833_v9, %v1821_v25  ;;  %2329 = vmatpush.msrb.mxu3 %v2184_v3  ;;  %v2176_v25 = vld [vmem:[%s5780_s3 + $0x3b8] sm:$0xff]  ;;  %v290_v27 = vperm.slane %v5583_v1, 6 }
 0x162   :  { %2271 = vmatpush.msrb.mxu0 %v2134_v61  ;;  %v1846_v12 = vpop.f32.mrf.mxu3  ;;  %2310 = vmatpush.msrb.mxu2 %v2167_v34 }
 0x163   :  { %2291 = vmatpush.msrb.mxu1 %v2150_v62  ;;  %v1847_v26 = vadd.f32 %v1846_v12, %v1834_v37 }
 0x164   :  { %2272 = vmatpush.msrb.mxu0 %v2133_v63  ;;  %2311 = vmatpush.msrb.mxu2 %v2166_v35 }
 0x165   :  { %2292 = vmatpush.msrb.mxu1 %v2149_v4  ;;  %v2018_v38 = vmul.f32 0.1, %v1847_v26  ;;  %vm2010_vm7 = vcmp.gt.f32.partialorder %v1847_v26, 0.0 }
 0x166   :  { %2273 = vmatpush.msrb.mxu0 %v2132_v5  ;;  %2312 = vmatpush.msrb.mxu2 %v2165_v39 }
 0x167   :  { %2293 = vmatpush.msrb.mxu1 %v2148_v6  ;;  %v5685_v53 = vsel %vm2010_vm7, %v1847_v26, %v2018_v38  ;;  %v2153_v6 = vld [vmem:[%s5780_s3 + $0x300] sm:$0xff]  ;;  %v2170_v26 = vld [vmem:[%s5780_s3 + $0x388] sm:$0xff] }
 0x168   :  { %2274 = vmatpush.msrb.mxu0 %v2131_v7  ;;  %v1835_v30 = vpop.f32.mrf.mxu2  ;;  %2313 = vmatpush.msrb.mxu2 %v2164_v28  ;;  %v2183_v7 = vld [vmem:[%s5780_s3 + $0x3f0] sm:$0xff] }
 0x169   :  { %2294 = vmatpush.msrb.mxu1 %v2147_v10  ;;  %2330 = vmatpush.msrb.mxu3 %v2183_v7 }
 0x16a   :  { %2275 = vmatpush.msrb.mxu0 %v2130_v11  ;;  %v1848_v33 = vpop.f32.mrf.mxu3  ;;  %2314 = vmatpush.msrb.mxu2 %v2163_v20  ;;  %v2181_v11 = vld [vmem:[%s5780_s3 + $0x3e0] sm:$0xff] }
 0x16b   :  { %2295 = vmatpush.msrb.mxu1 %v2146_v13  ;;  %2331 = vmatpush.msrb.mxu3 %v2182_v8  ;;  %v2180_v13 = vld [vmem:[%s5780_s3 + $0x3d8] sm:$0xff]  ;;  %v2169_v20 = vld [vmem:[%s5780_s3 + $0x380] sm:$0xff] }
 0x16c   :  { %2276 = vmatpush.msrb.mxu0 %v2129_v19  ;;  %2315 = vmatpush.msrb.mxu2 %v2162_v43  ;;  %v2179_v19 = vld [vmem:[%s5780_s3 + $0x3d0] sm:$0xff] }
 0x16d   :  { %2296 = vmatpush.msrb.mxu1 %v2145_v29  ;;  %2332 = vmatpush.msrb.mxu3 %v2181_v11 }
 0x16e   :  { %2277 = vmatpush.msrb.mxu0 %v2128_v31  ;;  %2316 = vmatpush.msrb.mxu2 %v2161_v49  ;;  %v2175_v31 = vld [vmem:[%s5780_s3 + $0x3b0] sm:$0xff] }
 0x16f   :  { %2297 = vmatpush.msrb.mxu1 %v2144_v32  ;;  %2333 = vmatpush.msrb.mxu3 %v2180_v13  ;;  %v2174_v32 = vld [vmem:[%s5780_s3 + $0x3a8] sm:$0xff] }
 0x170   :  { %2278 = vmatpush.msrb.mxu0 %v2127_v36  ;;  %2317 = vmatpush.msrb.mxu2 %v2160_v45  ;;  %v2173_v36 = vld [vmem:[%s5780_s3 + $0x3a0] sm:$0xff] }
 0x171   :  { %2298 = vmatpush.msrb.mxu1 %v2143_v16  ;;  %2334 = vmatpush.msrb.mxu3 %v2179_v19 }
 0x172   :  { %2279 = vmatpush.msrb.mxu0 %v2126_v40  ;;  %2318 = vmatpush.msrb.mxu2 %v2159_v55  ;;  %v2172_v40 = vld [vmem:[%s5780_s3 + $0x398] sm:$0xff] }
 0x173   :  { %2299 = vmatpush.msrb.mxu1 %v2142_v41  ;;  %2335 = vmatpush.msrb.mxu3 %v2178_v21 }
 0x174   :  { %2280 = vmatpush.msrb.mxu0 %v2125_v23  ;;  %2319 = vmatpush.msrb.mxu2 %v2158_v15  ;;  %v2171_v23 = vld [vmem:[%s5780_s3 + $0x390] sm:$0xff] }
 0x175   :  { %2300 = vmatpush.msrb.mxu1 %v2141_v42  ;;  %2336 = vmatpush.msrb.mxu3 %v2177_v22 }
 0x176   :  { %2281 = vmatpush.msrb.mxu0 %v2124_v24  ;;  %v1859_v17 = vpop.f32.mrf.mxu0  ;;  %2320 = vmatpush.msrb.mxu2 %v2157_v18 }
 0x177   :  { %2301 = vmatpush.msrb.mxu1 %v2140_v48  ;;  %v1860_v56 = vadd.f32 %v1859_v17, %v289_v52  ;;  %2337 = vmatpush.msrb.mxu3 %v2176_v25 }
 0x178   :  { %2282 = vmatpush.msrb.mxu0 %v2123_v46  ;;  %v1872_v57 = vpop.f32.mrf.mxu1  ;;  %2321 = vmatpush.msrb.mxu2 %v2156_v51  ;;  %v291_v46 = vperm.slane %v5583_v1, 7 }
 0x179   :  { %2302 = vmatpush.msrb.mxu1 %v2139_v47  ;;  %v1873_v58 = vadd.f32 %v1872_v57, %v1860_v56  ;;  %2338 = vmatpush.msrb.mxu3 %v2175_v31 }
 0x17a   :  { %2283 = vmatpush.msrb.mxu0 %v2122_v50  ;;  %2322 = vmatpush.msrb.mxu2 %v2155_v0 }
 0x17b   :  { %2303 = vmatpush.msrb.mxu1 %v2138_v44  ;;  %2339 = vmatpush.msrb.mxu3 %v2174_v32 }
 0x17c   :  { %2284 = vmatpush.msrb.mxu0 %v2121_v14  ;;  %2323 = vmatpush.msrb.mxu2 %v2154_v2 }
 0x17d   :  { %2285 = vmatmul.f32.vlgmr.msrb.gmra.mxu0 %v5685_v53  ;;  %2304 = vmatpush.msrb.mxu1 %v2137_v54 }
 0x17e   :  { %v1861_v63 = vpop.f32.mrf.mxu0  ;;  %2324 = vmatpush.msrb.mxu2 %v2153_v6  ;;  %2340 = vmatpush.msrb.mxu3 %v2173_v36 }
 0x180   :  { %v1885_v59 = vpop.f32.mrf.mxu2  ;;  %v1874_v4 = vpop.f32.mrf.mxu1  ;;  %2341 = vmatpush.msrb.mxu3 %v2172_v40 }
 0x181   :  { %v1886_v60 = vadd.f32 %v1885_v59, %v1873_v58 }
 0x182   :  { %v1898_v61 = vpop.f32.mrf.mxu3  ;;  %2342 = vmatpush.msrb.mxu3 %v2171_v23 }
 0x183   :  { %v1899_v62 = vadd.f32 %v1898_v61, %v1886_v60  ;;  %v3652_v61 = vld [vmem:[#allocation2] ss:$0 sm:$0xff] }
 0x184   :  { %2343 = vmatpush.msrb.mxu3 %v2170_v26 }
 0x185   :  { %vm2011_vm8 = vcmp.gt.f32.partialorder %v1899_v62, 0.0  ;;  %v2019_v5 = vmul.f32 0.1, %v1899_v62 }
 0x186   :  { %2344 = vmatpush.msrb.mxu3 %v2169_v20 }
 0x187   :  { %v5722_v9 = vsel %vm2011_vm8, %v1899_v62, %v2019_v5 }
 0x188   :  { %2305 = vmatmul.f32.vlgmr.msrb.gmra.mxu1 %v5722_v9  ;;  %v1887_v10 = vpop.f32.mrf.mxu2  ;;  %v2041_v17 = vrot.slane %v5722_v9, 6 }
 0x18a   :  { %v1900_v12 = vpop.f32.mrf.mxu3  ;;  %v2050_v1 = vsel %vm2044_vm4, %v5685_v53, %v2041_v17 }
 0x196   :  { %v1911_v29 = vpop.f32.mrf.mxu0 }
 0x197   :  { %v1912_v34 = vadd.f32 %v1911_v29, %v290_v27 }
 0x198   :  { %v1924_v35 = vpop.f32.mrf.mxu1 }
 0x199   :  { %v1925_v37 = vadd.f32 %v1924_v35, %v1912_v34 }
 0x19e   :  { %v1913_v41 = vpop.f32.mrf.mxu0 }
 0x1a0   :  { %v1937_v30 = vpop.f32.mrf.mxu2  ;;  %v1926_v28 = vpop.f32.mrf.mxu1 }
 0x1a1   :  { %v1938_v16 = vadd.f32 %v1937_v30, %v1925_v37 }
 0x1a2   :  { %v1950_v39 = vpop.f32.mrf.mxu3 }
 0x1a3   :  { %v1951_v33 = vadd.f32 %v1950_v39, %v1938_v16 }
 0x1a5   :  { %vm2012_vm9 = vcmp.gt.f32.partialorder %v1951_v33, 0.0  ;;  %v2020_v42 = vmul.f32 0.1, %v1951_v33 }
 0x1a7   :  { %v2028_v24 = vsel %vm2012_vm9, %v1951_v33, %v2020_v42 }
 0x1a8   :  { %2325 = vmatmul.f32.vlgmr.msrb.gmra.mxu2 %v2028_v24  ;;  %v1939_v48 = vpop.f32.mrf.mxu2  ;;  %v2042_v57 = vrot.slane %v2028_v24, 4 }
 0x1aa   :  { %v1952_v43 = vpop.f32.mrf.mxu3 }
 0x1b6   :  { %v1963_v38 = vpop.f32.mrf.mxu0 }
 0x1b7   :  { %v1964_v49 = vadd.f32 %v1963_v38, %v291_v46 }
 0x1b8   :  { %v1976_v47 = vpop.f32.mrf.mxu1 }
 0x1b9   :  { %v1977_v50 = vadd.f32 %v1976_v47, %v1964_v49 }
 0x1be   :  { %v1965_v54 = vpop.f32.mrf.mxu0 }
 0x1c0   :  { %v1989_v44 = vpop.f32.mrf.mxu2  ;;  %v1978_v55 = vpop.f32.mrf.mxu1 }
 0x1c1   :  { %v1990_v14 = vadd.f32 %v1989_v44, %v1977_v50 }
 0x1c2   :  { %v2002_v45 = vpop.f32.mrf.mxu3 }
 0x1c3   :  { %v2003_v52 = vadd.f32 %v2002_v45, %v1990_v14 }
 0x1c5   :  { %vm2013_vm10 = vcmp.gt.f32.partialorder %v2003_v52, 0.0  ;;  %v2021_v15 = vmul.f32 0.1, %v2003_v52 }
 0x1c7   :  { %v2029_v56 = vsel %vm2013_vm10, %v2003_v52, %v2021_v15 }
 0x1c8   :  { %v1991_v18 = vpop.f32.mrf.mxu2  ;;  %v2043_v51 = vrot.slane %v2029_v56, 2  ;;  %2345 = vmatmul.f32.vlgmr.msrb.gmra.mxu3 %v2029_v56 }
 0x1ca   :  { %v2004_v58 = vpop.f32.mrf.mxu3  ;;  %v2051_v59 = vsel %vm2046_vm5, %v2042_v57, %v2043_v51 }
 0x1cb   :  { %v2052_v60 = vsel %vm2048_vm6, %v2050_v1, %v2051_v59 }
 0x1cc   :  { %2056 = vst [vmem:[#allocation3 + $0x8] sm:$0xff] %v2052_v60 }
 0x1cd   :  { %2363 = dma.vmem_to_hbm [thread:$0]  %s2359_s30, 256, %s2361_s28, [#allocation4]  }
 0x1d8   :  { %v2206_v62 = vpop.f32.mrf.mxu0 }
 0x1d9   :  { %v2207_v63 = vadd.f32 %v3652_v61, %v2206_v62 }
 0x1da   :  { %v2226_v0 = vpop.f32.mrf.mxu1 }
 0x1db   :  { %v2227_v53 = vadd.f32 %v2226_v0, %v2207_v63 }
 0x1e0   :  { %v2246_v2 = vpop.f32.mrf.mxu2 }
 0x1e1   :  { %v2247_v3 = vadd.f32 %v2246_v2, %v2227_v53 }
 0x1e2   :  { %v2266_v4 = vpop.f32.mrf.mxu3 }
 0x1e3   :  { %v2267_v6 = vadd.f32 %v2266_v4, %v2247_v3 }
 0x1fa   :  { %v2286_v5 = vpop.f32.mrf.mxu0 }
 0x1fb   :  { %v2287_v8 = vadd.f32 %v2286_v5, %v2267_v6 }
 0x205   :  { %v2306_v7 = vpop.f32.mrf.mxu1 }
 0x206   :  { %v2307_v10 = vadd.f32 %v2306_v7, %v2287_v8 }
 0x22b   :  { %v2326_v9 = vpop.f32.mrf.mxu2 }
 0x22c   :  { %v2327_v11 = vadd.f32 %v2326_v9, %v2307_v10 }
 0x24b   :  { %v2346_v12 = vpop.f32.mrf.mxu3 }
 0x24c   :  { %v2347_v13 = vadd.f32 %v2346_v12, %v2327_v11 }
 0x24e   :  { %2350 = vst.msk [vmem:[%s5782_s5] sm:$0x3] %vm2349_vm11, %v2347_v13 }
 0x24f   :  { %3682 = dma.done.wait [#allocation4], 256  }
 0x250   :  { %3683 = vsyncadd [#allocation4], 4294967040 }
 0x251   :  { %2370 = vsyncpa [#allocation4], 1 }

</bundles_post_ra>
